<compile_context>
chip_gen: v6e
topology: v6e:2x2x1
jax: 0.10.0
libtpu: 0.0.40
codegen_flags: <defaults>
</compile_context>

<pallas_src>
import jax
import jax.numpy as jnp
from jax.experimental import pallas as pl
from jax.experimental.pallas import tpu as pltpu

LANE = 128
TB_MAX = 512   # batch rows per grid step; raise to 1024 on v6e (128 MiB VMEM)


def _round_up(n, m):
    return ((n + m - 1) // m) * m


def _make_kernel(lane_dense):
    def kernel(x_ref, w1_ref, b1_ref, w2_ref, b2_ref, o_ref):
        # Cast the streamed activation to bf16 in-kernel (no-op if pre-cast).
        x = x_ref[...].astype(jnp.bfloat16)
        # Linear 1: (TB, dimx_p) @ (dimx_p, hid_p), bf16 operands, f32 accumulation.
        h = jnp.dot(x, w1_ref[...], preferred_element_type=jnp.float32)
        h = h + b1_ref[...]                      # bias in f32
        h = jnp.maximum(h, 0.2 * h)              # LeakyReLU(0.2), single VPU max
        # Dropout(p=0) is the identity (module default).
        # TODO(synk): dropout with p > 0 (training mode) would need pltpu.prng_* masking.
        # Linear 2: (TB, hid_p) @ (hid_p, ncls_p), bf16 operands, f32 accumulation.
        out = jnp.dot(h.astype(jnp.bfloat16), w2_ref[...],
                      preferred_element_type=jnp.float32)
        out = out + b2_ref[...]
        if lane_dense:
            # num_classes == 1: only column 0 is real.  Transpose the (TB, 128)
            # tile (TB is a multiple of 128 -> clean XLU transpose) and emit a
            # single lane-dense (1, TB) row instead of a 128x-padded slab.
            o_ref[...] = jnp.transpose(out)[0:1, :].astype(o_ref.dtype)
        else:
            o_ref[...] = out.astype(o_ref.dtype)
    return kernel


def prepare_netD_ess_params(w1, b1, w2, b2):
    """One-time parameter preprocessing (hoisted out of the forward call):
    zero-pad every lane dim to a multiple of 128 and cast matmul weights to bf16.
    w1: (dimx, 1000), w2: (1000, num_classes) (i.e. transposed vs PyTorch storage)."""
    dimx, hidden = w1.shape
    num_classes = w2.shape[1]
    assert w2.shape[0] == hidden and b1.shape == (hidden,) and b2.shape == (num_classes,)

    dimx_p = _round_up(dimx, LANE)
    hid_p = _round_up(hidden, LANE)          # 1000 -> 1024
    ncls_p = _round_up(num_classes, LANE)    # 1    -> 128

    w1_p = jnp.zeros((dimx_p, hid_p), jnp.bfloat16).at[:dimx, :hidden].set(
        w1.astype(jnp.bfloat16))
    b1_p = jnp.zeros((1, hid_p), jnp.float32).at[0, :hidden].set(
        b1.astype(jnp.float32))
    w2_p = jnp.zeros((hid_p, ncls_p), jnp.bfloat16).at[:hidden, :num_classes].set(
        w2.astype(jnp.bfloat16))
    b2_p = jnp.zeros((1, ncls_p), jnp.float32).at[0, :num_classes].set(
        b2.astype(jnp.float32))

    return dict(w1=w1_p, b1=b1_p, w2=w2_p, b2=b2_p,
                dimx=dimx, hidden=hidden, num_classes=num_classes)


def netD_ess_forward(x, params):
    """x: (B, dimx) float32; params from prepare_netD_ess_params().
    Returns (B,) if num_classes == 1 else (B, num_classes)."""
    w1_p, b1_p, w2_p, b2_p = params["w1"], params["b1"], params["w2"], params["b2"]
    dimx, num_classes = params["dimx"], params["num_classes"]
    dimx_p, hid_p = w1_p.shape
    ncls_p = w2_p.shape[1]
    B = x.shape[0]
    assert x.shape[1] == dimx
    lane_dense = (num_classes == 1)

    # ---- batch tiling: TB a multiple of 128 (clean lanes + clean in-kernel
    # transpose), and >= 2 grid steps whenever B >= 256 so the "parallel" axis
    # spans both TensorCores on v7x.
    B128 = _round_up(max(B, 1), LANE)
    if B128 <= LANE:
        TB = LANE
    else:
        TB = min(TB_MAX, max(LANE, (B128 // 2 // LANE) * LANE))
    B_p = _round_up(B, TB)
    grid_b = B_p // TB
    # TODO(synk): for very large dimx (v5e >~3-4k, v7x >~8k, v6e >~16k) add a K
    # grid axis over dimx with a (TB, hid_p) f32 scratch accumulator so the W1
    # tile stays within each generation's VMEM budget.

    # ---- x: fast path feeds f32 straight to the kernel (cast to bf16 in-kernel,
    # 4 B/elem HBM); ragged shapes pay one fused pad+bf16 pass (8 B/elem).
    if B == B_p and dimx == dimx_p:
        x_in = x
    else:
        x_in = jnp.zeros((B_p, dimx_p), jnp.bfloat16).at[:B, :dimx].set(
            x.astype(jnp.bfloat16))

    # ---- output: lane-dense (grid_b, TB) row per tile for num_classes == 1,
    # padded (B_p, ncls_p) otherwise.
    if lane_dense:
        out_shape = jax.ShapeDtypeStruct((grid_b, TB), jnp.float32)
        out_spec = pl.BlockSpec((1, TB), lambda i: (i, 0))
        out_tile_bytes = TB * 4
    else:
        out_shape = jax.ShapeDtypeStruct((B_p, ncls_p), jnp.float32)
        out_spec = pl.BlockSpec((TB, ncls_p), lambda i: (i, 0))
        out_tile_bytes = TB * ncls_p * 4

    x_spec = pl.BlockSpec((TB, dimx_p), lambda i: (i, 0))

    def _const_spec(shape, single_buffer):
        idx = lambda i: (0,) * len(shape)
        if single_buffer:
            # Constant index_map -> the block is DMA'd once; single-buffer it to
            # halve its VMEM footprint.
            return pl.BlockSpec(shape, idx, pipeline_mode=pl.Buffered(1))
        return pl.BlockSpec(shape, idx)

    weight_bytes_once = (w1_p.size * 2 + w2_p.size * 2 + b1_p.size * 4 + b2_p.size * 4)
    flops = 2 * B_p * (dimx_p * hid_p + hid_p * ncls_p)
    bytes_accessed = (x_in.size * x_in.dtype.itemsize + weight_bytes_once
                      + out_shape.size * 4)

    def _vmem_limit(single_buffer):
        wbuf = 1 if single_buffer else 2
        need = (wbuf * weight_bytes_once
                + 2 * TB * dimx_p * x_in.dtype.itemsize      # x, double-buffered
                + 2 * out_tile_bytes                          # out, double-buffered
                + TB * hid_p * (4 + 2)                        # h (f32) + bf16 copy
                + TB * ncls_p * 4                             # second-matmul result
                + TB * dimx_p * 2)                            # in-kernel bf16 x copy
        return int(min(64 * 1024 * 1024, max(32 * 1024 * 1024, need * 3 // 2)))

    def _call(single_buffer):
        in_specs = [
            x_spec,                                     # x: tiled over batch
            _const_spec(w1_p.shape, single_buffer),     # W1: VMEM-resident
            _const_spec(b1_p.shape, single_buffer),     # b1
            _const_spec(w2_p.shape, single_buffer),     # W2
            _const_spec(b2_p.shape, single_buffer),     # b2
        ]
        return pl.pallas_call(
            _make_kernel(lane_dense),
            out_shape=out_shape,
            grid=(grid_b,),
            in_specs=in_specs,
            out_specs=out_spec,
            compiler_params=pltpu.CompilerParams(
                dimension_semantics=("parallel",),
                vmem_limit_bytes=_vmem_limit(single_buffer)),
            cost_estimate=pl.CostEstimate(
                flops=flops, transcendentals=0, bytes_accessed=bytes_accessed),
        )(x_in, w1_p, b1_p, w2_p, b2_p)

    # Keep the wrapper un-jitted so a Buffered(1) rejection (if any) is caught
    # here and we can retry with default pipelining.
    try:
        out = _call(True)
    except Exception:  # fallback: default double-buffered constant-index weights
        out = _call(False)

    if lane_dense:
        return out.reshape(B_p)[:B]                 # .view(B, 1).squeeze(1) -> (B,)
    return out[:B, :num_classes]                    # (B, num_classes)


if __name__ == "__main__":
    # Small, deterministic example consistent with the module's forward:
    # x is a flat feature vector per sample of size dimx.
    B = 2
    dimx = 32
    hidden = 1000          # fixed by the module definition
    num_classes = 1

    key = jax.random.PRNGKey(0)
    kx, kw1, kb1, kw2, kb2 = jax.random.split(key, 5)

    x = jax.random.normal(kx, (B, dimx), dtype=jnp.float32)

    # Deterministic parameter init (PyTorch-style uniform bounds).
    bound1 = 1.0 / (dimx ** 0.5)
    w1 = jax.random.uniform(kw1, (dimx, hidden), jnp.float32, -bound1, bound1)
    b1 = jax.random.uniform(kb1, (hidden,), jnp.float32, -bound1, bound1)
    bound2 = 1.0 / (hidden ** 0.5)
    w2 = jax.random.uniform(kw2, (hidden, num_classes), jnp.float32, -bound2, bound2)
    b2 = jax.random.uniform(kb2, (num_classes,), jnp.float32, -bound2, bound2)

    params = prepare_netD_ess_params(w1, b1, w2, b2)   # one-time weight prep
    out = netD_ess_forward(x, params)
    out = jax.block_until_ready(out)
    assert out.shape == (B,), out.shape

    # Cross-check against a pure-JAX reference using the same bf16 matmul /
    # f32 accumulation path as the kernel.
    h_ref = jnp.dot(x.astype(jnp.bfloat16), w1.astype(jnp.bfloat16),
                    preferred_element_type=jnp.float32) + b1
    h_ref = jnp.maximum(h_ref, 0.2 * h_ref)
    ref = (jnp.dot(h_ref.astype(jnp.bfloat16), w2.astype(jnp.bfloat16),
                   preferred_element_type=jnp.float32) + b2).reshape(B)
    assert jnp.allclose(out, ref, atol=2e-2, rtol=2e-2), (out, ref)

    # Looser sanity check against full-f32 math.
    h32 = x @ w1 + b1
    h32 = jnp.maximum(h32, 0.2 * h32)
    ref32 = (h32 @ w2 + b2).reshape(B)
    assert jnp.allclose(out, ref32, atol=5e-2, rtol=5e-2), (out, ref32)

    print("KERNEL_OK")
</pallas_src>

<mosaic_0001>
module attributes {stable_mosaic.version = 11 : i64} {
  func.func @kernel(%arg0: i32, %arg1: memref<128x128xbf16, #tpu.memory_space<vmem>>, %arg2: memref<128x1024xbf16, #tpu.memory_space<vmem>>, %arg3: memref<1x1024xf32, #tpu.memory_space<vmem>>, %arg4: memref<1024x128xbf16, #tpu.memory_space<vmem>>, %arg5: memref<1x128xf32, #tpu.memory_space<vmem>>, %arg6: memref<1x128xf32, #tpu.memory_space<vmem>>) attributes {dimension_semantics = [#tpu.dimension_semantics<parallel>], iteration_bounds = array<i64: 1>, scalar_prefetch = 0 : i64, scratch_operands = 0 : i64, tpu.core_type = #tpu.core_type<tc>, window_params = [{transform_indices = @transform_0, window_bounds = array<i64: 128, 128>}, {pipeline_mode = #tpu.pipeline_mode<synchronous>, transform_indices = @transform_1, window_bounds = array<i64: 128, 1024>}, {pipeline_mode = #tpu.pipeline_mode<synchronous>, transform_indices = @transform_2, window_bounds = array<i64: 1, 1024>}, {pipeline_mode = #tpu.pipeline_mode<synchronous>, transform_indices = @transform_3, window_bounds = array<i64: 1024, 128>}, {pipeline_mode = #tpu.pipeline_mode<synchronous>, transform_indices = @transform_4, window_bounds = array<i64: 1, 128>}, {transform_indices = @transform_5, window_bounds = array<i64: 1, 128>}]} {
    %c0 = arith.constant 0 : index
    %c0_0 = arith.constant 0 : index
    %0 = vector.load %arg1[%c0, %c0_0] : memref<128x128xbf16, #tpu.memory_space<vmem>>, vector<128x128xbf16>
    %c0_1 = arith.constant 0 : index
    %c0_2 = arith.constant 0 : index
    %1 = vector.load %arg2[%c0_1, %c0_2] : memref<128x1024xbf16, #tpu.memory_space<vmem>>, vector<128x1024xbf16>
    %cst = arith.constant dense<0.000000e+00> : vector<128x1024xf32>
    %2 = tpu.matmul %0, %1, %cst {dimension_numbers = #tpu.dot_dimension_numbers<[1], [0], [0], [1], [0, 0, 1, 1], [], []>} : vector<128x128xbf16>, vector<128x1024xbf16>, vector<128x1024xf32> -> vector<128x1024xf32>
    %c0_3 = arith.constant 0 : index
    %c0_4 = arith.constant 0 : index
    %3 = vector.load %arg3[%c0_3, %c0_4] : memref<1x1024xf32, #tpu.memory_space<vmem>>, vector<1x1024xf32>
    %4 = vector.broadcast %3 : vector<1x1024xf32> to vector<128x1024xf32>
    %5 = arith.addf %2, %4 : vector<128x1024xf32>
    %cst_5 = arith.constant 2.000000e-01 : f32
    %6 = vector.broadcast %cst_5 : f32 to vector<128x1024xf32>
    %7 = arith.mulf %6, %5 : vector<128x1024xf32>
    %8 = arith.maximumf %5, %7 : vector<128x1024xf32>
    %9 = arith.truncf %8 : vector<128x1024xf32> to vector<128x1024xbf16>
    %c0_6 = arith.constant 0 : index
    %c0_7 = arith.constant 0 : index
    %10 = vector.load %arg4[%c0_6, %c0_7] : memref<1024x128xbf16, #tpu.memory_space<vmem>>, vector<1024x128xbf16>
    %cst_8 = arith.constant dense<0.000000e+00> : vector<128x128xf32>
    %11 = tpu.matmul %9, %10, %cst_8 {dimension_numbers = #tpu.dot_dimension_numbers<[1], [0], [0], [1], [0, 0, 1, 1], [], []>} : vector<128x1024xbf16>, vector<1024x128xbf16>, vector<128x128xf32> -> vector<128x128xf32>
    %c0_9 = arith.constant 0 : index
    %c0_10 = arith.constant 0 : index
    %12 = vector.load %arg5[%c0_9, %c0_10] : memref<1x128xf32, #tpu.memory_space<vmem>>, vector<1x128xf32>
    %13 = vector.broadcast %12 : vector<1x128xf32> to vector<128x128xf32>
    %14 = arith.addf %11, %13 : vector<128x128xf32>
    %15 = tpu.transpose %14, [1, 0] : vector<128x128xf32> -> vector<128x128xf32>
    %16 = vector.extract_strided_slice %15 {offsets = [0, 0], sizes = [1, 128], strides = [1, 1]} : vector<128x128xf32> to vector<1x128xf32>
    %c0_11 = arith.constant 0 : index
    %c0_12 = arith.constant 0 : index
    %17 = vector.load %arg6[%c0_11, %c0_12] : memref<1x128xf32, #tpu.memory_space<vmem>>, vector<1x128xf32>
    tpu.vector_store %arg6[%c0_11, %c0_12], %16 {strides = array<i32>} : memref<1x128xf32, #tpu.memory_space<vmem>>, vector<1x128xf32>,
    return
  }
  func.func @transform_0(%arg0: i32) -> (i32, i32) {
    %c0_i32 = arith.constant 0 : i32
    %c0_i32_0 = arith.constant 0 : i32
    return %arg0, %c0_i32 : i32, i32
  }
  func.func @transform_1(%arg0: i32) -> (i32, i32) {
    %c0_i32 = arith.constant 0 : i32
    %c0_i32_0 = arith.constant 0 : i32
    %c0_i32_1 = arith.constant 0 : i32
    return %c0_i32, %c0_i32_0 : i32, i32
  }
  func.func @transform_2(%arg0: i32) -> (i32, i32) {
    %c0_i32 = arith.constant 0 : i32
    %c0_i32_0 = arith.constant 0 : i32
    %c0_i32_1 = arith.constant 0 : i32
    return %c0_i32, %c0_i32_0 : i32, i32
  }
  func.func @transform_3(%arg0: i32) -> (i32, i32) {
    %c0_i32 = arith.constant 0 : i32
    %c0_i32_0 = arith.constant 0 : i32
    %c0_i32_1 = arith.constant 0 : i32
    return %c0_i32, %c0_i32_0 : i32, i32
  }
  func.func @transform_4(%arg0: i32) -> (i32, i32) {
    %c0_i32 = arith.constant 0 : i32
    %c0_i32_0 = arith.constant 0 : i32
    %c0_i32_1 = arith.constant 0 : i32
    return %c0_i32, %c0_i32_0 : i32, i32
  }
  func.func @transform_5(%arg0: i32) -> (i32, i32) {
    %c0_i32 = arith.constant 0 : i32
    %c0_i32_0 = arith.constant 0 : i32
    return %arg0, %c0_i32 : i32, i32
  }
}

module attributes {stable_mosaic.version = 11 : i64} {
  func.func @kernel(%arg0: i32, %arg1: memref<128x128xbf16, #tpu.memory_space<vmem>>, %arg2: memref<128x1024xbf16, #tpu.memory_space<vmem>>, %arg3: memref<1x1024xf32, #tpu.memory_space<vmem>>, %arg4: memref<1024x128xbf16, #tpu.memory_space<vmem>>, %arg5: memref<1x128xf32, #tpu.memory_space<vmem>>, %arg6: memref<1x128xf32, #tpu.memory_space<vmem>>) attributes {dimension_semantics = [#tpu.dimension_semantics<parallel>], iteration_bounds = array<i64: 1>, scalar_prefetch = 0 : i64, scratch_operands = 0 : i64, tpu.core_type = #tpu.core_type<tc>, window_params = [{transform_indices = @transform_0, window_bounds = array<i64: 128, 128>}, {pipeline_mode = #tpu.pipeline_mode<synchronous>, transform_indices = @transform_1, window_bounds = array<i64: 128, 1024>}, {pipeline_mode = #tpu.pipeline_mode<synchronous>, transform_indices = @transform_2, window_bounds = array<i64: 1, 1024>}, {pipeline_mode = #tpu.pipeline_mode<synchronous>, transform_indices = @transform_3, window_bounds = array<i64: 1024, 128>}, {pipeline_mode = #tpu.pipeline_mode<synchronous>, transform_indices = @transform_4, window_bounds = array<i64: 1, 128>}, {transform_indices = @transform_5, window_bounds = array<i64: 1, 128>}]} {
    %c0 = arith.constant 0 : index
    %c0_0 = arith.constant 0 : index
    %0 = vector.load %arg1[%c0, %c0_0] : memref<128x128xbf16, #tpu.memory_space<vmem>>, vector<128x128xbf16>
    %c0_1 = arith.constant 0 : index
    %c0_2 = arith.constant 0 : index
    %1 = vector.load %arg2[%c0_1, %c0_2] : memref<128x1024xbf16, #tpu.memory_space<vmem>>, vector<128x1024xbf16>
    %cst = arith.constant dense<0.000000e+00> : vector<128x1024xf32>
    %2 = tpu.matmul %0, %1, %cst {dimension_numbers = #tpu.dot_dimension_numbers<[1], [0], [0], [1], [0, 0, 1, 1], [], []>} : vector<128x128xbf16>, vector<128x1024xbf16>, vector<128x1024xf32> -> vector<128x1024xf32>
    %c0_3 = arith.constant 0 : index
    %c0_4 = arith.constant 0 : index
    %3 = vector.load %arg3[%c0_3, %c0_4] : memref<1x1024xf32, #tpu.memory_space<vmem>>, vector<1x1024xf32>
    %4 = vector.broadcast %3 : vector<1x1024xf32> to vector<128x1024xf32>
    %5 = arith.addf %2, %4 : vector<128x1024xf32>
    %cst_5 = arith.constant 2.000000e-01 : f32
    %6 = vector.broadcast %cst_5 : f32 to vector<128x1024xf32>
    %7 = arith.mulf %6, %5 : vector<128x1024xf32>
    %8 = arith.maximumf %5, %7 : vector<128x1024xf32>
    %9 = arith.truncf %8 : vector<128x1024xf32> to vector<128x1024xbf16>
    %c0_6 = arith.constant 0 : index
    %c0_7 = arith.constant 0 : index
    %10 = vector.load %arg4[%c0_6, %c0_7] : memref<1024x128xbf16, #tpu.memory_space<vmem>>, vector<1024x128xbf16>
    %cst_8 = arith.constant dense<0.000000e+00> : vector<128x128xf32>
    %11 = tpu.matmul %9, %10, %cst_8 {dimension_numbers = #tpu.dot_dimension_numbers<[1], [0], [0], [1], [0, 0, 1, 1], [], []>} : vector<128x1024xbf16>, vector<1024x128xbf16>, vector<128x128xf32> -> vector<128x128xf32>
    %c0_9 = arith.constant 0 : index
    %c0_10 = arith.constant 0 : index
    %12 = vector.load %arg5[%c0_9, %c0_10] : memref<1x128xf32, #tpu.memory_space<vmem>>, vector<1x128xf32>
    %13 = vector.broadcast %12 : vector<1x128xf32> to vector<128x128xf32>
    %14 = arith.addf %11, %13 : vector<128x128xf32>
    %15 = tpu.transpose %14, [1, 0] : vector<128x128xf32> -> vector<128x128xf32>
    %16 = vector.extract_strided_slice %15 {offsets = [0, 0], sizes = [1, 128], strides = [1, 1]} : vector<128x128xf32> to vector<1x128xf32>
    %c0_11 = arith.constant 0 : index
    %c0_12 = arith.constant 0 : index
    %17 = vector.load %arg6[%c0_11, %c0_12] : memref<1x128xf32, #tpu.memory_space<vmem>>, vector<1x128xf32>
    tpu.vector_store %arg6[%c0_11, %c0_12], %16 {strides = array<i32>} : memref<1x128xf32, #tpu.memory_space<vmem>>, vector<1x128xf32>,
    return
  }
  func.func @transform_0(%arg0: i32) -> (i32, i32) {
    %c0_i32 = arith.constant 0 : i32
    %c0_i32_0 = arith.constant 0 : i32
    return %arg0, %c0_i32 : i32, i32
  }
  func.func @transform_1(%arg0: i32) -> (i32, i32) {
    %c0_i32 = arith.constant 0 : i32
    %c0_i32_0 = arith.constant 0 : i32
    %c0_i32_1 = arith.constant 0 : i32
    return %c0_i32, %c0_i32_0 : i32, i32
  }
  func.func @transform_2(%arg0: i32) -> (i32, i32) {
    %c0_i32 = arith.constant 0 : i32
    %c0_i32_0 = arith.constant 0 : i32
    %c0_i32_1 = arith.constant 0 : i32
    return %c0_i32, %c0_i32_0 : i32, i32
  }
  func.func @transform_3(%arg0: i32) -> (i32, i32) {
    %c0_i32 = arith.constant 0 : i32
    %c0_i32_0 = arith.constant 0 : i32
    %c0_i32_1 = arith.constant 0 : i32
    return %c0_i32, %c0_i32_0 : i32, i32
  }
  func.func @transform_4(%arg0: i32) -> (i32, i32) {
    %c0_i32 = arith.constant 0 : i32
    %c0_i32_0 = arith.constant 0 : i32
    %c0_i32_1 = arith.constant 0 : i32
    return %c0_i32, %c0_i32_0 : i32, i32
  }
  func.func @transform_5(%arg0: i32) -> (i32, i32) {
    %c0_i32 = arith.constant 0 : i32
    %c0_i32_0 = arith.constant 0 : i32
    return %arg0, %c0_i32 : i32, i32
  }
}

</mosaic_0001>

<bundles_post_ra>
// kernel: tpu_custom_call.1
= control target key start
LH: loop header
LB: loop body
LE: loop exit
PB: predicated region body
PF: predicated region fallthrough
CT: control target
= control target key end

     0   :  { %10 = vsyncpa [#allocation3], 0  ;;  %s3469_s0 = inlined_call_operand.hbm [shape: bf16[128,128], index: 0, kind: input, shape index: {}]   ;;  %s3470_s1 = inlined_call_operand.hbm [shape: bf16[128,1024], index: 1, kind: input, shape index: {}]   ;;  %s3471_s2 = inlined_call_operand.hbm [shape: f32[1,1024], index: 2, kind: input, shape index: {}]   ;;  %s3472_s3 = inlined_call_operand.hbm [shape: bf16[1024,128], index: 3, kind: input, shape index: {}]   ;;  %s3473_s4 = inlined_call_operand.vmem [shape: f32[1,128], index: 4, kind: input, shape index: {}]   ;;  %s3474_s5 = inlined_call_operand.hbm [shape: f32[1,128], index: 5, kind: output, shape index: {}]  }
   0x1   :  { %11 = vsyncpa [#allocation6], 0 }
   0x2   :  { %12 = vsyncpa [#allocation9], 0 }
   0x3   :  { %13 = vsyncpa [#allocation4], 0  ;;  %s2877_s18 = smov [#allocation5]  }
   0x4   :  { %s31_s19 = sshll.u32 %s2877_s18, 4  ;;  %s32_s19 = int_to_ptr.vmem [resolvable:$true] %s31_s19 }
   0x5   :  { %s2777_s20 = scalar_lea.vmem %s32_s19, 8192  ;;  %p2782_p1 = scmp.lt.s32.totalorder %s32_s19, %s32_s19 }
   0x6   :  { %p2778_p0 = scmp.ne.s32.totalorder %s32_s19, %s2777_s20  ;;  %p2783_p2 = scmp.lt.s32.totalorder %s2777_s20, %s2777_s20 }
   0x8   :  { %p2784_p3 = por %p2783_p2, %p2782_p1 }
   0xa   :  { %p2785_p4 = pnand %p2784_p3, %p2778_p0 }
   0xc   :  { %2788 = shalt.err (!%p2785_p4)
}
   0xd   :  { %s2878_s21 = smov 512   ;;  %s2879_s22 = smov 32  }
   0xe   :  { %37 = dma.hbm_to_vmem [thread:$0]  %s3470_s1, 8192, %s32_s19, [#allocation6], %s2878_s21, %s2878_s21, %s2879_s22  }
   0xf   :  { %s2880_s25 = smov [#allocation2]  }
  0x10   :  { %s19_s26 = sshll.u32 %s2880_s25, 4  ;;  %s20_s26 = int_to_ptr.vmem [resolvable:$true] %s19_s26 }
  0x11   :  { %s2797_s27 = scalar_lea.vmem %s20_s26, 1024  ;;  %p2802_p6 = scmp.lt.s32.totalorder %s20_s26, %s20_s26 }
  0x12   :  { %p2798_p5 = scmp.ne.s32.totalorder %s20_s26, %s2797_s27  ;;  %p2803_p7 = scmp.lt.s32.totalorder %s2797_s27, %s2797_s27 }
  0x14   :  { %p2804_p8 = por %p2803_p7, %p2802_p6 }
  0x16   :  { %p2805_p9 = pnand %p2804_p8, %p2798_p5 }
  0x18   :  { %2808 = shalt.err (!%p2805_p9)
}
  0x19   :  { %s2881_s28 = smov 64   ;;  %s2882_s29 = smov 4  }
  0x1a   :  { %25 = dma.hbm_to_vmem [thread:$0]  %s3469_s0, 1024, %s20_s26, [#allocation3], %s2881_s28, %s2881_s28, %s2882_s29  }
  0x1b   :  { %s2883_s7 = smov [#allocation7]   ;;  %s2884_s9 = smov [#allocation8]  }
  0x1c   :  { %s44_s8 = sshll.u32 %s2883_s7, 4  ;;  %s53_s1 = sshll.u32 %s2884_s9, 4  ;;  %s45_s8 = int_to_ptr.vmem [resolvable:$true] %s44_s8  ;;  %s54_s1 = int_to_ptr.vmem [resolvable:$true] %s53_s1 }
  0x1d   :  { %s2817_s10 = scalar_lea.vmem %s45_s8, 128  ;;  %p2822_p11 = scmp.lt.s32.totalorder %s45_s8, %s45_s8 }
  0x1e   :  { %p2818_p10 = scmp.ne.s32.totalorder %s45_s8, %s2817_s10  ;;  %p2823_p12 = scmp.lt.s32.totalorder %s2817_s10, %s2817_s10 }
  0x20   :  { %p2824_p13 = por %p2823_p12, %p2822_p11 }
  0x22   :  { %p2825_p0 = pnand %p2824_p13, %p2818_p10 }
  0x24   :  { %2828 = shalt.err (!%p2825_p0)
}
  0x25   :  { %47 = dma.hbm_to_vmem [thread:$0]  %s3471_s2, 128, %s45_s8, [#allocation6]  }
  0x26   :  { %s2837_s13 = scalar_lea.vmem %s54_s1, 8192  ;;  %p2842_p2 = scmp.lt.s32.totalorder %s54_s1, %s54_s1 }
  0x27   :  { %p2838_p1 = scmp.ne.s32.totalorder %s54_s1, %s2837_s13  ;;  %p2843_p3 = scmp.lt.s32.totalorder %s2837_s13, %s2837_s13 }
  0x29   :  { %p2844_p4 = por %p2843_p3, %p2842_p2 }
  0x2b   :  { %p2845_p5 = pnand %p2844_p4, %p2838_p1 }
  0x2d   :  { %2848 = shalt.err (!%p2845_p5)
}
  0x2e   :  { %59 = dma.hbm_to_vmem [thread:$0]  %s3472_s3, 8192, %s54_s1, [#allocation9], %s2881_s28, %s2881_s28, %s2882_s29  }
  0x2f   :  { %2869 = dma.done.wait [#allocation3], 1024  }
  0x30   :  { %2870 = vsyncadd [#allocation3], 4294966272 }
  0x31   :  { %2871 = dma.done.wait [#allocation6], 8320  }
  0x32   :  { %2872 = vsyncadd [#allocation6], 4294958976 }
  0x33   :  { %2873 = dma.done.wait [#allocation9], 8192  }
  0x34   :  { %2874 = vsyncadd [#allocation9], 4294959104  ;;  %v2885_v0 = vmov 0   ;;  %v147_v1 = vld [vmem:[#allocation5 + $0x1c0] sm:$0xff]  ;;  %v148_v3 = vld [vmem:[#allocation5 + $0x1c8] sm:$0xff] }
  0x35   :  { %597 = vmatprep.mubr.bf16.mxu0 %v2885_v0  ;;  %710 = vmatprep.mubr.bf16.mxu1 %v2885_v0  ;;  %v151_v2 = vld [vmem:[#allocation5 + $0x1e0] sm:$0xff]  ;;  %v152_v5 = vld [vmem:[#allocation5 + $0x1e8] sm:$0xff]  ;;  %v149_v63 = vld [vmem:[#allocation5 + $0x1d0] sm:$0xff] }
  0x36   :  { %v2359_v4 = vcombine.high %v147_v1, %v151_v2  ;;  %v2358_v6 = vcombine.low %v147_v1, %v151_v2  ;;  %v139_v7 = vld [vmem:[#allocation5 + $0x180] sm:$0xff]  ;;  %v2361_v9 = vcombine.high %v148_v3, %v152_v5  ;;  %v2360_v10 = vcombine.low %v148_v3, %v152_v5  ;;  %v140_v12 = vld [vmem:[#allocation5 + $0x188] sm:$0xff]  ;;  %v153_v1 = vld [vmem:[#allocation5 + $0x1f0] sm:$0xff] }
  0x37   :  { %v143_v8 = vld [vmem:[#allocation5 + $0x1a0] sm:$0xff]  ;;  %v144_v13 = vld [vmem:[#allocation5 + $0x1a8] sm:$0xff]  ;;  %v150_v2 = vld [vmem:[#allocation5 + $0x1d8] sm:$0xff] }
  0x38   :  { %v2351_v11 = vcombine.high %v139_v7, %v143_v8  ;;  %v131_v14 = vld [vmem:[#allocation5 + $0x140] sm:$0xff]  ;;  %565 = vmatprep.subr.bf16.mxu0 %v2359_v4  ;;  %v2353_v15 = vcombine.high %v140_v12, %v144_v13  ;;  %v132_v17 = vld [vmem:[#allocation5 + $0x148] sm:$0xff]  ;;  %678 = vmatprep.subr.bf16.mxu1 %v2361_v9  ;;  %v2350_v19 = vcombine.low %v139_v7, %v143_v8  ;;  %v154_v3 = vld [vmem:[#allocation5 + $0x1f8] sm:$0xff] }
  0x39   :  { %v135_v16 = vld [vmem:[#allocation5 + $0x160] sm:$0xff]  ;;  %v136_v18 = vld [vmem:[#allocation5 + $0x168] sm:$0xff]  ;;  %566 = vmatpush1.bf16.msra.mxu0 %v2358_v6  ;;  %679 = vmatpush1.bf16.msra.mxu1 %v2360_v10  ;;  %v2352_v20 = vcombine.low %v140_v12, %v144_v13  ;;  %v2363_v7 = vcombine.high %v149_v63, %v153_v1  ;;  %v141_v8 = vld [vmem:[#allocation5 + $0x190] sm:$0xff]  ;;  %v2365_v10 = vcombine.high %v150_v2, %v154_v3 }
  0x3a   :  { %567 = vmatprep.subr.bf16.mxu0 %v2351_v11  ;;  %v2343_v21 = vcombine.high %v131_v14, %v135_v16  ;;  %680 = vmatprep.subr.bf16.mxu1 %v2353_v15  ;;  %v2345_v22 = vcombine.high %v132_v17, %v136_v18  ;;  %v123_v23 = vld [vmem:[#allocation5 + $0x100] sm:$0xff]  ;;  %v124_v25 = vld [vmem:[#allocation5 + $0x108] sm:$0xff]  ;;  %v2342_v27 = vcombine.low %v131_v14, %v135_v16  ;;  %v145_v9 = vld [vmem:[#allocation5 + $0x1b0] sm:$0xff] }
  0x3b   :  { %v127_v24 = vld [vmem:[#allocation5 + $0x120] sm:$0xff]  ;;  %v128_v26 = vld [vmem:[#allocation5 + $0x128] sm:$0xff]  ;;  %v2344_v28 = vcombine.low %v132_v17, %v136_v18  ;;  %v142_v11 = vld [vmem:[#allocation5 + $0x198] sm:$0xff]  ;;  %v2362_v13 = vcombine.low %v149_v63, %v153_v1  ;;  %v2364_v15 = vcombine.low %v150_v2, %v154_v3  ;;  %v2355_v17 = vcombine.high %v141_v8, %v145_v9 }
  0x3c   :  { %v2335_v29 = vcombine.high %v123_v23, %v127_v24  ;;  %v2337_v30 = vcombine.high %v124_v25, %v128_v26  ;;  %v115_v31 = vld [vmem:[#allocation5 + $0xc0] sm:$0xff]  ;;  %v116_v33 = vld [vmem:[#allocation5 + $0xc8] sm:$0xff]  ;;  %v2334_v35 = vcombine.low %v123_v23, %v127_v24  ;;  %v2336_v36 = vcombine.low %v124_v25, %v128_v26  ;;  %v146_v12 = vld [vmem:[#allocation5 + $0x1b8] sm:$0xff] }
  0x3d   :  { %568 = vmatpush1.bf16.msra.mxu0 %v2350_v19  ;;  %681 = vmatpush1.bf16.msra.mxu1 %v2352_v20  ;;  %v119_v32 = vld [vmem:[#allocation5 + $0xe0] sm:$0xff]  ;;  %v120_v34 = vld [vmem:[#allocation5 + $0xe8] sm:$0xff]  ;;  %v133_v14 = vld [vmem:[#allocation5 + $0x150] sm:$0xff]  ;;  %v2357_v19 = vcombine.high %v142_v11, %v146_v12  ;;  %v2356_v23 = vcombine.low %v142_v11, %v146_v12 }
  0x3e   :  { %569 = vmatprep.subr.bf16.mxu0 %v2343_v21  ;;  %682 = vmatprep.subr.bf16.mxu1 %v2345_v22  ;;  %v2327_v37 = vcombine.high %v115_v31, %v119_v32  ;;  %v2329_v38 = vcombine.high %v116_v33, %v120_v34  ;;  %v107_v39 = vld [vmem:[#allocation5 + $0x80] sm:$0xff]  ;;  %v108_v41 = vld [vmem:[#allocation5 + $0x88] sm:$0xff]  ;;  %v2326_v43 = vcombine.low %v115_v31, %v119_v32  ;;  %v137_v16 = vld [vmem:[#allocation5 + $0x170] sm:$0xff] }
  0x3f   :  { %v111_v40 = vld [vmem:[#allocation5 + $0xa0] sm:$0xff]  ;;  %v112_v42 = vld [vmem:[#allocation5 + $0xa8] sm:$0xff]  ;;  %v2328_v44 = vcombine.low %v116_v33, %v120_v34  ;;  %v134_v18 = vld [vmem:[#allocation5 + $0x158] sm:$0xff]  ;;  %v2354_v21 = vcombine.low %v141_v8, %v145_v9  ;;  %v2347_v24 = vcombine.high %v133_v14, %v137_v16 }
  0x40   :  { %v2319_v45 = vcombine.high %v107_v39, %v111_v40  ;;  %v2321_v46 = vcombine.high %v108_v41, %v112_v42  ;;  %v99_v47 = vld [vmem:[#allocation5 + $0x40] sm:$0xff]  ;;  %v100_v49 = vld [vmem:[#allocation5 + $0x48] sm:$0xff]  ;;  %v2318_v51 = vcombine.low %v107_v39, %v111_v40  ;;  %v2320_v52 = vcombine.low %v108_v41, %v112_v42  ;;  %v138_v20 = vld [vmem:[#allocation5 + $0x178] sm:$0xff] }
  0x41   :  { %570 = vmatpush1.bf16.msra.mxu0 %v2342_v27  ;;  %683 = vmatpush1.bf16.msra.mxu1 %v2344_v28  ;;  %v103_v48 = vld [vmem:[#allocation5 + $0x60] sm:$0xff]  ;;  %v104_v50 = vld [vmem:[#allocation5 + $0x68] sm:$0xff]  ;;  %v125_v25 = vld [vmem:[#allocation5 + $0x110] sm:$0xff]  ;;  %v2349_v26 = vcombine.high %v134_v18, %v138_v20  ;;  %v2348_v32 = vcombine.low %v134_v18, %v138_v20 }
  0x42   :  { %571 = vmatprep.subr.bf16.mxu0 %v2335_v29  ;;  %684 = vmatprep.subr.bf16.mxu1 %v2337_v30  ;;  %v2311_v53 = vcombine.high %v99_v47, %v103_v48  ;;  %v91_v54 = vld [vmem:[#allocation5] sm:$0xff]  ;;  %v2313_v55 = vcombine.high %v100_v49, %v104_v50  ;;  %v92_v57 = vld [vmem:[#allocation5 + $0x8] sm:$0xff]  ;;  %v2310_v59 = vcombine.low %v99_v47, %v103_v48  ;;  %v129_v27 = vld [vmem:[#allocation5 + $0x130] sm:$0xff] }
  0x43   :  { %v95_v56 = vld [vmem:[#allocation5 + $0x20] sm:$0xff]  ;;  %v96_v58 = vld [vmem:[#allocation5 + $0x28] sm:$0xff]  ;;  %v2312_v60 = vcombine.low %v100_v49, %v104_v50  ;;  %v126_v28 = vld [vmem:[#allocation5 + $0x118] sm:$0xff]  ;;  %v2346_v30 = vcombine.low %v133_v14, %v137_v16  ;;  %v2339_v33 = vcombine.high %v125_v25, %v129_v27  ;;  %v2338_v39 = vcombine.low %v125_v25, %v129_v27 }
  0x44   :  { %v2303_v61 = vcombine.high %v91_v54, %v95_v56  ;;  %v2305_v62 = vcombine.high %v92_v57, %v96_v58  ;;  %v2302_v4 = vcombine.low %v91_v54, %v95_v56  ;;  %v2304_v5 = vcombine.low %v92_v57, %v96_v58  ;;  %v2931_v6 = vld [vmem:[#allocation2] sm:$0xff]   ;;  %v2936_v22 = vld [vmem:[#allocation2 + $0x8] sm:$0xff]   ;;  %v130_v29 = vld [vmem:[#allocation5 + $0x138] sm:$0xff] }
  0x45   :  { %572 = vmatpush1.bf16.msra.mxu0 %v2334_v35  ;;  %685 = vmatpush1.bf16.msra.mxu1 %v2336_v36  ;;  %v117_v31 = vld [vmem:[#allocation5 + $0xd0] sm:$0xff]  ;;  %v2341_v35 = vcombine.high %v126_v28, %v130_v29  ;;  %v118_v36 = vld [vmem:[#allocation5 + $0xd8] sm:$0xff]  ;;  %v2340_v41 = vcombine.low %v126_v28, %v130_v29  ;;  %v2707_v9 = vld [vmem:[#allocation8 + $0xf8] sm:$0xff]  }
  0x46   :  { %573 = vmatprep.subr.bf16.mxu0 %v2327_v37  ;;  %686 = vmatprep.subr.bf16.mxu1 %v2329_v38  ;;  %v121_v34 = vld [vmem:[#allocation5 + $0xf0] sm:$0xff]  ;;  %v122_v37 = vld [vmem:[#allocation5 + $0xf8] sm:$0xff]  ;;  %v2961_v11 = vld [vmem:[#allocation2 + $0x28] sm:$0xff]  }
  0x47   :  { %v2943_v38 = vld [vmem:[#allocation2 + $0x10] sm:$0xff]   ;;  %v2331_v42 = vcombine.high %v117_v31, %v121_v34  ;;  %v2330_v47 = vcombine.low %v117_v31, %v121_v34  ;;  %v2332_v49 = vcombine.low %v118_v36, %v122_v37  ;;  %v106_v54 = vld [vmem:[#allocation5 + $0x78] sm:$0xff]  ;;  %v2706_v14 = vld [vmem:[#allocation8 + $0x38] sm:$0xff]  }
  0x48   :  { %v109_v40 = vld [vmem:[#allocation5 + $0x90] sm:$0xff]  ;;  %v2709_v16 = vld [vmem:[#allocation8 + $0x70] sm:$0xff]   ;;  %v2717_v25 = vld [vmem:[#allocation8 + $0x60] sm:$0xff]  }
  0x49   :  { %574 = vmatpush1.bf16.msra.mxu0 %v2326_v43  ;;  %687 = vmatpush1.bf16.msra.mxu1 %v2328_v44  ;;  %v113_v43 = vld [vmem:[#allocation5 + $0xb0] sm:$0xff]  ;;  %v2333_v44 = vcombine.high %v118_v36, %v122_v37  ;;  %v2710_v18 = vld [vmem:[#allocation8 + $0x30] sm:$0xff]   ;;  %v2720_v27 = vld [vmem:[#allocation8 + $0xa0] sm:$0xff]  }
  0x4a   :  { %575 = vmatprep.subr.bf16.mxu0 %v2319_v45  ;;  %688 = vmatprep.subr.bf16.mxu1 %v2321_v46  ;;  %v110_v45 = vld [vmem:[#allocation5 + $0x98] sm:$0xff]  ;;  %v101_v48 = vld [vmem:[#allocation5 + $0x50] sm:$0xff]  ;;  %v2323_v50 = vcombine.high %v109_v40, %v113_v43  ;;  %v2322_v56 = vcombine.low %v109_v40, %v113_v43  ;;  %v2721_v28 = vld [vmem:[#allocation8 + $0x58] sm:$0xff]  }
  0x4b   :  { %v114_v46 = vld [vmem:[#allocation5 + $0xb8] sm:$0xff]  ;;  %v93_v57 = vld [vmem:[#allocation5 + $0x10] sm:$0xff]  ;;  %v2723_v29 = vld [vmem:[#allocation8 + $0xd8] sm:$0xff]  }
  0x4c   :  { %v97_v58 = vld [vmem:[#allocation5 + $0x30] sm:$0xff]  ;;  %v2724_v31 = vld [vmem:[#allocation8 + $0x98] sm:$0xff]   ;;  %v2728_v34 = vld [vmem:[#allocation8 + $0x90] sm:$0xff]  }
  0x4d   :  { %576 = vmatpush1.bf16.msra.mxu0 %v2318_v51  ;;  %689 = vmatpush1.bf16.msra.mxu1 %v2320_v52  ;;  %v105_v51 = vld [vmem:[#allocation5 + $0x70] sm:$0xff]  ;;  %v2325_v52 = vcombine.high %v110_v45, %v114_v46  ;;  %v2307_v3 = vcombine.high %v93_v57, %v97_v58  ;;  %v2306_v8 = vcombine.low %v93_v57, %v97_v58  ;;  %v2733_v40 = vld [vmem:[#allocation8 + $0x40] sm:$0xff]   ;;  %v2737_v43 = vld [vmem:[#allocation8 + $0x178] sm:$0xff]  }
  0x4e   :  { %577 = vmatprep.subr.bf16.mxu0 %v2311_v53  ;;  %690 = vmatprep.subr.bf16.mxu1 %v2313_v55  ;;  %v102_v53 = vld [vmem:[#allocation5 + $0x58] sm:$0xff]  ;;  %v2314_v1 = vcombine.low %v101_v48, %v105_v51  ;;  %v2967_v12 = vld [vmem:[#allocation2 + $0x30] sm:$0xff]  }
  0x4f   :  { %v2949_v55 = vld [vmem:[#allocation2 + $0x18] sm:$0xff]   ;;  %v2317_v63 = vcombine.high %v102_v53, %v106_v54  ;;  %v2316_v2 = vcombine.low %v102_v53, %v106_v54  ;;  %v2713_v20 = vld [vmem:[#allocation8 + $0x68] sm:$0xff]  }
  0x50   :  { %v2731_v36 = vld [vmem:[#allocation8 + $0xc8] sm:$0xff]  }
  0x51   :  { %578 = vmatpush1.bf16.msra.mxu0 %v2310_v59  ;;  %691 = vmatpush1.bf16.msra.mxu1 %v2312_v60  ;;  %v2324_v59 = vcombine.low %v110_v45, %v114_v46  ;;  %v2315_v60 = vcombine.high %v101_v48, %v105_v51  ;;  %v2730_v37 = vld [vmem:[#allocation8 + $0x8] sm:$0xff]   ;;  %v157_v45 = vlaneseq  ;;  %v3012_v48 = vld [vmem:[#allocation7] sm:$0xff] }
  0x52   :  { %579 = vmatprep.subr.bf16.mxu0 %v2303_v61  ;;  %692 = vmatprep.subr.bf16.mxu1 %v2305_v62  ;;  %v94_v61 = vld [vmem:[#allocation5 + $0x18] sm:$0xff] }
  0x53   :  { %v98_v62 = vld [vmem:[#allocation5 + $0x38] sm:$0xff]  ;;  %v3009_v46 = vshrl.u32 %v157_v45, 7 }
  0x55   :  { %580 = vmatpush1.bf16.msra.mxu0 %v2302_v4  ;;  %693 = vmatpush1.bf16.msra.mxu1 %v2304_v5  ;;  %v2309_v4 = vcombine.high %v94_v61, %v98_v62  ;;  %v2705_v5 = vld [vmem:[#allocation8 + $0x78] sm:$0xff]   ;;  %v167_v51 = vsub.s32 2, %v3009_v46 }
  0x56   :  { %791 = vmatprep.subr.bf16.mxu0 %v2363_v7  ;;  %904 = vmatprep.subr.bf16.mxu1 %v2365_v10  ;;  %v2955_v7 = vld [vmem:[#allocation2 + $0x20] sm:$0xff]   ;;  %v2308_v10 = vcombine.low %v94_v61, %v98_v62 }
  0x58   :  { %598 = vmatmul.mubr.bf16.vlgmr.msra.gmra.mxu0 %v2931_v6  ;;  %711 = vmatmul.mubr.bf16.vlgmr.msra.gmra.mxu1 %v2931_v6 }
  0x59   :  { %792 = vmatpush1.bf16.msra.mxu0 %v2362_v13  ;;  %905 = vmatpush1.bf16.msra.mxu1 %v2364_v15  ;;  %v2973_v13 = vld [vmem:[#allocation2 + $0x38] sm:$0xff]   ;;  %v2708_v15 = vld [vmem:[#allocation8 + $0xb8] sm:$0xff]  }
  0x5a   :  { %607 = vmatprep.mubr.bf16.mxu0 %v2885_v0  ;;  %720 = vmatprep.mubr.bf16.mxu1 %v2885_v0 }
  0x5b   :  { %793 = vmatprep.subr.bf16.mxu0 %v2355_v17  ;;  %906 = vmatprep.subr.bf16.mxu1 %v2357_v19  ;;  %v2711_v17 = vld [vmem:[#allocation8 + $0xf0] sm:$0xff]  }
  0x5c   :  { %v2712_v19 = vld [vmem:[#allocation8 + $0xb0] sm:$0xff]  }
  0x5d   :  { %794 = vmatpush1.bf16.msra.mxu0 %v2354_v21  ;;  %907 = vmatpush1.bf16.msra.mxu1 %v2356_v23  ;;  %v2715_v21 = vld [vmem:[#allocation8 + $0xe8] sm:$0xff]  }
  0x5e   :  { %795 = vmatprep.subr.bf16.mxu0 %v2347_v24  ;;  %908 = vmatprep.subr.bf16.mxu1 %v2349_v26  ;;  %v2714_v23 = vld [vmem:[#allocation8 + $0x28] sm:$0xff]   ;;  %v2718_v26 = vld [vmem:[#allocation8 + $0x20] sm:$0xff]  }
  0x5f   :  { %v2716_v24 = vld [vmem:[#allocation8 + $0xa8] sm:$0xff]  }
  0x60   :  { %608 = vmatmul.mubr.bf16.gmra.mxu0 %v2936_v22  ;;  %721 = vmatmul.mubr.bf16.gmra.mxu1 %v2936_v22 }
  0x61   :  { %617 = vmatprep.mubr.bf16.mxu0 %v2885_v0  ;;  %730 = vmatprep.mubr.bf16.mxu1 %v2885_v0 }
  0x62   :  { %796 = vmatpush1.bf16.msra.mxu0 %v2346_v30  ;;  %909 = vmatpush1.bf16.msra.mxu1 %v2348_v32  ;;  %v2722_v30 = vld [vmem:[#allocation8 + $0x18] sm:$0xff]   ;;  %v2725_v32 = vld [vmem:[#allocation8 + $0x50] sm:$0xff]  }
  0x63   :  { %797 = vmatprep.subr.bf16.mxu0 %v2339_v33  ;;  %910 = vmatprep.subr.bf16.mxu1 %v2341_v35  ;;  %v2726_v33 = vld [vmem:[#allocation8 + $0x10] sm:$0xff]   ;;  %v2729_v35 = vld [vmem:[#allocation8 + $0x48] sm:$0xff]  }
  0x66   :  { %798 = vmatpush1.bf16.msra.mxu0 %v2338_v39  ;;  %911 = vmatpush1.bf16.msra.mxu1 %v2340_v41  ;;  %v2732_v39 = vld [vmem:[#allocation8 + $0x88] sm:$0xff]   ;;  %v2734_v41 = vld [vmem:[#allocation8] sm:$0xff]  }
  0x67   :  { %799 = vmatprep.subr.bf16.mxu0 %v2331_v42  ;;  %912 = vmatprep.subr.bf16.mxu1 %v2333_v44  ;;  %v2736_v42 = vld [vmem:[#allocation8 + $0x80] sm:$0xff]   ;;  %v2739_v44 = vld [vmem:[#allocation8 + $0x1f8] sm:$0xff]  }
  0x68   :  { %618 = vmatmul.mubr.bf16.gmra.mxu0 %v2943_v38  ;;  %731 = vmatmul.mubr.bf16.gmra.mxu1 %v2943_v38 }
  0x69   :  { %627 = vmatprep.mubr.bf16.mxu0 %v2885_v0  ;;  %740 = vmatprep.mubr.bf16.mxu1 %v2885_v0 }
  0x6a   :  { %800 = vmatpush1.bf16.msra.mxu0 %v2330_v47  ;;  %913 = vmatpush1.bf16.msra.mxu1 %v2332_v49  ;;  %v159_v47 = vsub.s32 0, %v3009_v46  ;;  %v163_v49 = vsub.s32 1, %v3009_v46 }
  0x6b   :  { %801 = vmatprep.subr.bf16.mxu0 %v2323_v50  ;;  %914 = vmatprep.subr.bf16.mxu1 %v2325_v52  ;;  %v171_v50 = vsub.s32 3, %v3009_v46 }
  0x6c   :  { %v3018_v52 = vrot.slane %v3012_v48, %v159_v47 }
  0x6d   :  { %v3024_v54 = vrot.slane %v3012_v48, %v171_v50  ;;  %v2743_v50 = vld [vmem:[#allocation8 + $0x1f0] sm:$0xff]  }
  0x6e   :  { %802 = vmatpush1.bf16.msra.mxu0 %v2322_v56  ;;  %915 = vmatpush1.bf16.msra.mxu1 %v2324_v59 }
  0x6f   :  { %803 = vmatprep.subr.bf16.mxu0 %v2315_v60  ;;  %916 = vmatprep.subr.bf16.mxu1 %v2317_v63 }
  0x70   :  { %628 = vmatmul.mubr.bf16.gmra.mxu0 %v2949_v55  ;;  %741 = vmatmul.mubr.bf16.gmra.mxu1 %v2949_v55 }
  0x71   :  { %637 = vmatprep.mubr.bf16.mxu0 %v2885_v0  ;;  %750 = vmatprep.mubr.bf16.mxu1 %v2885_v0 }
  0x72   :  { %804 = vmatpush1.bf16.msra.mxu0 %v2314_v1  ;;  %917 = vmatpush1.bf16.msra.mxu1 %v2316_v2 }
  0x73   :  { %805 = vmatprep.subr.bf16.mxu0 %v2307_v3  ;;  %918 = vmatprep.subr.bf16.mxu1 %v2309_v4 }
  0x76   :  { %806 = vmatpush1.bf16.msra.mxu0 %v2306_v8  ;;  %919 = vmatpush1.bf16.msra.mxu1 %v2308_v10 }
  0x77   :  { %2431 = vmatprep.subr.bf16.mxu0 %v2705_v5  ;;  %2495 = vmatprep.subr.bf16.mxu1 %v2707_v9 }
  0x78   :  { %638 = vmatmul.mubr.bf16.gmra.mxu0 %v2955_v7  ;;  %751 = vmatmul.mubr.bf16.gmra.mxu1 %v2955_v7 }
  0x79   :  { %647 = vmatprep.mubr.bf16.mxu0 %v2885_v0  ;;  %760 = vmatprep.mubr.bf16.mxu1 %v2885_v0 }
  0x80   :  { %648 = vmatmul.mubr.bf16.gmra.mxu0 %v2961_v11  ;;  %761 = vmatmul.mubr.bf16.gmra.mxu1 %v2961_v11 }
  0x81   :  { %657 = vmatprep.mubr.bf16.mxu0 %v2885_v0  ;;  %770 = vmatprep.mubr.bf16.mxu1 %v2885_v0 }
  0x88   :  { %658 = vmatmul.mubr.bf16.gmra.mxu0 %v2967_v12  ;;  %771 = vmatmul.mubr.bf16.gmra.mxu1 %v2967_v12 }
  0x89   :  { %667 = vmatprep.mubr.bf16.mxu0 %v2885_v0  ;;  %780 = vmatprep.mubr.bf16.mxu1 %v2885_v0 }
  0x90   :  { %668 = vmatmul.mubr.bf16.gmra.mxu0 %v2973_v13  ;;  %781 = vmatmul.mubr.bf16.gmra.mxu1 %v2973_v13 }
  0x91   :  { %823 = vmatprep.mubr.bf16.mxu0 %v2885_v0  ;;  %936 = vmatprep.mubr.bf16.mxu1 %v2885_v0 }
  0x98   :  { %824 = vmatmul.mubr.bf16.vlgmr.msra.gmra.mxu0 %v2931_v6  ;;  %937 = vmatmul.mubr.bf16.vlgmr.msra.gmra.mxu1 %v2931_v6  ;;  %v2719_v6 = vld [vmem:[#allocation8 + $0xe0] sm:$0xff]  }
  0x99   :  { %833 = vmatprep.mubr.bf16.mxu0 %v2885_v0  ;;  %946 = vmatprep.mubr.bf16.mxu1 %v2885_v0 }
  0x9a   :  { %2432 = vmatpush3.bf16.msra.mxu0 %v2706_v14  ;;  %2496 = vmatpush3.bf16.msra.mxu1 %v2708_v15 }
  0x9b   :  { %2433 = vmatprep.subr.bf16.mxu0 %v2709_v16  ;;  %2497 = vmatprep.subr.bf16.mxu1 %v2711_v17 }
  0x9e   :  { %2434 = vmatpush3.bf16.msra.mxu0 %v2710_v18  ;;  %2498 = vmatpush3.bf16.msra.mxu1 %v2712_v19 }
  0x9f   :  { %2435 = vmatprep.subr.bf16.mxu0 %v2713_v20  ;;  %2499 = vmatprep.subr.bf16.mxu1 %v2715_v21 }
  0xa0   :  { %834 = vmatmul.mubr.bf16.gmra.mxu0 %v2936_v22  ;;  %947 = vmatmul.mubr.bf16.gmra.mxu1 %v2936_v22  ;;  %v2727_v22 = vld [vmem:[#allocation8 + $0xd0] sm:$0xff]  }
  0xa1   :  { %843 = vmatprep.mubr.bf16.mxu0 %v2885_v0  ;;  %956 = vmatprep.mubr.bf16.mxu1 %v2885_v0 }
  0xa2   :  { %2436 = vmatpush3.bf16.msra.mxu0 %v2714_v23  ;;  %2500 = vmatpush3.bf16.msra.mxu1 %v2716_v24 }
  0xa3   :  { %2437 = vmatprep.subr.bf16.mxu0 %v2717_v25  ;;  %2501 = vmatprep.subr.bf16.mxu1 %v2719_v6 }
  0xa6   :  { %2438 = vmatpush3.bf16.msra.mxu0 %v2718_v26  ;;  %2502 = vmatpush3.bf16.msra.mxu1 %v2720_v27 }
  0xa7   :  { %2439 = vmatprep.subr.bf16.mxu0 %v2721_v28  ;;  %2503 = vmatprep.subr.bf16.mxu1 %v2723_v29 }
  0xa8   :  { %844 = vmatmul.mubr.bf16.gmra.mxu0 %v2943_v38  ;;  %957 = vmatmul.mubr.bf16.gmra.mxu1 %v2943_v38  ;;  %v2735_v38 = vld [vmem:[#allocation8 + $0xc0] sm:$0xff]  }
  0xa9   :  { %853 = vmatprep.mubr.bf16.mxu0 %v2885_v0  ;;  %966 = vmatprep.mubr.bf16.mxu1 %v2885_v0 }
  0xaa   :  { %2440 = vmatpush3.bf16.msra.mxu0 %v2722_v30  ;;  %2504 = vmatpush3.bf16.msra.mxu1 %v2724_v31 }
  0xab   :  { %2441 = vmatprep.subr.bf16.mxu0 %v2725_v32  ;;  %2505 = vmatprep.subr.bf16.mxu1 %v2727_v22 }
  0xae   :  { %2442 = vmatpush3.bf16.msra.mxu0 %v2726_v33  ;;  %2506 = vmatpush3.bf16.msra.mxu1 %v2728_v34 }
  0xaf   :  { %2443 = vmatprep.subr.bf16.mxu0 %v2729_v35  ;;  %2507 = vmatprep.subr.bf16.mxu1 %v2731_v36  ;;  %v2738_v36 = vld [vmem:[#allocation8 + $0x138] sm:$0xff]  }
  0xb0   :  { %854 = vmatmul.mubr.bf16.gmra.mxu0 %v2949_v55  ;;  %967 = vmatmul.mubr.bf16.gmra.mxu1 %v2949_v55  ;;  %v3027_v55 = vrot.slane %v3012_v48, %v167_v51 }
  0xb1   :  { %863 = vmatprep.mubr.bf16.mxu0 %v2885_v0  ;;  %976 = vmatprep.mubr.bf16.mxu1 %v2885_v0 }
  0xb2   :  { %2444 = vmatpush3.bf16.msra.mxu0 %v2730_v37  ;;  %2508 = vmatpush3.bf16.msra.mxu1 %v2732_v39 }
  0xb3   :  { %2445 = vmatprep.subr.bf16.mxu0 %v2733_v40  ;;  %2509 = vmatprep.subr.bf16.mxu1 %v2735_v38 }
  0xb6   :  { %2446 = vmatpush3.bf16.msra.mxu0 %v2734_v41  ;;  %2510 = vmatpush3.bf16.msra.mxu1 %v2736_v42  ;;  %v2740_v41 = vld [vmem:[#allocation8 + $0x1b8] sm:$0xff]   ;;  %v2741_v42 = vld [vmem:[#allocation8 + $0x170] sm:$0xff]  }
  0xb7   :  { %2559 = vmatprep.subr.bf16.mxu0 %v2737_v43  ;;  %2623 = vmatprep.subr.bf16.mxu1 %v2739_v44 }
  0xb8   :  { %864 = vmatmul.mubr.bf16.gmra.mxu0 %v2955_v7  ;;  %977 = vmatmul.mubr.bf16.gmra.mxu1 %v2955_v7 }
  0xb9   :  { %873 = vmatprep.mubr.bf16.mxu0 %v2885_v0  ;;  %986 = vmatprep.mubr.bf16.mxu1 %v2885_v0 }
  0xc0   :  { %874 = vmatmul.mubr.bf16.gmra.mxu0 %v2961_v11  ;;  %987 = vmatmul.mubr.bf16.gmra.mxu1 %v2961_v11 }
  0xc1   :  { %883 = vmatprep.mubr.bf16.mxu0 %v2885_v0  ;;  %996 = vmatprep.mubr.bf16.mxu1 %v2885_v0 }
  0xc8   :  { %884 = vmatmul.mubr.bf16.gmra.mxu0 %v2967_v12  ;;  %997 = vmatmul.mubr.bf16.gmra.mxu1 %v2967_v12 }
  0xc9   :  { %893 = vmatprep.mubr.bf16.mxu0 %v2885_v0  ;;  %1006 = vmatprep.mubr.bf16.mxu1 %v2885_v0  ;;  %v3021_v0 = vrot.slane %v3012_v48, %v163_v49 }
  0xd0   :  { %894 = vmatmul.mubr.bf16.gmra.mxu0 %v2973_v13  ;;  %1007 = vmatmul.mubr.bf16.gmra.mxu1 %v2973_v13 }
 0x118   :  { %v599_v53 = vpop.f32.mrf.mxu0  ;;  %v712_v56 = vpop.f32.mrf.mxu1 }
 0x119   :  { %v600_v57 = vadd.f32 %v599_v53, %v3018_v52  ;;  %v713_v63 = vadd.f32 %v712_v56, %v3027_v55 }
 0x11a   :  { %v601_v58 = vpop.f32.mrf.mxu0  ;;  %v714_v60 = vpop.f32.mrf.mxu1 }
 0x11b   :  { %v602_v59 = vadd.f32 %v601_v58, %v3021_v0  ;;  %v715_v61 = vadd.f32 %v714_v60, %v3024_v54  ;;  %v1017_v3 = vmul.f32 0.2, %v600_v57  ;;  %v1019_v15 = vmul.f32 0.2, %v713_v63 }
 0x11c   :  { %v603_v62 = vpop.f32.mrf.mxu0  ;;  %v716_v2 = vpop.f32.mrf.mxu1 }
 0x11d   :  { %v604_v1 = vadd.f32 %v603_v62, %v3018_v52  ;;  %v717_v4 = vadd.f32 %v716_v2, %v3027_v55  ;;  %v1018_v7 = vmul.f32 0.2, %v602_v59  ;;  %v1020_v11 = vmul.f32 0.2, %v715_v61  ;;  %v2742_v62 = vld [vmem:[#allocation8 + $0x130] sm:$0xff]  }
 0x11e   :  { %v605_v5 = vpop.f32.mrf.mxu0  ;;  %v718_v10 = vpop.f32.mrf.mxu1  ;;  %v1145_v18 = vmax.f32 %v600_v57, %v1017_v3  ;;  %v1147_v32 = vmax.f32 %v713_v63, %v1019_v15 }
 0x11f   :  { %v1025_v8 = vmul.f32 0.2, %v604_v1  ;;  %v606_v9 = vadd.f32 %v605_v5, %v3021_v0  ;;  %v1027_v12 = vmul.f32 0.2, %v717_v4  ;;  %v719_v13 = vadd.f32 %v718_v10, %v3024_v54  ;;  %v2745_v5 = vld [vmem:[#allocation8 + $0x168] sm:$0xff]  }
 0x120   :  { %v609_v14 = vpop.f32.mrf.mxu0  ;;  %v722_v17 = vpop.f32.mrf.mxu1  ;;  %v1146_v23 = vmax.f32 %v602_v59, %v1018_v7  ;;  %v1148_v27 = vmax.f32 %v715_v61, %v1020_v11 }
 0x121   :  { %v1026_v16 = vmul.f32 0.2, %v606_v9  ;;  %v1153_v19 = vmax.f32 %v604_v1, %v1025_v8  ;;  %v1028_v20 = vmul.f32 0.2, %v719_v13  ;;  %v1155_v24 = vmax.f32 %v717_v4, %v1027_v12  ;;  %v2744_v4 = vld [vmem:[#allocation8 + $0x1b0] sm:$0xff]   ;;  %v2747_v12 = vld [vmem:[#allocation8 + $0x1e8] sm:$0xff]  }
 0x122   :  { %v611_v21 = vpop.f32.mrf.mxu0  ;;  %v724_v26 = vpop.f32.mrf.mxu1  ;;  %v3041_v29 = vadd.f32 %v609_v14, %v3018_v52  ;;  %v3047_v22 = vadd.f32 %v722_v17, %v3027_v55 }
 0x123   :  { %v1154_v25 = vmax.f32 %v606_v9, %v1026_v16  ;;  %v3038_v6 = vadd.f32 %v611_v21, %v3021_v0  ;;  %v1156_v28 = vmax.f32 %v719_v13, %v1028_v20  ;;  %v3044_v30 = vadd.f32 %v724_v26, %v3024_v54 }
 0x124   :  { %v613_v31 = vpop.f32.mrf.mxu0  ;;  %v726_v34 = vpop.f32.mrf.mxu1  ;;  %v1273_v37 = vpack.c.bf16 %v1153_v19, %v1145_v18  ;;  %v1275_v43 = vpack.c.bf16 %v1155_v24, %v1147_v32  ;;  %v1033_v51 = vmul.f32 0.2, %v3041_v29  ;;  %v1035_v59 = vmul.f32 0.2, %v3047_v22  ;;  %v2746_v24 = vld [vmem:[#allocation8 + $0x128] sm:$0xff]  }
 0x125   :  { %v614_v33 = vadd.f32 %v613_v31, %v3018_v52  ;;  %v1274_v35 = vpack.c.bf16 %v1154_v25, %v1146_v23  ;;  %v3051_v39 = vadd.f32 %v726_v34, %v3027_v55  ;;  %v1276_v38 = vpack.c.bf16 %v1156_v28, %v1148_v27 }
 0x126   :  { %v615_v40 = vpop.f32.mrf.mxu0  ;;  %v1034_v44 = vmul.f32 0.2, %v3038_v6  ;;  %v728_v49 = vpop.f32.mrf.mxu1  ;;  %v1036_v53 = vmul.f32 0.2, %v3044_v30  ;;  %v1161_v13 = vmax.f32 %v3041_v29, %v1033_v51  ;;  %v1163_v18 = vmax.f32 %v3047_v22, %v1035_v59  ;;  %v2748_v29 = vld [vmem:[#allocation8 + $0x1a8] sm:$0xff]   ;;  %v2753_v51 = vld [vmem:[#allocation8 + $0x158] sm:$0xff]  }
 0x127   :  { %v1041_v45 = vmul.f32 0.2, %v614_v33  ;;  %v616_v47 = vadd.f32 %v615_v40, %v3021_v0  ;;  %1888 = vmatprep.mubr.bf16.mxu0 %v1274_v35  ;;  %v1043_v56 = vmul.f32 0.2, %v3051_v39  ;;  %v729_v57 = vadd.f32 %v728_v49, %v3024_v54  ;;  %1985 = vmatprep.mubr.bf16.mxu1 %v1276_v38  ;;  %v2751_v35 = vld [vmem:[#allocation8 + $0x1e0] sm:$0xff]  }
 0x128   :  { %v619_v58 = vpop.f32.mrf.mxu0  ;;  %1889 = vmatmul.mubr.bf16.vlgmr.msra.gmra.mxu0 %v1273_v37  ;;  %v732_v61 = vpop.f32.mrf.mxu1  ;;  %1986 = vmatmul.mubr.bf16.vlgmr.msra.gmra.mxu1 %v1275_v43  ;;  %v1162_v7 = vmax.f32 %v3038_v6, %v1034_v44  ;;  %v1164_v14 = vmax.f32 %v3044_v30, %v1036_v53  ;;  %v2749_v30 = vld [vmem:[#allocation8 + $0x160] sm:$0xff]  }
 0x129   :  { %v1042_v60 = vmul.f32 0.2, %v616_v47  ;;  %2560 = vmatpush3.bf16.msra.mxu0 %v2738_v36  ;;  %v1169_v63 = vmax.f32 %v614_v33, %v1041_v45  ;;  %v1044_v1 = vmul.f32 0.2, %v729_v57  ;;  %v3061_v2 = vadd.f32 %v619_v58, %v3018_v52  ;;  %2624 = vmatpush3.bf16.msra.mxu1 %v2740_v41  ;;  %v2750_v43 = vld [vmem:[#allocation8 + $0x120] sm:$0xff]  }
 0x12a   :  { %v621_v3 = vpop.f32.mrf.mxu0  ;;  %2561 = vmatprep.subr.bf16.mxu0 %v2741_v42  ;;  %v1171_v8 = vmax.f32 %v3051_v39, %v1043_v56  ;;  %v734_v11 = vpop.f32.mrf.mxu1  ;;  %2625 = vmatprep.subr.bf16.mxu1 %v2743_v50  ;;  %v3075_v19 = vadd.f32 %v732_v61, %v3027_v55  ;;  %v2752_v50 = vld [vmem:[#allocation8 + $0x1a0] sm:$0xff]  }
 0x12b   :  { %v1170_v9 = vmax.f32 %v616_v47, %v1042_v60  ;;  %v3066_v10 = vadd.f32 %v621_v3, %v3021_v0  ;;  %v1172_v15 = vmax.f32 %v729_v57, %v1044_v1  ;;  %v3071_v16 = vadd.f32 %v734_v11, %v3024_v54  ;;  %v2755_v60 = vld [vmem:[#allocation8 + $0x1d8] sm:$0xff]  }
 0x12c   :  { %v623_v17 = vpop.f32.mrf.mxu0  ;;  %v736_v21 = vpop.f32.mrf.mxu1  ;;  %v1049_v25 = vmul.f32 0.2, %v3061_v2  ;;  %v1281_v28 = vpack.c.bf16 %v1169_v63, %v1161_v13  ;;  %v1283_v34 = vpack.c.bf16 %v1171_v8, %v1163_v18  ;;  %v1051_v38 = vmul.f32 0.2, %v3075_v19 }
 0x12d   :  { %v3078_v20 = vadd.f32 %v623_v17, %v3018_v52  ;;  %v1282_v23 = vpack.c.bf16 %v1170_v9, %v1162_v7  ;;  %2562 = vmatpush3.bf16.msra.mxu0 %v2742_v62  ;;  %v3082_v6 = vadd.f32 %v736_v21, %v3027_v55  ;;  %v1284_v27 = vpack.c.bf16 %v1172_v15, %v1164_v14  ;;  %v2754_v9 = vld [vmem:[#allocation8 + $0x118] sm:$0xff]   ;;  %v2757_v15 = vld [vmem:[#allocation8 + $0x150] sm:$0xff]  }
 0x12e   :  { %v625_v26 = vpop.f32.mrf.mxu0  ;;  %2626 = vmatpush3.bf16.msra.mxu1 %v2744_v4  ;;  %2563 = vmatprep.subr.bf16.mxu0 %v2745_v5  ;;  %v1050_v31 = vmul.f32 0.2, %v3066_v10  ;;  %v738_v33 = vpop.f32.mrf.mxu1  ;;  %v1052_v36 = vmul.f32 0.2, %v3071_v16  ;;  %v1177_v44 = vmax.f32 %v3061_v2, %v1049_v25  ;;  %v1179_v3 = vmax.f32 %v3075_v19, %v1051_v38  ;;  %v2756_v14 = vld [vmem:[#allocation8 + $0x198] sm:$0xff]   ;;  %v2759_v21 = vld [vmem:[#allocation8 + $0x1d0] sm:$0xff]  }
 0x12f   :  { %v1057_v32 = vmul.f32 0.2, %v3078_v20  ;;  %v626_v22 = vadd.f32 %v625_v26, %v3021_v0  ;;  %1896 = vmatprep.mubr.bf16.mxu0 %v1282_v23  ;;  %2627 = vmatprep.subr.bf16.mxu1 %v2747_v12  ;;  %v1059_v37 = vmul.f32 0.2, %v3082_v6  ;;  %v739_v39 = vadd.f32 %v738_v33, %v3024_v54 }
 0x130   :  { %1993 = vmatprep.mubr.bf16.mxu1 %v1284_v27  ;;  %v629_v40 = vpop.f32.mrf.mxu0  ;;  %1897 = vmatmul.mubr.bf16.gmra.mxu0 %v1281_v28  ;;  %v742_v42 = vpop.f32.mrf.mxu1  ;;  %v1178_v53 = vmax.f32 %v3066_v10, %v1050_v31  ;;  %v1180_v61 = vmax.f32 %v3071_v16, %v1052_v36 }
 0x131   :  { %v1058_v41 = vmul.f32 0.2, %v626_v22  ;;  %1994 = vmatmul.mubr.bf16.gmra.mxu1 %v1283_v34  ;;  %2564 = vmatpush3.bf16.msra.mxu0 %v2746_v24  ;;  %v1185_v45 = vmax.f32 %v3078_v20, %v1057_v32  ;;  %v1060_v47 = vmul.f32 0.2, %v739_v39  ;;  %v1187_v56 = vmax.f32 %v3082_v6, %v1059_v37  ;;  %v2760_v34 = vld [vmem:[#allocation8 + $0x190] sm:$0xff]  }
 0x132   :  { %v631_v49 = vpop.f32.mrf.mxu0  ;;  %2628 = vmatpush3.bf16.msra.mxu1 %v2748_v29  ;;  %2565 = vmatprep.subr.bf16.mxu0 %v2749_v30  ;;  %v744_v59 = vpop.f32.mrf.mxu1  ;;  %v3100_v63 = vadd.f32 %v629_v40, %v3018_v52  ;;  %v3107_v4 = vadd.f32 %v742_v42, %v3027_v55  ;;  %v2758_v30 = vld [vmem:[#allocation8 + $0x110] sm:$0xff]  }
 0x133   :  { %v1186_v57 = vmax.f32 %v626_v22, %v1058_v41  ;;  %v3096_v58 = vadd.f32 %v631_v49, %v3021_v0  ;;  %2629 = vmatprep.subr.bf16.mxu1 %v2751_v35  ;;  %v1188_v62 = vmax.f32 %v739_v39, %v1060_v47  ;;  %v3103_v1 = vadd.f32 %v744_v59, %v3024_v54  ;;  %v2761_v35 = vld [vmem:[#allocation8 + $0x148] sm:$0xff]  }
 0x134   :  { %v633_v2 = vpop.f32.mrf.mxu0  ;;  %v746_v7 = vpop.f32.mrf.mxu1  ;;  %v1289_v13 = vpack.c.bf16 %v1185_v45, %v1177_v44  ;;  %v1291_v20 = vpack.c.bf16 %v1187_v56, %v1179_v3  ;;  %v1065_v23 = vmul.f32 0.2, %v3100_v63  ;;  %v1067_v27 = vmul.f32 0.2, %v3107_v4  ;;  %v2763_v41 = vld [vmem:[#allocation8 + $0x1c8] sm:$0xff]  }
 0x135   :  { %v3110_v5 = vadd.f32 %v633_v2, %v3018_v52  ;;  %v1290_v8 = vpack.c.bf16 %v1186_v57, %v1178_v53  ;;  %2566 = vmatpush3.bf16.msra.mxu0 %v2750_v43  ;;  %v3113_v10 = vadd.f32 %v746_v7, %v3027_v55  ;;  %v1292_v12 = vpack.c.bf16 %v1188_v62, %v1180_v61  ;;  %v2762_v57 = vld [vmem:[#allocation8 + $0x108] sm:$0xff]  }
 0x136   :  { %v635_v11 = vpop.f32.mrf.mxu0  ;;  %2630 = vmatpush3.bf16.msra.mxu1 %v2752_v50  ;;  %2567 = vmatprep.subr.bf16.mxu0 %v2753_v51  ;;  %v1066_v16 = vmul.f32 0.2, %v3096_v58  ;;  %v748_v19 = vpop.f32.mrf.mxu1  ;;  %v1068_v24 = vmul.f32 0.2, %v3103_v1  ;;  %v1193_v42 = vmax.f32 %v3100_v63, %v1065_v23  ;;  %v1195_v49 = vmax.f32 %v3107_v4, %v1067_v27  ;;  %v2764_v63 = vld [vmem:[#allocation8 + $0x188] sm:$0xff]  }
 0x137   :  { %v1073_v17 = vmul.f32 0.2, %v3110_v5  ;;  %v636_v18 = vadd.f32 %v635_v11, %v3021_v0  ;;  %1904 = vmatprep.mubr.bf16.mxu0 %v1290_v8  ;;  %2631 = vmatprep.subr.bf16.mxu1 %v2755_v60  ;;  %v1075_v25 = vmul.f32 0.2, %v3113_v10  ;;  %v749_v6 = vadd.f32 %v748_v19, %v3024_v54  ;;  %v2767_v8 = vld [vmem:[#allocation8 + $0x1c0] sm:$0xff]  }
 0x138   :  { %2001 = vmatprep.mubr.bf16.mxu1 %v1292_v12  ;;  %v639_v26 = vpop.f32.mrf.mxu0  ;;  %1905 = vmatmul.mubr.bf16.gmra.mxu0 %v1289_v13  ;;  %v752_v29 = vpop.f32.mrf.mxu1  ;;  %v1194_v36 = vmax.f32 %v3096_v58, %v1066_v16  ;;  %v1196_v43 = vmax.f32 %v3103_v1, %v1068_v24  ;;  %v2765_v1 = vld [vmem:[#allocation8 + $0x140] sm:$0xff]  }
 0x139   :  { %v1074_v28 = vmul.f32 0.2, %v636_v18  ;;  %2002 = vmatmul.mubr.bf16.gmra.mxu1 %v1291_v20  ;;  %2568 = vmatpush3.bf16.msra.mxu0 %v2754_v9  ;;  %v1201_v31 = vmax.f32 %v3110_v5, %v1073_v17  ;;  %v1076_v32 = vmul.f32 0.2, %v749_v6  ;;  %v3125_v22 = vadd.f32 %v639_v26, %v3018_v52  ;;  %v2766_v16 = vld [vmem:[#allocation8 + $0x100] sm:$0xff]  }
 0x13a   :  { %v641_v33 = vpop.f32.mrf.mxu0  ;;  %2632 = vmatpush3.bf16.msra.mxu1 %v2756_v14  ;;  %2569 = vmatprep.subr.bf16.mxu0 %v2757_v15  ;;  %v1203_v37 = vmax.f32 %v3113_v10, %v1075_v25  ;;  %v754_v38 = vpop.f32.mrf.mxu1  ;;  %v3139_v50 = vadd.f32 %v752_v29, %v3027_v55 }
 0x13b   :  { %v1202_v39 = vmax.f32 %v636_v18, %v1074_v28  ;;  %v3130_v40 = vadd.f32 %v641_v33, %v3021_v0  ;;  %2633 = vmatprep.subr.bf16.mxu1 %v2759_v21  ;;  %v1204_v44 = vmax.f32 %v749_v6, %v1076_v32  ;;  %v3135_v45 = vadd.f32 %v754_v38, %v3024_v54  ;;  %v2768_v21 = vld [vmem:[#allocation8 + $0x180] sm:$0xff]  }
 0x13c   :  { %v643_v47 = vpop.f32.mrf.mxu0  ;;  %v756_v53 = vpop.f32.mrf.mxu1  ;;  %v1081_v58 = vmul.f32 0.2, %v3125_v22  ;;  %v1297_v62 = vpack.c.bf16 %v1201_v31, %v1193_v42  ;;  %v1299_v7 = vpack.c.bf16 %v1203_v37, %v1195_v49  ;;  %v1083_v13 = vmul.f32 0.2, %v3139_v50 }
 0x13d   :  { %v644_v51 = vadd.f32 %v643_v47, %v3018_v52  ;;  %v1298_v56 = vpack.c.bf16 %v1202_v39, %v1194_v36  ;;  %2570 = vmatpush3.bf16.msra.mxu0 %v2758_v30  ;;  %v3144_v59 = vadd.f32 %v756_v53, %v3027_v55  ;;  %v1300_v61 = vpack.c.bf16 %v1204_v44, %v1196_v43 }
 0x13e   :  { %v645_v60 = vpop.f32.mrf.mxu0  ;;  %2634 = vmatpush3.bf16.msra.mxu1 %v2760_v34  ;;  %2571 = vmatprep.subr.bf16.mxu0 %v2761_v35  ;;  %v1082_v2 = vmul.f32 0.2, %v3130_v40  ;;  %v758_v5 = vpop.f32.mrf.mxu1  ;;  %v1084_v9 = vmul.f32 0.2, %v3135_v45  ;;  %v1209_v17 = vmax.f32 %v3125_v22, %v1081_v58  ;;  %v1211_v32 = vmax.f32 %v3139_v50, %v1083_v13 }
 0x13f   :  { %v1089_v3 = vmul.f32 0.2, %v644_v51  ;;  %v646_v4 = vadd.f32 %v645_v60, %v3021_v0  ;;  %1912 = vmatprep.mubr.bf16.mxu0 %v1298_v56  ;;  %2635 = vmatprep.subr.bf16.mxu1 %v2763_v41  ;;  %v1091_v10 = vmul.f32 0.2, %v3144_v59  ;;  %v759_v11 = vadd.f32 %v758_v5, %v3024_v54 }
 0x140   :  { %2009 = vmatprep.mubr.bf16.mxu1 %v1300_v61  ;;  %v649_v12 = vpop.f32.mrf.mxu0  ;;  %1913 = vmatmul.mubr.bf16.gmra.mxu0 %v1297_v62  ;;  %v762_v15 = vpop.f32.mrf.mxu1  ;;  %v1210_v23 = vmax.f32 %v3130_v40, %v1082_v2  ;;  %v1212_v27 = vmax.f32 %v3135_v45, %v1084_v9  ;;  %v175_v58 = vsub.s32 4, %v3009_v46 }
 0x141   :  { %v1090_v14 = vmul.f32 0.2, %v646_v4  ;;  %2010 = vmatmul.mubr.bf16.gmra.mxu1 %v1299_v7  ;;  %2572 = vmatpush3.bf16.msra.mxu0 %v2762_v57  ;;  %v1217_v18 = vmax.f32 %v644_v51, %v1089_v3  ;;  %v1092_v19 = vmul.f32 0.2, %v759_v11  ;;  %v1219_v24 = vmax.f32 %v3144_v59, %v1091_v10 }
 0x142   :  { %v651_v20 = vpop.f32.mrf.mxu0  ;;  %2636 = vmatpush3.bf16.msra.mxu1 %v2764_v63  ;;  %2573 = vmatprep.subr.bf16.mxu0 %v2765_v1  ;;  %v764_v26 = vpop.f32.mrf.mxu1  ;;  %v650_v29 = vadd.f32 %v649_v12, %v3018_v52  ;;  %v763_v22 = vadd.f32 %v762_v15, %v3027_v55  ;;  %v179_v63 = vsub.s32 5, %v3009_v46 }
 0x143   :  { %v1218_v25 = vmax.f32 %v646_v4, %v1090_v14  ;;  %v652_v6 = vadd.f32 %v651_v20, %v3021_v0  ;;  %2637 = vmatprep.subr.bf16.mxu1 %v2767_v8  ;;  %v1220_v28 = vmax.f32 %v759_v11, %v1092_v19  ;;  %v765_v30 = vadd.f32 %v764_v26, %v3024_v54 }
 0x144   :  { %v653_v31 = vpop.f32.mrf.mxu0  ;;  %v766_v34 = vpop.f32.mrf.mxu1  ;;  %v1305_v40 = vpack.c.bf16 %v1217_v18, %v1209_v17  ;;  %v1307_v44 = vpack.c.bf16 %v1219_v24, %v1211_v32  ;;  %v1097_v45 = vmul.f32 0.2, %v650_v29  ;;  %v1099_v53 = vmul.f32 0.2, %v763_v22 }
 0x145   :  { %v654_v33 = vadd.f32 %v653_v31, %v3018_v52  ;;  %v1306_v35 = vpack.c.bf16 %v1218_v25, %v1210_v23  ;;  %2574 = vmatpush3.bf16.msra.mxu0 %v2766_v16  ;;  %v767_v36 = vadd.f32 %v766_v34, %v3027_v55  ;;  %v1308_v39 = vpack.c.bf16 %v1220_v28, %v1212_v27 }
 0x146   :  { %v655_v37 = vpop.f32.mrf.mxu0  ;;  %2638 = vmatpush3.bf16.msra.mxu1 %v2768_v21  ;;  %v1098_v38 = vmul.f32 0.2, %v652_v6  ;;  %v768_v43 = vpop.f32.mrf.mxu1  ;;  %v1100_v47 = vmul.f32 0.2, %v765_v30  ;;  %v1225_v7 = vmax.f32 %v650_v29, %v1097_v45  ;;  %v1227_v12 = vmax.f32 %v763_v22, %v1099_v53 }
 0x147   :  { %v1105_v41 = vmul.f32 0.2, %v654_v33  ;;  %v656_v42 = vadd.f32 %v655_v37, %v3021_v0  ;;  %1920 = vmatprep.mubr.bf16.mxu0 %v1306_v35  ;;  %v1107_v49 = vmul.f32 0.2, %v767_v36  ;;  %v769_v50 = vadd.f32 %v768_v43, %v3024_v54  ;;  %2017 = vmatprep.mubr.bf16.mxu1 %v1308_v39 }
 0x148   :  { %v659_v51 = vpop.f32.mrf.mxu0  ;;  %1921 = vmatmul.mubr.bf16.gmra.mxu0 %v1305_v40  ;;  %v772_v57 = vpop.f32.mrf.mxu1  ;;  %v1226_v1 = vmax.f32 %v652_v6, %v1098_v38  ;;  %v1228_v8 = vmax.f32 %v765_v30, %v1100_v47  ;;  %v183_v31 = vsub.s32 6, %v3009_v46  ;;  %v3180_v34 = vrot.slane %v3012_v48, %v175_v58 }
 0x149   :  { %v1106_v56 = vmul.f32 0.2, %v656_v42  ;;  %2018 = vmatmul.mubr.bf16.gmra.mxu1 %v1307_v44  ;;  %v1233_v59 = vmax.f32 %v654_v33, %v1105_v41  ;;  %v1108_v60 = vmul.f32 0.2, %v769_v50  ;;  %v3167_v61 = vadd.f32 %v659_v51, %v3018_v52 }
 0x14a   :  { %v661_v62 = vpop.f32.mrf.mxu0  ;;  %v1235_v2 = vmax.f32 %v767_v36, %v1107_v49  ;;  %v774_v5 = vpop.f32.mrf.mxu1  ;;  %v773_v13 = vadd.f32 %v772_v57, %v3027_v55  ;;  %v187_v35 = vsub.s32 7, %v3009_v46  ;;  %v3185_v38 = vrot.slane %v3012_v48, %v179_v63 }
 0x14b   :  { %v1234_v3 = vmax.f32 %v656_v42, %v1106_v56  ;;  %v662_v4 = vadd.f32 %v661_v62, %v3021_v0  ;;  %v1236_v9 = vmax.f32 %v769_v50, %v1108_v60  ;;  %v775_v10 = vadd.f32 %v774_v5, %v3024_v54 }
 0x14c   :  { %v663_v11 = vpop.f32.mrf.mxu0  ;;  %v776_v15 = vpop.f32.mrf.mxu1  ;;  %v1113_v17 = vmul.f32 0.2, %v3167_v61  ;;  %v1313_v21 = vpack.c.bf16 %v1233_v59, %v1225_v7  ;;  %v1315_v26 = vpack.c.bf16 %v1235_v2, %v1227_v12  ;;  %v1115_v32 = vmul.f32 0.2, %v773_v13 }
 0x14d   :  { %v664_v14 = vadd.f32 %v663_v11, %v3018_v52  ;;  %v1314_v16 = vpack.c.bf16 %v1234_v3, %v1226_v1  ;;  %v777_v18 = vadd.f32 %v776_v15, %v3027_v55  ;;  %v1316_v20 = vpack.c.bf16 %v1236_v9, %v1228_v8 }
 0x14e   :  { %v665_v19 = vpop.f32.mrf.mxu0  ;;  %v1114_v23 = vmul.f32 0.2, %v662_v4  ;;  %v778_v6 = vpop.f32.mrf.mxu1  ;;  %v1116_v27 = vmul.f32 0.2, %v775_v10  ;;  %v1241_v36 = vmax.f32 %v3167_v61, %v1113_v17  ;;  %v1243_v53 = vmax.f32 %v773_v13, %v1115_v32 }
 0x14f   :  { %v1121_v24 = vmul.f32 0.2, %v664_v14  ;;  %v666_v25 = vadd.f32 %v665_v19, %v3021_v0  ;;  %1928 = vmatprep.mubr.bf16.mxu0 %v1314_v16  ;;  %v1123_v28 = vmul.f32 0.2, %v777_v18  ;;  %v779_v29 = vadd.f32 %v778_v6, %v3024_v54  ;;  %2025 = vmatprep.mubr.bf16.mxu1 %v1316_v20 }
 0x150   :  { %v669_v30 = vpop.f32.mrf.mxu0  ;;  %1929 = vmatmul.mubr.bf16.gmra.mxu0 %v1313_v21  ;;  %v782_v33 = vpop.f32.mrf.mxu1  ;;  %v1242_v41 = vmax.f32 %v662_v4, %v1114_v23  ;;  %v1244_v47 = vmax.f32 %v775_v10, %v1116_v27  ;;  %v3194_v1 = vrot.slane %v3012_v48, %v187_v35  ;;  %v3199_v13 = vrot.slane %v3012_v48, %v183_v31 }
 0x151   :  { %v1122_v22 = vmul.f32 0.2, %v666_v25  ;;  %2026 = vmatmul.mubr.bf16.gmra.mxu1 %v1315_v26  ;;  %v1249_v37 = vmax.f32 %v664_v14, %v1121_v24  ;;  %v1124_v39 = vmul.f32 0.2, %v779_v29  ;;  %v1251_v42 = vmax.f32 %v777_v18, %v1123_v28 }
 0x152   :  { %v671_v40 = vpop.f32.mrf.mxu0  ;;  %v784_v45 = vpop.f32.mrf.mxu1  ;;  %v670_v50 = vadd.f32 %v669_v30, %v3018_v52  ;;  %v783_v56 = vadd.f32 %v782_v33, %v3027_v55 }
 0x153   :  { %v1250_v43 = vmax.f32 %v666_v25, %v1122_v22  ;;  %v672_v44 = vadd.f32 %v671_v40, %v3021_v0  ;;  %v1252_v49 = vmax.f32 %v779_v29, %v1124_v39  ;;  %v785_v46 = vadd.f32 %v784_v45, %v3024_v54 }
 0x154   :  { %v673_v51 = vpop.f32.mrf.mxu0  ;;  %v786_v58 = vpop.f32.mrf.mxu1  ;;  %v1321_v63 = vpack.c.bf16 %v1249_v37, %v1241_v36  ;;  %v1323_v7 = vpack.c.bf16 %v1251_v42, %v1243_v53  ;;  %v1129_v8 = vmul.f32 0.2, %v670_v50  ;;  %v1131_v11 = vmul.f32 0.2, %v783_v56 }
 0x155   :  { %v674_v57 = vadd.f32 %v673_v51, %v3018_v52  ;;  %v1322_v59 = vpack.c.bf16 %v1250_v43, %v1242_v41  ;;  %v787_v60 = vadd.f32 %v786_v58, %v3027_v55  ;;  %v1324_v62 = vpack.c.bf16 %v1252_v49, %v1244_v47 }
 0x156   :  { %v675_v61 = vpop.f32.mrf.mxu0  ;;  %v1130_v2 = vmul.f32 0.2, %v672_v44  ;;  %v788_v5 = vpop.f32.mrf.mxu1  ;;  %v1132_v9 = vmul.f32 0.2, %v785_v46  ;;  %v1257_v23 = vmax.f32 %v670_v50, %v1129_v8  ;;  %v1259_v26 = vmax.f32 %v783_v56, %v1131_v11 }
 0x157   :  { %v1137_v3 = vmul.f32 0.2, %v674_v57  ;;  %v676_v4 = vadd.f32 %v675_v61, %v3021_v0  ;;  %1936 = vmatprep.mubr.bf16.mxu0 %v1322_v59  ;;  %v1139_v52 = vmul.f32 0.2, %v787_v60  ;;  %v789_v10 = vadd.f32 %v788_v5, %v3024_v54  ;;  %2033 = vmatprep.mubr.bf16.mxu1 %v1324_v62 }
 0x158   :  { %v825_v55 = vpop.f32.mrf.mxu0  ;;  %1937 = vmatmul.mubr.bf16.gmra.mxu0 %v1321_v63  ;;  %v938_v14 = vpop.f32.mrf.mxu1  ;;  %v1258_v18 = vmax.f32 %v672_v44, %v1130_v2  ;;  %v1260_v24 = vmax.f32 %v785_v46, %v1132_v9 }
 0x159   :  { %v1138_v12 = vmul.f32 0.2, %v676_v4  ;;  %2034 = vmatmul.mubr.bf16.gmra.mxu1 %v1323_v7  ;;  %v1265_v15 = vmax.f32 %v674_v57, %v1137_v3  ;;  %v1140_v0 = vmul.f32 0.2, %v789_v10  ;;  %v826_v16 = vadd.f32 %v825_v55, %v3180_v34 }
 0x15a   :  { %v827_v17 = vpop.f32.mrf.mxu0  ;;  %v1267_v19 = vmax.f32 %v787_v60, %v1139_v52  ;;  %v940_v21 = vpop.f32.mrf.mxu1  ;;  %v939_v27 = vadd.f32 %v938_v14, %v3199_v13 }
 0x15b   :  { %v1266_v20 = vmax.f32 %v676_v4, %v1138_v12  ;;  %v828_v54 = vadd.f32 %v827_v17, %v3185_v38  ;;  %v1268_v25 = vmax.f32 %v789_v10, %v1140_v0  ;;  %v941_v6 = vadd.f32 %v940_v21, %v3194_v1 }
 0x15c   :  { %v829_v48 = vpop.f32.mrf.mxu0  ;;  %v942_v29 = vpop.f32.mrf.mxu1  ;;  %v1021_v31 = vmul.f32 0.2, %v826_v16  ;;  %v1329_v35 = vpack.c.bf16 %v1265_v15, %v1257_v23  ;;  %v1331_v41 = vpack.c.bf16 %v1267_v19, %v1259_v26  ;;  %v1023_v47 = vmul.f32 0.2, %v939_v27 }
 0x15d   :  { %v830_v28 = vadd.f32 %v829_v48, %v3180_v34  ;;  %v1330_v30 = vpack.c.bf16 %v1266_v20, %v1258_v18  ;;  %v943_v32 = vadd.f32 %v942_v29, %v3199_v13  ;;  %v1332_v33 = vpack.c.bf16 %v1268_v25, %v1260_v24 }
 0x15e   :  { %v831_v22 = vpop.f32.mrf.mxu0  ;;  %v1022_v36 = vmul.f32 0.2, %v828_v54  ;;  %v944_v40 = vpop.f32.mrf.mxu1  ;;  %v1024_v42 = vmul.f32 0.2, %v941_v6  ;;  %v1149_v46 = vmax.f32 %v826_v16, %v1021_v31  ;;  %v1151_v5 = vmax.f32 %v939_v27, %v1023_v47 }
 0x15f   :  { %v1029_v37 = vmul.f32 0.2, %v830_v28  ;;  %v832_v39 = vadd.f32 %v831_v22, %v3185_v38  ;;  %1944 = vmatprep.mubr.bf16.mxu0 %v1330_v30  ;;  %v1031_v43 = vmul.f32 0.2, %v943_v32  ;;  %v945_v44 = vadd.f32 %v944_v40, %v3194_v1  ;;  %2041 = vmatprep.mubr.bf16.mxu1 %v1332_v33 }
 0x160   :  { %v835_v45 = vpop.f32.mrf.mxu0  ;;  %1945 = vmatmul.mubr.bf16.gmra.mxu0 %v1329_v35  ;;  %v948_v50 = vpop.f32.mrf.mxu1  ;;  %v1150_v57 = vmax.f32 %v828_v54, %v1022_v36  ;;  %v1152_v62 = vmax.f32 %v941_v6, %v1024_v42 }
 0x161   :  { %v1030_v49 = vmul.f32 0.2, %v832_v39  ;;  %2042 = vmatmul.mubr.bf16.gmra.mxu1 %v1331_v41  ;;  %v1157_v51 = vmax.f32 %v830_v28, %v1029_v37  ;;  %v1032_v53 = vmul.f32 0.2, %v945_v44  ;;  %v1159_v58 = vmax.f32 %v943_v32, %v1031_v43 }
 0x162   :  { %v837_v56 = vpop.f32.mrf.mxu0  ;;  %v950_v61 = vpop.f32.mrf.mxu1  ;;  %v836_v2 = vadd.f32 %v835_v45, %v3180_v34  ;;  %v949_v7 = vadd.f32 %v948_v50, %v3199_v13 }
 0x163   :  { %v1158_v59 = vmax.f32 %v832_v39, %v1030_v49  ;;  %v838_v60 = vadd.f32 %v837_v56, %v3185_v38  ;;  %v1160_v63 = vmax.f32 %v945_v44, %v1032_v53  ;;  %v951_v3 = vadd.f32 %v950_v61, %v3194_v1 }
 0x164   :  { %v839_v4 = vpop.f32.mrf.mxu0  ;;  %v952_v9 = vpop.f32.mrf.mxu1  ;;  %v1277_v10 = vpack.c.bf16 %v1157_v51, %v1149_v46  ;;  %v1279_v14 = vpack.c.bf16 %v1159_v58, %v1151_v5  ;;  %v1037_v18 = vmul.f32 0.2, %v836_v2  ;;  %v1039_v23 = vmul.f32 0.2, %v949_v7 }
 0x165   :  { %v840_v8 = vadd.f32 %v839_v4, %v3180_v34  ;;  %v1278_v52 = vpack.c.bf16 %v1158_v59, %v1150_v57  ;;  %v953_v55 = vadd.f32 %v952_v9, %v3199_v13  ;;  %v1280_v12 = vpack.c.bf16 %v1160_v63, %v1152_v62 }
 0x166   :  { %v841_v11 = vpop.f32.mrf.mxu0  ;;  %v1038_v15 = vmul.f32 0.2, %v838_v60  ;;  %v954_v17 = vpop.f32.mrf.mxu1  ;;  %v1040_v19 = vmul.f32 0.2, %v951_v3  ;;  %v1165_v22 = vmax.f32 %v836_v2, %v1037_v18  ;;  %v1167_v39 = vmax.f32 %v949_v7, %v1039_v23 }
 0x167   :  { %v1045_v0 = vmul.f32 0.2, %v840_v8  ;;  %v842_v16 = vadd.f32 %v841_v11, %v3185_v38  ;;  %2082 = vmatprep.mubr.bf16.mxu0 %v1278_v52  ;;  %v1047_v20 = vmul.f32 0.2, %v953_v55  ;;  %v955_v54 = vadd.f32 %v954_v17, %v3194_v1  ;;  %2179 = vmatprep.mubr.bf16.mxu1 %v1280_v12 }
 0x168   :  { %v845_v21 = vpop.f32.mrf.mxu0  ;;  %2083 = vmatmul.mubr.bf16.vlgmr.msra.gmra.mxu0 %v1277_v10  ;;  %v958_v25 = vpop.f32.mrf.mxu1  ;;  %v1166_v28 = vmax.f32 %v838_v60, %v1038_v15  ;;  %v1168_v33 = vmax.f32 %v951_v3, %v1040_v19 }
 0x169   :  { %v1046_v24 = vmul.f32 0.2, %v842_v16  ;;  %2180 = vmatmul.mubr.bf16.vlgmr.msra.gmra.mxu1 %v1279_v14  ;;  %v1173_v6 = vmax.f32 %v840_v8, %v1045_v0  ;;  %v1048_v48 = vmul.f32 0.2, %v955_v54  ;;  %v846_v26 = vadd.f32 %v845_v21, %v3180_v34 }
 0x16a   :  { %v847_v27 = vpop.f32.mrf.mxu0  ;;  %v1175_v29 = vmax.f32 %v953_v55, %v1047_v20  ;;  %v960_v32 = vpop.f32.mrf.mxu1  ;;  %v959_v40 = vadd.f32 %v958_v25, %v3199_v13 }
 0x16b   :  { %v1174_v30 = vmax.f32 %v842_v16, %v1046_v24  ;;  %v848_v31 = vadd.f32 %v847_v27, %v3185_v38  ;;  %v1176_v35 = vmax.f32 %v955_v54, %v1048_v48  ;;  %v961_v36 = vadd.f32 %v960_v32, %v3194_v1 }
 0x16c   :  { %v849_v37 = vpop.f32.mrf.mxu0  ;;  %v962_v42 = vpop.f32.mrf.mxu1  ;;  %v1053_v44 = vmul.f32 0.2, %v846_v26  ;;  %v1285_v50 = vpack.c.bf16 %v1173_v6, %v1165_v22  ;;  %v1287_v57 = vpack.c.bf16 %v1175_v29, %v1167_v39  ;;  %v1055_v62 = vmul.f32 0.2, %v959_v40 }
 0x16d   :  { %v850_v41 = vadd.f32 %v849_v37, %v3180_v34  ;;  %v1286_v43 = vpack.c.bf16 %v1174_v30, %v1166_v28  ;;  %v963_v45 = vadd.f32 %v962_v42, %v3199_v13  ;;  %v1288_v49 = vpack.c.bf16 %v1176_v35, %v1168_v33 }
 0x16e   :  { %v851_v47 = vpop.f32.mrf.mxu0  ;;  %v1054_v46 = vmul.f32 0.2, %v848_v31  ;;  %v964_v56 = vpop.f32.mrf.mxu1  ;;  %v1056_v58 = vmul.f32 0.2, %v961_v36  ;;  %v1181_v3 = vmax.f32 %v846_v26, %v1053_v44  ;;  %v1183_v16 = vmax.f32 %v959_v40, %v1055_v62 }
 0x16f   :  { %v1061_v51 = vmul.f32 0.2, %v850_v41  ;;  %v852_v53 = vadd.f32 %v851_v47, %v3185_v38  ;;  %2090 = vmatprep.mubr.bf16.mxu0 %v1286_v43  ;;  %v1063_v59 = vmul.f32 0.2, %v963_v45  ;;  %v965_v60 = vadd.f32 %v964_v56, %v3194_v1  ;;  %2187 = vmatprep.mubr.bf16.mxu1 %v1288_v49 }
 0x170   :  { %v855_v61 = vpop.f32.mrf.mxu0  ;;  %2091 = vmatmul.mubr.bf16.gmra.mxu0 %v1285_v50  ;;  %v968_v2 = vpop.f32.mrf.mxu1  ;;  %v1182_v8 = vmax.f32 %v848_v31, %v1054_v46  ;;  %v1184_v11 = vmax.f32 %v961_v36, %v1056_v58 }
 0x171   :  { %v1062_v63 = vmul.f32 0.2, %v852_v53  ;;  %2188 = vmatmul.mubr.bf16.gmra.mxu1 %v1287_v57  ;;  %v1189_v4 = vmax.f32 %v850_v41, %v1061_v51  ;;  %v1064_v5 = vmul.f32 0.2, %v965_v60  ;;  %v1191_v9 = vmax.f32 %v963_v45, %v1063_v59 }
 0x172   :  { %v857_v7 = vpop.f32.mrf.mxu0  ;;  %v970_v55 = vpop.f32.mrf.mxu1  ;;  %v856_v14 = vadd.f32 %v855_v61, %v3180_v34  ;;  %v969_v17 = vadd.f32 %v968_v2, %v3199_v13 }
 0x173   :  { %v1190_v52 = vmax.f32 %v852_v53, %v1062_v63  ;;  %v858_v10 = vadd.f32 %v857_v7, %v3185_v38  ;;  %v1192_v12 = vmax.f32 %v965_v60, %v1064_v5  ;;  %v971_v15 = vadd.f32 %v970_v55, %v3194_v1 }
 0x174   :  { %v859_v0 = vpop.f32.mrf.mxu0  ;;  %v972_v19 = vpop.f32.mrf.mxu1  ;;  %v1293_v24 = vpack.c.bf16 %v1189_v4, %v1181_v3  ;;  %v1295_v27 = vpack.c.bf16 %v1191_v9, %v1183_v16  ;;  %v1069_v28 = vmul.f32 0.2, %v856_v14  ;;  %v1071_v22 = vmul.f32 0.2, %v969_v17 }
 0x175   :  { %v860_v18 = vadd.f32 %v859_v0, %v3180_v34  ;;  %v1294_v20 = vpack.c.bf16 %v1190_v52, %v1182_v8  ;;  %v973_v54 = vadd.f32 %v972_v19, %v3199_v13  ;;  %v1296_v23 = vpack.c.bf16 %v1192_v12, %v1184_v11 }
 0x176   :  { %v861_v21 = vpop.f32.mrf.mxu0  ;;  %v1070_v25 = vmul.f32 0.2, %v858_v10  ;;  %v974_v26 = vpop.f32.mrf.mxu1  ;;  %v1072_v29 = vmul.f32 0.2, %v971_v15  ;;  %v1197_v47 = vmax.f32 %v856_v14, %v1069_v28  ;;  %v1199_v53 = vmax.f32 %v969_v17, %v1071_v22 }
 0x177   :  { %v1077_v6 = vmul.f32 0.2, %v860_v18  ;;  %v862_v48 = vadd.f32 %v861_v21, %v3185_v38  ;;  %2098 = vmatprep.mubr.bf16.mxu0 %v1294_v20  ;;  %v1079_v30 = vmul.f32 0.2, %v973_v54  ;;  %v975_v31 = vadd.f32 %v974_v26, %v3194_v1  ;;  %2195 = vmatprep.mubr.bf16.mxu1 %v1296_v23 }
 0x178   :  { %v865_v32 = vpop.f32.mrf.mxu0  ;;  %2099 = vmatmul.mubr.bf16.gmra.mxu0 %v1293_v24  ;;  %v978_v35 = vpop.f32.mrf.mxu1  ;;  %v1198_v41 = vmax.f32 %v858_v10, %v1070_v25  ;;  %v1200_v49 = vmax.f32 %v971_v15, %v1072_v29 }
 0x179   :  { %v1078_v33 = vmul.f32 0.2, %v862_v48  ;;  %2196 = vmatmul.mubr.bf16.gmra.mxu1 %v1295_v27  ;;  %v1205_v36 = vmax.f32 %v860_v18, %v1077_v6  ;;  %v1080_v37 = vmul.f32 0.2, %v975_v31  ;;  %v866_v39 = vadd.f32 %v865_v32, %v3180_v34 }
 0x17a   :  { %v867_v40 = vpop.f32.mrf.mxu0  ;;  %v1207_v42 = vmax.f32 %v973_v54, %v1079_v30  ;;  %v980_v45 = vpop.f32.mrf.mxu1  ;;  %v979_v56 = vadd.f32 %v978_v35, %v3199_v13 }
 0x17b   :  { %v1206_v43 = vmax.f32 %v862_v48, %v1078_v33  ;;  %v868_v44 = vadd.f32 %v867_v40, %v3185_v38  ;;  %v1208_v50 = vmax.f32 %v975_v31, %v1080_v37  ;;  %v981_v46 = vadd.f32 %v980_v45, %v3194_v1 }
 0x17c   :  { %v869_v51 = vpop.f32.mrf.mxu0  ;;  %v982_v58 = vpop.f32.mrf.mxu1  ;;  %v1085_v60 = vmul.f32 0.2, %v866_v39  ;;  %v1301_v2 = vpack.c.bf16 %v1205_v36, %v1197_v47  ;;  %v1303_v8 = vpack.c.bf16 %v1207_v42, %v1199_v53  ;;  %v1087_v11 = vmul.f32 0.2, %v979_v56 }
 0x17d   :  { %v870_v57 = vadd.f32 %v869_v51, %v3180_v34  ;;  %v1302_v59 = vpack.c.bf16 %v1206_v43, %v1198_v41  ;;  %v983_v61 = vadd.f32 %v982_v58, %v3199_v13  ;;  %v1304_v63 = vpack.c.bf16 %v1208_v50, %v1200_v49 }
 0x17e   :  { %v871_v62 = vpop.f32.mrf.mxu0  ;;  %v1086_v3 = vmul.f32 0.2, %v868_v44  ;;  %v984_v7 = vpop.f32.mrf.mxu1  ;;  %v1088_v9 = vmul.f32 0.2, %v981_v46  ;;  %v1213_v15 = vmax.f32 %v866_v39, %v1085_v60  ;;  %v1215_v26 = vmax.f32 %v979_v56, %v1087_v11 }
 0x17f   :  { %v1093_v4 = vmul.f32 0.2, %v870_v57  ;;  %v872_v5 = vadd.f32 %v871_v62, %v3185_v38  ;;  %2106 = vmatprep.mubr.bf16.mxu0 %v1302_v59  ;;  %v1095_v52 = vmul.f32 0.2, %v983_v61  ;;  %v985_v10 = vadd.f32 %v984_v7, %v3194_v1  ;;  %2203 = vmatprep.mubr.bf16.mxu1 %v1304_v63 }
 0x180   :  { %v875_v55 = vpop.f32.mrf.mxu0  ;;  %2107 = vmatmul.mubr.bf16.gmra.mxu0 %v1301_v2  ;;  %v988_v14 = vpop.f32.mrf.mxu1  ;;  %v1214_v18 = vmax.f32 %v868_v44, %v1086_v3  ;;  %v1216_v23 = vmax.f32 %v981_v46, %v1088_v9 }
 0x181   :  { %v1094_v12 = vmul.f32 0.2, %v872_v5  ;;  %2204 = vmatmul.mubr.bf16.gmra.mxu1 %v1303_v8  ;;  %v1221_v0 = vmax.f32 %v870_v57, %v1093_v4  ;;  %v1096_v16 = vmul.f32 0.2, %v985_v10  ;;  %v1223_v19 = vmax.f32 %v983_v61, %v1095_v52 }
 0x182   :  { %v877_v17 = vpop.f32.mrf.mxu0  ;;  %v990_v21 = vpop.f32.mrf.mxu1  ;;  %v876_v25 = vadd.f32 %v875_v55, %v3180_v34  ;;  %v989_v27 = vadd.f32 %v988_v14, %v3199_v13 }
 0x183   :  { %v1222_v20 = vmax.f32 %v872_v5, %v1094_v12  ;;  %v878_v54 = vadd.f32 %v877_v17, %v3185_v38  ;;  %v1224_v24 = vmax.f32 %v985_v10, %v1096_v16  ;;  %v991_v6 = vadd.f32 %v990_v21, %v3194_v1 }
 0x184   :  { %v879_v48 = vpop.f32.mrf.mxu0  ;;  %v992_v29 = vpop.f32.mrf.mxu1  ;;  %v1309_v31 = vpack.c.bf16 %v1221_v0, %v1213_v15  ;;  %v1311_v35 = vpack.c.bf16 %v1223_v19, %v1215_v26  ;;  %v1101_v41 = vmul.f32 0.2, %v876_v25  ;;  %v1103_v47 = vmul.f32 0.2, %v989_v27 }
 0x185   :  { %v880_v28 = vadd.f32 %v879_v48, %v3180_v34  ;;  %v1310_v30 = vpack.c.bf16 %v1222_v20, %v1214_v18  ;;  %v993_v32 = vadd.f32 %v992_v29, %v3199_v13  ;;  %v1312_v33 = vpack.c.bf16 %v1224_v24, %v1216_v23 }
 0x186   :  { %v881_v22 = vpop.f32.mrf.mxu0  ;;  %v1102_v36 = vmul.f32 0.2, %v878_v54  ;;  %v994_v40 = vpop.f32.mrf.mxu1  ;;  %v1104_v42 = vmul.f32 0.2, %v991_v6  ;;  %v1229_v62 = vmax.f32 %v876_v25, %v1101_v41  ;;  %v1231_v5 = vmax.f32 %v989_v27, %v1103_v47 }
 0x187   :  { %v1109_v37 = vmul.f32 0.2, %v880_v28  ;;  %v882_v39 = vadd.f32 %v881_v22, %v3185_v38  ;;  %2114 = vmatprep.mubr.bf16.mxu0 %v1310_v30  ;;  %v1111_v43 = vmul.f32 0.2, %v993_v32  ;;  %v995_v44 = vadd.f32 %v994_v40, %v3194_v1  ;;  %2211 = vmatprep.mubr.bf16.mxu1 %v1312_v33 }
 0x188   :  { %v885_v45 = vpop.f32.mrf.mxu0  ;;  %2115 = vmatmul.mubr.bf16.gmra.mxu0 %v1309_v31  ;;  %v998_v50 = vpop.f32.mrf.mxu1  ;;  %v1230_v57 = vmax.f32 %v878_v54, %v1102_v36  ;;  %v1232_v63 = vmax.f32 %v991_v6, %v1104_v42 }
 0x189   :  { %v1110_v49 = vmul.f32 0.2, %v882_v39  ;;  %2212 = vmatmul.mubr.bf16.gmra.mxu1 %v1311_v35  ;;  %v1237_v46 = vmax.f32 %v880_v28, %v1109_v37  ;;  %v1112_v51 = vmul.f32 0.2, %v995_v44  ;;  %v886_v53 = vadd.f32 %v885_v45, %v3180_v34 }
 0x18a   :  { %v887_v56 = vpop.f32.mrf.mxu0  ;;  %v1239_v58 = vmax.f32 %v993_v32, %v1111_v43  ;;  %v1000_v61 = vpop.f32.mrf.mxu1  ;;  %v999_v7 = vadd.f32 %v998_v50, %v3199_v13 }
 0x18b   :  { %v1238_v59 = vmax.f32 %v882_v39, %v1110_v49  ;;  %v888_v60 = vadd.f32 %v887_v56, %v3185_v38  ;;  %v1240_v2 = vmax.f32 %v995_v44, %v1112_v51  ;;  %v1001_v3 = vadd.f32 %v1000_v61, %v3194_v1 }
 0x18c   :  { %v889_v4 = vpop.f32.mrf.mxu0  ;;  %v1002_v9 = vpop.f32.mrf.mxu1  ;;  %v1317_v10 = vpack.c.bf16 %v1237_v46, %v1229_v62  ;;  %v1117_v55 = vmul.f32 0.2, %v886_v53  ;;  %v1319_v15 = vpack.c.bf16 %v1239_v58, %v1231_v5  ;;  %v1119_v23 = vmul.f32 0.2, %v999_v7 }
 0x18d   :  { %v890_v8 = vadd.f32 %v889_v4, %v3180_v34  ;;  %v1318_v52 = vpack.c.bf16 %v1238_v59, %v1230_v57  ;;  %v1003_v11 = vadd.f32 %v1002_v9, %v3199_v13  ;;  %v1320_v14 = vpack.c.bf16 %v1240_v2, %v1232_v63 }
 0x18e   :  { %v891_v12 = vpop.f32.mrf.mxu0  ;;  %v1118_v0 = vmul.f32 0.2, %v888_v60  ;;  %v1004_v18 = vpop.f32.mrf.mxu1  ;;  %v1120_v19 = vmul.f32 0.2, %v1001_v3  ;;  %v1245_v6 = vmax.f32 %v886_v53, %v1117_v55  ;;  %v1247_v39 = vmax.f32 %v999_v7, %v1119_v23 }
 0x18f   :  { %v1125_v16 = vmul.f32 0.2, %v890_v8  ;;  %v892_v17 = vadd.f32 %v891_v12, %v3185_v38  ;;  %2122 = vmatprep.mubr.bf16.mxu0 %v1318_v52  ;;  %v1127_v20 = vmul.f32 0.2, %v1003_v11  ;;  %v1005_v54 = vadd.f32 %v1004_v18, %v3194_v1  ;;  %2219 = vmatprep.mubr.bf16.mxu1 %v1320_v14 }
 0x190   :  { %v895_v21 = vpop.f32.mrf.mxu0  ;;  %2123 = vmatmul.mubr.bf16.gmra.mxu0 %v1317_v10  ;;  %v1008_v25 = vpop.f32.mrf.mxu1  ;;  %v1246_v28 = vmax.f32 %v888_v60, %v1118_v0  ;;  %v1248_v22 = vmax.f32 %v1001_v3, %v1120_v19 }
 0x191   :  { %v1126_v24 = vmul.f32 0.2, %v892_v17  ;;  %2220 = vmatmul.mubr.bf16.gmra.mxu1 %v1319_v15  ;;  %v1253_v48 = vmax.f32 %v890_v8, %v1125_v16  ;;  %v1128_v26 = vmul.f32 0.2, %v1005_v54  ;;  %v1255_v29 = vmax.f32 %v1003_v11, %v1127_v20 }
 0x192   :  { %v897_v27 = vpop.f32.mrf.mxu0  ;;  %v1010_v32 = vpop.f32.mrf.mxu1  ;;  %v896_v35 = vadd.f32 %v895_v21, %v3180_v34  ;;  %v1009_v40 = vadd.f32 %v1008_v25, %v3199_v13 }
 0x193   :  { %v1254_v30 = vmax.f32 %v892_v17, %v1126_v24  ;;  %v898_v31 = vadd.f32 %v897_v27, %v3185_v38  ;;  %v1256_v33 = vmax.f32 %v1005_v54, %v1128_v26  ;;  %v1011_v36 = vadd.f32 %v1010_v32, %v3194_v1 }
 0x194   :  { %v899_v37 = vpop.f32.mrf.mxu0  ;;  %v1012_v42 = vpop.f32.mrf.mxu1  ;;  %v1325_v44 = vpack.c.bf16 %v1253_v48, %v1245_v6  ;;  %v1327_v50 = vpack.c.bf16 %v1255_v29, %v1247_v39  ;;  %v1133_v57 = vmul.f32 0.2, %v896_v35 }
 0x195   :  { %v900_v41 = vadd.f32 %v899_v37, %v3180_v34  ;;  %v1326_v43 = vpack.c.bf16 %v1254_v30, %v1246_v28  ;;  %v1013_v45 = vadd.f32 %v1012_v42, %v3199_v13  ;;  %v1328_v49 = vpack.c.bf16 %v1256_v33, %v1248_v22 }
 0x196   :  { %v901_v47 = vpop.f32.mrf.mxu0  ;;  %v1134_v46 = vmul.f32 0.2, %v898_v31  ;;  %v1014_v56 = vpop.f32.mrf.mxu1  ;;  %v1136_v58 = vmul.f32 0.2, %v1011_v36  ;;  %v1135_v34 = vmul.f32 0.2, %v1009_v40  ;;  %v1261_v4 = vmax.f32 %v896_v35, %v1133_v57 }
 0x197   :  { %v1141_v51 = vmul.f32 0.2, %v900_v41  ;;  %v902_v53 = vadd.f32 %v901_v47, %v3185_v38  ;;  %2130 = vmatprep.mubr.bf16.mxu0 %v1326_v43  ;;  %v1143_v59 = vmul.f32 0.2, %v1013_v45  ;;  %v1015_v60 = vadd.f32 %v1014_v56, %v3194_v1  ;;  %2227 = vmatprep.mubr.bf16.mxu1 %v1328_v49 }
 0x198   :  { %2131 = vmatmul.mubr.bf16.gmra.mxu0 %v1325_v44  ;;  %v1262_v63 = vmax.f32 %v898_v31, %v1134_v46  ;;  %v1264_v5 = vmax.f32 %v1011_v36, %v1136_v58  ;;  %v1263_v7 = vmax.f32 %v1009_v40, %v1135_v34 }
 0x199   :  { %v1142_v61 = vmul.f32 0.2, %v902_v53  ;;  %2228 = vmatmul.mubr.bf16.gmra.mxu1 %v1327_v50  ;;  %v1269_v13 = vmax.f32 %v900_v41, %v1141_v51  ;;  %v1144_v62 = vmul.f32 0.2, %v1015_v60  ;;  %v1271_v2 = vmax.f32 %v1013_v45, %v1143_v59 }
 0x19b   :  { %v1270_v3 = vmax.f32 %v902_v53, %v1142_v61  ;;  %v1272_v38 = vmax.f32 %v1015_v60, %v1144_v62  ;;  %v1333_v9 = vpack.c.bf16 %v1269_v13, %v1261_v4  ;;  %v1335_v10 = vpack.c.bf16 %v1271_v2, %v1263_v7 }
 0x19d   :  { %v1334_v8 = vpack.c.bf16 %v1270_v3, %v1262_v63  ;;  %v1336_v52 = vpack.c.bf16 %v1272_v38, %v1264_v5 }
 0x19f   :  { %2138 = vmatprep.mubr.bf16.mxu0 %v1334_v8  ;;  %2235 = vmatprep.mubr.bf16.mxu1 %v1336_v52 }
 0x1a0   :  { %2139 = vmatmul.mubr.bf16.gmra.mxu0 %v1333_v9  ;;  %v3380_v9 = vld [vmem:[%s3473_s4] ss:$0 sm:$0xff]  ;;  %s2886_s4 = smov [#allocation10]  }
 0x1a1   :  { %2236 = vmatmul.mubr.bf16.gmra.mxu1 %v1335_v10  ;;  %s2283_s15 = sshll.u32 %s2886_s4, 4  ;;  %s2284_s15 = int_to_ptr.vmem [resolvable:$true] %s2283_s15 }
 0x1a2   :  { %s2849_s16 = scalar_lea.vmem %s2284_s15, 16  ;;  %s2853_s17 = scalar_lea.vmem %s2284_s15, 32 }
 0x1a3   :  { %p2850_p6 = scmp.ne.s32.totalorder %s2284_s15, %s2849_s16  ;;  %p2854_p7 = scmp.lt.s32.totalorder %s2284_s15, %s2284_s15 }
 0x1a4   :  { %p2855_p8 = scmp.lt.s32.totalorder %s2853_s17, %s2849_s16 }
 0x1a6   :  { %p2856_p9 = por %p2855_p8, %p2854_p7 }
 0x1a8   :  { %p2857_p10 = pnand %p2856_p9, %p2850_p6 }
 0x1e8   :  { %v2447_v1 = vpop.f32.mrf.mxu0  ;;  %v3265_v55 = vpop.f32.mrf.mxu1 }
 0x1ea   :  { %v2448_v11 = vpop.f32.mrf.mxu0  ;;  %v3267_v12 = vpop.f32.mrf.mxu1 }
 0x1eb   :  { %v2449_v7 = vadd.f32 %v2448_v11, %v2447_v1  ;;  %v2513_v1 = vadd.f32 %v3267_v12, %v3265_v55 }
 0x1ec   :  { %v2450_v14 = vpop.f32.mrf.mxu0  ;;  %v3269_v15 = vpop.f32.mrf.mxu1 }
 0x1ee   :  { %v2451_v0 = vpop.f32.mrf.mxu0  ;;  %v3271_v16 = vpop.f32.mrf.mxu1 }
 0x1f0   :  { %v3273_v17 = vpop.f32.mrf.mxu0 }
 0x1f1   :  { %v3275_v18 = vpop.f32.mrf.mxu1 }
 0x1f2   :  { %v3277_v19 = vpop.f32.mrf.mxu0 }
 0x1f3   :  { %v3279_v20 = vpop.f32.mrf.mxu1 }
 0x1f4   :  { %v3281_v54 = vpop.f32.mrf.mxu0 }
 0x1f5   :  { %v3283_v21 = vpop.f32.mrf.mxu1 }
 0x1f6   :  { %v3285_v23 = vpop.f32.mrf.mxu0 }
 0x1f7   :  { %v3287_v24 = vpop.f32.mrf.mxu1  ;;  %v2458_v12 = vadd.f32 %v3285_v23, %v3281_v54 }
 0x1f8   :  { %v3289_v25 = vpop.f32.mrf.mxu0 }
 0x1f9   :  { %v3291_v6 = vpop.f32.mrf.mxu1 }
 0x1fa   :  { %v3293_v48 = vpop.f32.mrf.mxu0 }
 0x1fb   :  { %v3295_v26 = vpop.f32.mrf.mxu1 }
 0x1fc   :  { %v3297_v27 = vpop.f32.mrf.mxu0 }
 0x1fd   :  { %v3299_v28 = vpop.f32.mrf.mxu1 }
 0x1fe   :  { %v3301_v29 = vpop.f32.mrf.mxu0 }
 0x1ff   :  { %v3303_v30 = vpop.f32.mrf.mxu1 }
 0x200   :  { %v3305_v31 = vpop.f32.mrf.mxu0 }
 0x201   :  { %v3307_v32 = vpop.f32.mrf.mxu1 }
 0x202   :  { %v3309_v22 = vpop.f32.mrf.mxu0 }
 0x203   :  { %v3311_v33 = vpop.f32.mrf.mxu1 }
 0x204   :  { %v3313_v35 = vpop.f32.mrf.mxu0 }
 0x205   :  { %v3315_v36 = vpop.f32.mrf.mxu1 }
 0x206   :  { %v3317_v37 = vpop.f32.mrf.mxu0 }
 0x207   :  { %v3319_v39 = vpop.f32.mrf.mxu1 }
 0x208   :  { %v3321_v40 = vpop.f32.mrf.mxu0 }
 0x209   :  { %v3323_v41 = vpop.f32.mrf.mxu1 }
 0x20a   :  { %v3325_v42 = vpop.f32.mrf.mxu0 }
 0x20b   :  { %v3327_v43 = vpop.f32.mrf.mxu1 }
 0x20c   :  { %v3329_v44 = vpop.f32.mrf.mxu0 }
 0x20d   :  { %v3331_v45 = vpop.f32.mrf.mxu1 }
 0x20e   :  { %v3333_v47 = vpop.f32.mrf.mxu0 }
 0x20f   :  { %v3335_v49 = vpop.f32.mrf.mxu1 }
 0x210   :  { %v3337_v50 = vpop.f32.mrf.mxu0 }
 0x211   :  { %v3339_v46 = vpop.f32.mrf.mxu1 }
 0x212   :  { %v3341_v51 = vpop.f32.mrf.mxu0 }
 0x213   :  { %v3343_v53 = vpop.f32.mrf.mxu1 }
 0x214   :  { %v3345_v56 = vpop.f32.mrf.mxu0 }
 0x215   :  { %v3347_v57 = vpop.f32.mrf.mxu1 }
 0x216   :  { %v3349_v58 = vpop.f32.mrf.mxu0 }
 0x217   :  { %v3351_v59 = vpop.f32.mrf.mxu1 }
 0x218   :  { %3475 = vst [vmem:[#allocation15_spill] sm:$0xff] %v3351_v59  ;;  %v3353_v60 = vpop.f32.mrf.mxu0 }
 0x219   :  { %v3355_v34 = vpop.f32.mrf.mxu1 }
 0x21a   :  { %3476 = vst [vmem:[#allocation16_spill] sm:$0xff] %v3355_v34  ;;  %v3357_v61 = vpop.f32.mrf.mxu0 }
 0x21b   :  { %v3359_v13 = vpop.f32.mrf.mxu1 }
 0x21c   :  { %3477 = vst [vmem:[#allocation17_spill] sm:$0xff] %v3359_v13  ;;  %v3361_v62 = vpop.f32.mrf.mxu0 }
 0x21d   :  { %3478 = vst [vmem:[#allocation18_spill] sm:$0xff] %v3361_v62  ;;  %v3363_v63 = vpop.f32.mrf.mxu1 }
 0x21e   :  { %3479 = vst [vmem:[#allocation19_spill] sm:$0xff] %v3363_v63  ;;  %v3365_v2 = vpop.f32.mrf.mxu0  ;;  %v2452_v63 = vadd.f32 %v2451_v0, %v2450_v14  ;;  %v2516_v0 = vadd.f32 %v3271_v16, %v3269_v15 }
 0x21f   :  { %3480 = vst [vmem:[#allocation20_spill] sm:$0xff] %v3365_v2  ;;  %v3367_v3 = vpop.f32.mrf.mxu1 }
 0x220   :  { %3481 = vst [vmem:[#allocation21_spill] sm:$0xff] %v3367_v3  ;;  %v3369_v4 = vpop.f32.mrf.mxu0 }
 0x221   :  { %3482 = vst [vmem:[#allocation22_spill] sm:$0xff] %v3369_v4  ;;  %v3371_v5 = vpop.f32.mrf.mxu1  ;;  %v1891_v4 = vadd.f32 %v2449_v7, %v3380_v9 }
 0x222   :  { %3483 = vst [vmem:[#allocation23_spill] sm:$0xff] %v3371_v5  ;;  %v3373_v38 = vpop.f32.mrf.mxu0 }
 0x223   :  { %3484 = vst [vmem:[#allocation24_spill] sm:$0xff] %v3373_v38  ;;  %v3375_v8 = vpop.f32.mrf.mxu1  ;;  %v1988_v34 = vadd.f32 %v2513_v1, %v1891_v4 }
 0x224   :  { %3485 = vst [vmem:[#allocation25_spill] sm:$0xff] %v3375_v8  ;;  %v3382_v52 = vpop.f32.mrf.mxu0  ;;  %v1894_v8 = vadd.f32 %v2452_v63, %v3380_v9 }
 0x225   :  { %3486 = vst [vmem:[#allocation26_spill] sm:$0xff] %v3382_v52  ;;  %v3384_v10 = vpop.f32.mrf.mxu1  ;;  %v2455_v52 = vadd.f32 %v3277_v19, %v3273_v17  ;;  %v2519_v19 = vadd.f32 %v3279_v20, %v3275_v18 }
 0x226   :  { %3487 = vst [vmem:[#allocation27_spill] sm:$0xff] %v3384_v10  ;;  %v3386_v3 = vpop.f32.mrf.mxu0  ;;  %v1991_v62 = vadd.f32 %v2516_v0, %v1894_v8 }
 0x227   :  { %3488 = vst [vmem:[#allocation28_spill] sm:$0xff] %v3386_v3  ;;  %v3389_v5 = vpop.f32.mrf.mxu1  ;;  %v1899_v55 = vadd.f32 %v2455_v52, %v3380_v9  ;;  %v1902_v52 = vadd.f32 %v2458_v12, %v3380_v9 }
 0x228   :  { %3489 = vst [vmem:[#allocation29_spill] sm:$0xff] %v3389_v5  ;;  %v2575_v38 = vpop.f32.mrf.mxu0 }
 0x229   :  { %v2639_v11 = vpop.f32.mrf.mxu1  ;;  %v1996_v8 = vadd.f32 %v2519_v19, %v1899_v55 }
 0x22a   :  { %v2576_v13 = vpop.f32.mrf.mxu0 }
 0x22b   :  { %v2577_v10 = vadd.f32 %v2576_v13, %v2575_v38  ;;  %v2640_v14 = vpop.f32.mrf.mxu1 }
 0x22c   :  { %v2578_v7 = vpop.f32.mrf.mxu0  ;;  %v2641_v3 = vadd.f32 %v2640_v14, %v2639_v11 }
 0x22d   :  { %v2642_v5 = vpop.f32.mrf.mxu1  ;;  %v2085_v2 = vadd.f32 %v2577_v10, %v1988_v34  ;;  %v2461_v34 = vadd.f32 %v3293_v48, %v3289_v25  ;;  %v2464_v25 = vadd.f32 %v3301_v29, %v3297_v27 }
 0x22e   :  { %v2579_v59 = vpop.f32.mrf.mxu0 }
 0x22f   :  { %v2580_v63 = vadd.f32 %v2579_v59, %v2578_v7  ;;  %v2643_v4 = vpop.f32.mrf.mxu1  ;;  %v2182_v1 = vadd.f32 %v2641_v3, %v2085_v2  ;;  %v2522_v2 = vadd.f32 %v3287_v24, %v3283_v21  ;;  %v2525_v7 = vadd.f32 %v3295_v26, %v3291_v6 }
 0x230   :  { %v2581_v17 = vpop.f32.mrf.mxu0  ;;  %v2644_v15 = vadd.f32 %v2643_v4, %v2642_v5 }
 0x231   :  { %v2088_v13 = vadd.f32 %v2580_v63, %v1991_v62  ;;  %v2645_v16 = vpop.f32.mrf.mxu1  ;;  %2244 = vxpose.xlu0.b32.start [1/16] (narrow) %v2182_v1, 8  ;;  %v1907_v62 = vadd.f32 %v2461_v34, %v3380_v9  ;;  %v1999_v11 = vadd.f32 %v2522_v2, %v1902_v52  ;;  %v1910_v1 = vadd.f32 %v2464_v25, %v3380_v9 }
 0x232   :  { %v2582_v38 = vpop.f32.mrf.mxu0  ;;  %v2470_v34 = vadd.f32 %v3317_v37, %v3313_v35  ;;  %v2473_v35 = vadd.f32 %v3325_v42, %v3321_v40 }
 0x233   :  { %v2583_v10 = vadd.f32 %v2582_v38, %v2581_v17  ;;  %v2646_v54 = vpop.f32.mrf.mxu1  ;;  %v2185_v23 = vadd.f32 %v2644_v15, %v2088_v13  ;;  %v2004_v63 = vadd.f32 %v2525_v7, %v1907_v62  ;;  %v2467_v17 = vadd.f32 %v3309_v22, %v3305_v31 }
 0x234   :  { %v2584_v59 = vpop.f32.mrf.mxu0  ;;  %v2647_v18 = vadd.f32 %v2646_v54, %v2645_v16  ;;  %v2528_v15 = vadd.f32 %v3303_v30, %v3299_v28  ;;  %v1918_v2 = vadd.f32 %v2470_v34, %v3380_v9  ;;  %v2476_v7 = vadd.f32 %v3333_v47, %v3329_v44 }
 0x235   :  { %v2093_v3 = vadd.f32 %v2583_v10, %v1996_v8  ;;  %v2648_v20 = vpop.f32.mrf.mxu1  ;;  %2245 = vxpose.xlu0.b32.cont [2/16] (narrow) %v2185_v23, 8  ;;  %v1915_v52 = vadd.f32 %v2467_v17, %v3380_v9  ;;  %v2531_v23 = vadd.f32 %v3311_v33, %v3307_v32 }
 0x236   :  { %v2585_v5 = vpop.f32.mrf.mxu0  ;;  %v2007_v8 = vadd.f32 %v2528_v15, %v1910_v1  ;;  %v1926_v17 = vadd.f32 %v2476_v7, %v3380_v9 }
 0x237   :  { %v2586_v48 = vadd.f32 %v2585_v5, %v2584_v59  ;;  %v2649_v14 = vpop.f32.mrf.mxu1  ;;  %v2190_v0 = vadd.f32 %v2647_v18, %v2093_v3  ;;  %v2012_v18 = vadd.f32 %v2531_v23, %v1915_v52  ;;  %v2534_v5 = vadd.f32 %v3319_v39, %v3315_v36 }
 0x238   :  { %v2587_v55 = vpop.f32.mrf.mxu0  ;;  %v2650_v21 = vadd.f32 %v2649_v14, %v2648_v20 }
 0x239   :  { %v2096_v12 = vadd.f32 %v2586_v48, %v1999_v11  ;;  %v2651_v24 = vpop.f32.mrf.mxu1  ;;  %2246 = vxpose.xlu0.b32.cont [3/16] (narrow) %v2190_v0, 8  ;;  %v2015_v48 = vadd.f32 %v2534_v5, %v1918_v2  ;;  %v1923_v0 = vadd.f32 %v2473_v35, %v3380_v9 }
 0x23a   :  { %v2588_v4 = vpop.f32.mrf.mxu0 }
 0x23b   :  { %v2589_v19 = vadd.f32 %v2588_v4, %v2587_v55  ;;  %v2652_v27 = vpop.f32.mrf.mxu1  ;;  %v2193_v29 = vadd.f32 %v2650_v21, %v2096_v12  ;;  %v2537_v21 = vadd.f32 %v3327_v43, %v3323_v41 }
 0x23c   :  { %v2590_v13 = vpop.f32.mrf.mxu0  ;;  %v2653_v26 = vadd.f32 %v2652_v27, %v2651_v24 }
 0x23d   :  { %v2101_v6 = vadd.f32 %v2589_v19, %v2004_v63  ;;  %v2654_v16 = vpop.f32.mrf.mxu1  ;;  %2247 = vxpose.xlu0.b32.cont [4/16] (narrow) %v2193_v29, 8  ;;  %v2479_v63 = vadd.f32 %v3341_v51, %v3337_v50  ;;  %v2020_v1 = vadd.f32 %v2537_v21, %v1923_v0  ;;  %v2540_v29 = vadd.f32 %v3335_v49, %v3331_v45 }
 0x23e   :  { %v2591_v38 = vpop.f32.mrf.mxu0  ;;  %v2482_v50 = vadd.f32 %v3349_v58, %v3345_v56 }
 0x23f   :  { %v2592_v10 = vadd.f32 %v2591_v38, %v2590_v13  ;;  %v2655_v31 = vpop.f32.mrf.mxu1  ;;  %v2198_v22 = vadd.f32 %v2653_v26, %v2101_v6  ;;  %v1931_v15 = vadd.f32 %v2479_v63, %v3380_v9  ;;  %v2023_v26 = vadd.f32 %v2540_v29, %v1926_v17  ;;  %v3498_v63 = vld [vmem:[#allocation21_spill] sm:$0xff] }
 0x240   :  { %v2593_v54 = vpop.f32.mrf.mxu0  ;;  %v2656_v28 = vadd.f32 %v2655_v31, %v2654_v16  ;;  %v2543_v38 = vadd.f32 %v3343_v53, %v3339_v46 }
 0x241   :  { %v2104_v59 = vadd.f32 %v2592_v10, %v2007_v8  ;;  %v2657_v30 = vpop.f32.mrf.mxu1  ;;  %2248 = vxpose.xlu0.b32.cont [5/16] (narrow) %v2198_v22, 8  ;;  %v1934_v22 = vadd.f32 %v2482_v50, %v3380_v9 }
 0x242   :  { %v2594_v3 = vpop.f32.mrf.mxu0  ;;  %v2028_v10 = vadd.f32 %v2543_v38, %v1931_v15 }
 0x243   :  { %v2595_v37 = vadd.f32 %v2594_v3, %v2593_v54  ;;  %v2658_v20 = vpop.f32.mrf.mxu1  ;;  %v2201_v62 = vadd.f32 %v2656_v28, %v2104_v59  ;;  %v2485_v54 = vadd.f32 %v3357_v61, %v3353_v60  ;;  %v3490_v28 = vld [vmem:[#allocation15_spill] sm:$0xff]  ;;  %v3491_v3 = vld [vmem:[#allocation18_spill] sm:$0xff] }
 0x244   :  { %v2596_v11 = vpop.f32.mrf.mxu0  ;;  %v2659_v32 = vadd.f32 %v2658_v20, %v2657_v30  ;;  %v2546_v30 = vadd.f32 %v3490_v28, %v3347_v57 }
 0x245   :  { %v2109_v25 = vadd.f32 %v2595_v37, %v2012_v18  ;;  %v2660_v33 = vpop.f32.mrf.mxu1  ;;  %2249 = vxpose.xlu0.b32.cont [6/16] (narrow) %v2201_v62, 8  ;;  %v3492_v18 = vld [vmem:[#allocation20_spill] sm:$0xff]  ;;  %v1939_v62 = vadd.f32 %v2485_v54, %v3380_v9 }
 0x246   :  { %v2597_v14 = vpop.f32.mrf.mxu0  ;;  %v2488_v35 = vadd.f32 %v3492_v18, %v3491_v3  ;;  %v2031_v20 = vadd.f32 %v2546_v30, %v1934_v22 }
 0x247   :  { %v2598_v55 = vadd.f32 %v2597_v14, %v2596_v11  ;;  %v2661_v40 = vpop.f32.mrf.mxu1  ;;  %v2206_v42 = vadd.f32 %v2659_v32, %v2109_v25  ;;  %v3493_v25 = vld [vmem:[#allocation16_spill] sm:$0xff]  ;;  %v3494_v32 = vld [vmem:[#allocation17_spill] sm:$0xff] }
 0x248   :  { %v2599_v12 = vpop.f32.mrf.mxu0  ;;  %v2662_v39 = vadd.f32 %v2661_v40, %v2660_v33  ;;  %v2549_v33 = vadd.f32 %v3494_v32, %v3493_v25  ;;  %v1942_v0 = vadd.f32 %v2488_v35, %v3380_v9  ;;  %v3495_v40 = vld [vmem:[#allocation22_spill] sm:$0xff] }
 0x249   :  { %v2112_v36 = vadd.f32 %v2598_v55, %v2015_v48  ;;  %v2663_v24 = vpop.f32.mrf.mxu1  ;;  %2250 = vxpose.xlu0.b32.cont [7/16] (narrow) %v2206_v42, 8  ;;  %v3496_v42 = vld [vmem:[#allocation24_spill] sm:$0xff] }
 0x24a   :  { %v2600_v4 = vpop.f32.mrf.mxu0  ;;  %v2036_v55 = vadd.f32 %v2549_v33, %v1939_v62 }
 0x24b   :  { %v2601_v19 = vadd.f32 %v2600_v4, %v2599_v12  ;;  %v2664_v44 = vpop.f32.mrf.mxu1  ;;  %v2209_v47 = vadd.f32 %v2662_v39, %v2112_v36  ;;  %v2491_v12 = vadd.f32 %v3496_v42, %v3495_v40 }
 0x24c   :  { %v2602_v27 = vpop.f32.mrf.mxu0  ;;  %v2665_v41 = vadd.f32 %v2664_v44, %v2663_v24  ;;  %v3497_v24 = vld [vmem:[#allocation19_spill] sm:$0xff] }
 0x24d   :  { %v2117_v13 = vadd.f32 %v2601_v19, %v2020_v1  ;;  %v2666_v43 = vpop.f32.mrf.mxu1  ;;  %2251 = vxpose.xlu0.b32.cont [8/16] (narrow) %v2209_v47, 8  ;;  %v2552_v4 = vadd.f32 %v3498_v63, %v3497_v24  ;;  %v1947_v29 = vadd.f32 %v2491_v12, %v3380_v9 }
 0x24e   :  { %v2603_v6 = vpop.f32.mrf.mxu0 }
 0x24f   :  { %v2604_v51 = vadd.f32 %v2603_v6, %v2602_v27  ;;  %v2667_v16 = vpop.f32.mrf.mxu1  ;;  %v2214_v34 = vadd.f32 %v2665_v41, %v2117_v13  ;;  %v2039_v47 = vadd.f32 %v2552_v4, %v1942_v0  ;;  %v3499_v13 = vld [vmem:[#allocation26_spill] sm:$0xff]  ;;  %v3500_v41 = vld [vmem:[#allocation28_spill] sm:$0xff] }
 0x250   :  { %v2605_v8 = vpop.f32.mrf.mxu0  ;;  %v2668_v45 = vadd.f32 %v2667_v16, %v2666_v43  ;;  %v2494_v43 = vadd.f32 %v3500_v41, %v3499_v13  ;;  %v3502_v16 = vld [vmem:[#allocation25_spill] sm:$0xff] }
 0x251   :  { %v2120_v52 = vadd.f32 %v2604_v51, %v2023_v26  ;;  %v2669_v49 = vpop.f32.mrf.mxu1  ;;  %2252 = vxpose.xlu0.b32.cont [9/16] (narrow) %v2214_v34, 8  ;;  %v3501_v51 = vld [vmem:[#allocation23_spill] sm:$0xff] }
 0x252   :  { %v2606_v31 = vpop.f32.mrf.mxu0  ;;  %v2555_v34 = vadd.f32 %v3502_v16, %v3501_v51 }
 0x253   :  { %v2607_v23 = vadd.f32 %v2606_v31, %v2605_v8  ;;  %v2670_v56 = vpop.f32.mrf.mxu1  ;;  %v2217_v58 = vadd.f32 %v2668_v45, %v2120_v52 }
 0x254   :  { %v2608_v59 = vpop.f32.mrf.mxu0  ;;  %v2671_v53 = vadd.f32 %v2670_v56, %v2669_v49  ;;  %v2044_v49 = vadd.f32 %v2555_v34, %v1947_v29  ;;  %v3503_v56 = vld [vmem:[#allocation27_spill] sm:$0xff] }
 0x255   :  { %v2125_v46 = vadd.f32 %v2607_v23, %v2028_v10  ;;  %v2672_v2 = vpop.f32.mrf.mxu1  ;;  %2253 = vxpose.xlu0.b32.cont [10/16] (narrow) %v2217_v58, 8  ;;  %v1950_v10 = vadd.f32 %v2494_v43, %v3380_v9  ;;  %v3504_v58 = vld [vmem:[#allocation29_spill] sm:$0xff] }
 0x256   :  { %v2609_v37 = vpop.f32.mrf.mxu0 }
 0x257   :  { %v2610_v5 = vadd.f32 %v2609_v37, %v2608_v59  ;;  %v2673_v60 = vpop.f32.mrf.mxu1  ;;  %v2222_v61 = vadd.f32 %v2671_v53, %v2125_v46  ;;  %v2558_v59 = vadd.f32 %v3504_v58, %v3503_v56 }
 0x258   :  { %v2611_v11 = vpop.f32.mrf.mxu0  ;;  %v2674_v57 = vadd.f32 %v2673_v60, %v2672_v2 }
 0x259   :  { %v2128_v48 = vadd.f32 %v2610_v5, %v2031_v20  ;;  %v2675_v14 = vpop.f32.mrf.mxu1  ;;  %2254 = vxpose.xlu0.b32.cont [11/16] (narrow) %v2222_v61, 8  ;;  %v2047_v2 = vadd.f32 %v2558_v59, %v1950_v10 }
 0x25a   :  { %v2612_v7 = vpop.f32.mrf.mxu0 }
 0x25b   :  { %v2613_v21 = vadd.f32 %v2612_v7, %v2611_v11  ;;  %v2676_v36 = vpop.f32.mrf.mxu1  ;;  %v2225_v39 = vadd.f32 %v2674_v57, %v2128_v48 }
 0x25c   :  { %v2614_v1 = vpop.f32.mrf.mxu0  ;;  %v2677_v19 = vadd.f32 %v2676_v36, %v2675_v14 }
 0x25d   :  { %v2133_v17 = vadd.f32 %v2613_v21, %v2036_v55  ;;  %v2678_v44 = vpop.f32.mrf.mxu1  ;;  %2255 = vxpose.xlu0.b32.cont [12/16] (narrow) %v2225_v39, 8 }
 0x25e   :  { %v2615_v27 = vpop.f32.mrf.mxu0 }
 0x25f   :  { %v2616_v15 = vadd.f32 %v2615_v27, %v2614_v1  ;;  %v2679_v6 = vpop.f32.mrf.mxu1  ;;  %v2230_v26 = vadd.f32 %v2677_v19, %v2133_v17 }
 0x260   :  { %v2617_v50 = vpop.f32.mrf.mxu0  ;;  %v2680_v8 = vadd.f32 %v2679_v6, %v2678_v44 }
 0x261   :  { %v2136_v38 = vadd.f32 %v2616_v15, %v2039_v47  ;;  %v2681_v52 = vpop.f32.mrf.mxu1  ;;  %2256 = vxpose.xlu0.b32.cont [13/16] (narrow) %v2230_v26, 8 }
 0x262   :  { %v2618_v45 = vpop.f32.mrf.mxu0 }
 0x263   :  { %v2619_v31 = vadd.f32 %v2618_v45, %v2617_v50  ;;  %v2682_v22 = vpop.f32.mrf.mxu1  ;;  %v2233_v54 = vadd.f32 %v2680_v8, %v2136_v38 }
 0x264   :  { %v2620_v23 = vpop.f32.mrf.mxu0  ;;  %v2683_v30 = vadd.f32 %v2682_v22, %v2681_v52 }
 0x265   :  { %v2141_v28 = vadd.f32 %v2619_v31, %v2044_v49  ;;  %v2684_v46 = vpop.f32.mrf.mxu1  ;;  %2257 = vxpose.xlu0.b32.cont [14/16] (narrow) %v2233_v54, 8 }
 0x266   :  { %v2621_v53 = vpop.f32.mrf.mxu0 }
 0x267   :  { %v2622_v3 = vadd.f32 %v2621_v53, %v2620_v23  ;;  %v2685_v18 = vpop.f32.mrf.mxu1  ;;  %v2238_v35 = vadd.f32 %v2683_v30, %v2141_v28 }
 0x268   :  { %v2686_v20 = vadd.f32 %v2685_v18, %v2684_v46 }
 0x269   :  { %v2144_v37 = vadd.f32 %v2622_v3, %v2047_v2  ;;  %2258 = vxpose.xlu0.b32.cont [15/16] (narrow) %v2238_v35, 8 }
 0x26b   :  { %v2241_v9 = vadd.f32 %v2686_v20, %v2144_v37 }
 0x26d   :  { %2259 = vxpose.xlu0.b32.end [16/16] (narrow) %v2241_v9, 8 }
 0x2ad   :  { %v2260_v62 = vpop.trf.xlu0 }
 0x2ae   :  { %2276 = vst [vmem:[#allocation10] sm:$0x1] %v2260_v62 }
 0x2af   :  { %2860 = shalt.err (!%p2857_p10)
}
 0x2b0   :  { %2286 = dma.vmem_to_hbm [thread:$0]  %s2284_s15, 16, %s3474_s5, [#allocation4]  }
 0x2b1   :  { %2875 = dma.done.wait [#allocation4], 16  }
 0x2b2   :  { %2876 = vsyncadd [#allocation4], 4294967280 }
 0x2b3   :  { %2290 = vsyncpa [#allocation3], 1 }
 0x2b4   :  { %2291 = vsyncpa [#allocation6], 1 }
 0x2b5   :  { %2292 = vsyncpa [#allocation9], 1 }
 0x2b6   :  { %2293 = vsyncpa [#allocation4], 1 }

// kernel: tpu_custom_call.1
= control target key start
LH: loop header
LB: loop body
LE: loop exit
PB: predicated region body
PF: predicated region fallthrough
CT: control target
= control target key end

     0   :  { %10 = vsyncpa [#allocation3], 0  ;;  %s3469_s0 = inlined_call_operand.hbm [shape: bf16[128,128], index: 0, kind: input, shape index: {}]   ;;  %s3470_s1 = inlined_call_operand.hbm [shape: bf16[128,1024], index: 1, kind: input, shape index: {}]   ;;  %s3471_s2 = inlined_call_operand.hbm [shape: f32[1,1024], index: 2, kind: input, shape index: {}]   ;;  %s3472_s3 = inlined_call_operand.hbm [shape: bf16[1024,128], index: 3, kind: input, shape index: {}]   ;;  %s3473_s4 = inlined_call_operand.vmem [shape: f32[1,128], index: 4, kind: input, shape index: {}]   ;;  %s3474_s5 = inlined_call_operand.hbm [shape: f32[1,128], index: 5, kind: output, shape index: {}]  }
   0x1   :  { %11 = vsyncpa [#allocation6], 0 }
   0x2   :  { %12 = vsyncpa [#allocation9], 0 }
   0x3   :  { %13 = vsyncpa [#allocation4], 0  ;;  %s2877_s18 = smov [#allocation5]  }
   0x4   :  { %s31_s19 = sshll.u32 %s2877_s18, 4  ;;  %s32_s19 = int_to_ptr.vmem [resolvable:$true] %s31_s19 }
   0x5   :  { %s2777_s20 = scalar_lea.vmem %s32_s19, 8192  ;;  %p2782_p1 = scmp.lt.s32.totalorder %s32_s19, %s32_s19 }
   0x6   :  { %p2778_p0 = scmp.ne.s32.totalorder %s32_s19, %s2777_s20  ;;  %p2783_p2 = scmp.lt.s32.totalorder %s2777_s20, %s2777_s20 }
   0x8   :  { %p2784_p3 = por %p2783_p2, %p2782_p1 }
   0xa   :  { %p2785_p4 = pnand %p2784_p3, %p2778_p0 }
   0xc   :  { %2788 = shalt.err (!%p2785_p4)
}
   0xd   :  { %s2878_s21 = smov 512   ;;  %s2879_s22 = smov 32  }
   0xe   :  { %37 = dma.hbm_to_vmem [thread:$0]  %s3470_s1, 8192, %s32_s19, [#allocation6], %s2878_s21, %s2878_s21, %s2879_s22  }
   0xf   :  { %s2880_s25 = smov [#allocation2]  }
  0x10   :  { %s19_s26 = sshll.u32 %s2880_s25, 4  ;;  %s20_s26 = int_to_ptr.vmem [resolvable:$true] %s19_s26 }
  0x11   :  { %s2797_s27 = scalar_lea.vmem %s20_s26, 1024  ;;  %p2802_p6 = scmp.lt.s32.totalorder %s20_s26, %s20_s26 }
  0x12   :  { %p2798_p5 = scmp.ne.s32.totalorder %s20_s26, %s2797_s27  ;;  %p2803_p7 = scmp.lt.s32.totalorder %s2797_s27, %s2797_s27 }
  0x14   :  { %p2804_p8 = por %p2803_p7, %p2802_p6 }
  0x16   :  { %p2805_p9 = pnand %p2804_p8, %p2798_p5 }
  0x18   :  { %2808 = shalt.err (!%p2805_p9)
}
  0x19   :  { %s2881_s28 = smov 64   ;;  %s2882_s29 = smov 4  }
  0x1a   :  { %25 = dma.hbm_to_vmem [thread:$0]  %s3469_s0, 1024, %s20_s26, [#allocation3], %s2881_s28, %s2881_s28, %s2882_s29  }
  0x1b   :  { %s2883_s7 = smov [#allocation7]   ;;  %s2884_s9 = smov [#allocation8]  }
  0x1c   :  { %s44_s8 = sshll.u32 %s2883_s7, 4  ;;  %s53_s1 = sshll.u32 %s2884_s9, 4  ;;  %s45_s8 = int_to_ptr.vmem [resolvable:$true] %s44_s8  ;;  %s54_s1 = int_to_ptr.vmem [resolvable:$true] %s53_s1 }
  0x1d   :  { %s2817_s10 = scalar_lea.vmem %s45_s8, 128  ;;  %p2822_p11 = scmp.lt.s32.totalorder %s45_s8, %s45_s8 }
  0x1e   :  { %p2818_p10 = scmp.ne.s32.totalorder %s45_s8, %s2817_s10  ;;  %p2823_p12 = scmp.lt.s32.totalorder %s2817_s10, %s2817_s10 }
  0x20   :  { %p2824_p13 = por %p2823_p12, %p2822_p11 }
  0x22   :  { %p2825_p0 = pnand %p2824_p13, %p2818_p10 }
  0x24   :  { %2828 = shalt.err (!%p2825_p0)
}
  0x25   :  { %47 = dma.hbm_to_vmem [thread:$0]  %s3471_s2, 128, %s45_s8, [#allocation6]  }
  0x26   :  { %s2837_s13 = scalar_lea.vmem %s54_s1, 8192  ;;  %p2842_p2 = scmp.lt.s32.totalorder %s54_s1, %s54_s1 }
  0x27   :  { %p2838_p1 = scmp.ne.s32.totalorder %s54_s1, %s2837_s13  ;;  %p2843_p3 = scmp.lt.s32.totalorder %s2837_s13, %s2837_s13 }
  0x29   :  { %p2844_p4 = por %p2843_p3, %p2842_p2 }
  0x2b   :  { %p2845_p5 = pnand %p2844_p4, %p2838_p1 }
  0x2d   :  { %2848 = shalt.err (!%p2845_p5)
}
  0x2e   :  { %59 = dma.hbm_to_vmem [thread:$0]  %s3472_s3, 8192, %s54_s1, [#allocation9], %s2881_s28, %s2881_s28, %s2882_s29  }
  0x2f   :  { %2869 = dma.done.wait [#allocation3], 1024  }
  0x30   :  { %2870 = vsyncadd [#allocation3], 4294966272 }
  0x31   :  { %2871 = dma.done.wait [#allocation6], 8320  }
  0x32   :  { %2872 = vsyncadd [#allocation6], 4294958976 }
  0x33   :  { %2873 = dma.done.wait [#allocation9], 8192  }
  0x34   :  { %2874 = vsyncadd [#allocation9], 4294959104  ;;  %v2885_v0 = vmov 0   ;;  %v147_v1 = vld [vmem:[#allocation5 + $0x1c0] sm:$0xff]  ;;  %v148_v3 = vld [vmem:[#allocation5 + $0x1c8] sm:$0xff] }
  0x35   :  { %597 = vmatprep.mubr.bf16.mxu0 %v2885_v0  ;;  %710 = vmatprep.mubr.bf16.mxu1 %v2885_v0  ;;  %v151_v2 = vld [vmem:[#allocation5 + $0x1e0] sm:$0xff]  ;;  %v152_v5 = vld [vmem:[#allocation5 + $0x1e8] sm:$0xff]  ;;  %v149_v63 = vld [vmem:[#allocation5 + $0x1d0] sm:$0xff] }
  0x36   :  { %v2359_v4 = vcombine.high %v147_v1, %v151_v2  ;;  %v2358_v6 = vcombine.low %v147_v1, %v151_v2  ;;  %v139_v7 = vld [vmem:[#allocation5 + $0x180] sm:$0xff]  ;;  %v2361_v9 = vcombine.high %v148_v3, %v152_v5  ;;  %v2360_v10 = vcombine.low %v148_v3, %v152_v5  ;;  %v140_v12 = vld [vmem:[#allocation5 + $0x188] sm:$0xff]  ;;  %v153_v1 = vld [vmem:[#allocation5 + $0x1f0] sm:$0xff] }
  0x37   :  { %v143_v8 = vld [vmem:[#allocation5 + $0x1a0] sm:$0xff]  ;;  %v144_v13 = vld [vmem:[#allocation5 + $0x1a8] sm:$0xff]  ;;  %v150_v2 = vld [vmem:[#allocation5 + $0x1d8] sm:$0xff] }
  0x38   :  { %v2351_v11 = vcombine.high %v139_v7, %v143_v8  ;;  %v131_v14 = vld [vmem:[#allocation5 + $0x140] sm:$0xff]  ;;  %565 = vmatprep.subr.bf16.mxu0 %v2359_v4  ;;  %v2353_v15 = vcombine.high %v140_v12, %v144_v13  ;;  %v132_v17 = vld [vmem:[#allocation5 + $0x148] sm:$0xff]  ;;  %678 = vmatprep.subr.bf16.mxu1 %v2361_v9  ;;  %v2350_v19 = vcombine.low %v139_v7, %v143_v8  ;;  %v154_v3 = vld [vmem:[#allocation5 + $0x1f8] sm:$0xff] }
  0x39   :  { %v135_v16 = vld [vmem:[#allocation5 + $0x160] sm:$0xff]  ;;  %v136_v18 = vld [vmem:[#allocation5 + $0x168] sm:$0xff]  ;;  %566 = vmatpush1.bf16.msra.mxu0 %v2358_v6  ;;  %679 = vmatpush1.bf16.msra.mxu1 %v2360_v10  ;;  %v2352_v20 = vcombine.low %v140_v12, %v144_v13  ;;  %v2363_v7 = vcombine.high %v149_v63, %v153_v1  ;;  %v141_v8 = vld [vmem:[#allocation5 + $0x190] sm:$0xff]  ;;  %v2365_v10 = vcombine.high %v150_v2, %v154_v3 }
  0x3a   :  { %567 = vmatprep.subr.bf16.mxu0 %v2351_v11  ;;  %v2343_v21 = vcombine.high %v131_v14, %v135_v16  ;;  %680 = vmatprep.subr.bf16.mxu1 %v2353_v15  ;;  %v2345_v22 = vcombine.high %v132_v17, %v136_v18  ;;  %v123_v23 = vld [vmem:[#allocation5 + $0x100] sm:$0xff]  ;;  %v124_v25 = vld [vmem:[#allocation5 + $0x108] sm:$0xff]  ;;  %v2342_v27 = vcombine.low %v131_v14, %v135_v16  ;;  %v145_v9 = vld [vmem:[#allocation5 + $0x1b0] sm:$0xff] }
  0x3b   :  { %v127_v24 = vld [vmem:[#allocation5 + $0x120] sm:$0xff]  ;;  %v128_v26 = vld [vmem:[#allocation5 + $0x128] sm:$0xff]  ;;  %v2344_v28 = vcombine.low %v132_v17, %v136_v18  ;;  %v142_v11 = vld [vmem:[#allocation5 + $0x198] sm:$0xff]  ;;  %v2362_v13 = vcombine.low %v149_v63, %v153_v1  ;;  %v2364_v15 = vcombine.low %v150_v2, %v154_v3  ;;  %v2355_v17 = vcombine.high %v141_v8, %v145_v9 }
  0x3c   :  { %v2335_v29 = vcombine.high %v123_v23, %v127_v24  ;;  %v2337_v30 = vcombine.high %v124_v25, %v128_v26  ;;  %v115_v31 = vld [vmem:[#allocation5 + $0xc0] sm:$0xff]  ;;  %v116_v33 = vld [vmem:[#allocation5 + $0xc8] sm:$0xff]  ;;  %v2334_v35 = vcombine.low %v123_v23, %v127_v24  ;;  %v2336_v36 = vcombine.low %v124_v25, %v128_v26  ;;  %v146_v12 = vld [vmem:[#allocation5 + $0x1b8] sm:$0xff] }
  0x3d   :  { %568 = vmatpush1.bf16.msra.mxu0 %v2350_v19  ;;  %681 = vmatpush1.bf16.msra.mxu1 %v2352_v20  ;;  %v119_v32 = vld [vmem:[#allocation5 + $0xe0] sm:$0xff]  ;;  %v120_v34 = vld [vmem:[#allocation5 + $0xe8] sm:$0xff]  ;;  %v133_v14 = vld [vmem:[#allocation5 + $0x150] sm:$0xff]  ;;  %v2357_v19 = vcombine.high %v142_v11, %v146_v12  ;;  %v2356_v23 = vcombine.low %v142_v11, %v146_v12 }
  0x3e   :  { %569 = vmatprep.subr.bf16.mxu0 %v2343_v21  ;;  %682 = vmatprep.subr.bf16.mxu1 %v2345_v22  ;;  %v2327_v37 = vcombine.high %v115_v31, %v119_v32  ;;  %v2329_v38 = vcombine.high %v116_v33, %v120_v34  ;;  %v107_v39 = vld [vmem:[#allocation5 + $0x80] sm:$0xff]  ;;  %v108_v41 = vld [vmem:[#allocation5 + $0x88] sm:$0xff]  ;;  %v2326_v43 = vcombine.low %v115_v31, %v119_v32  ;;  %v137_v16 = vld [vmem:[#allocation5 + $0x170] sm:$0xff] }
  0x3f   :  { %v111_v40 = vld [vmem:[#allocation5 + $0xa0] sm:$0xff]  ;;  %v112_v42 = vld [vmem:[#allocation5 + $0xa8] sm:$0xff]  ;;  %v2328_v44 = vcombine.low %v116_v33, %v120_v34  ;;  %v134_v18 = vld [vmem:[#allocation5 + $0x158] sm:$0xff]  ;;  %v2354_v21 = vcombine.low %v141_v8, %v145_v9  ;;  %v2347_v24 = vcombine.high %v133_v14, %v137_v16 }
  0x40   :  { %v2319_v45 = vcombine.high %v107_v39, %v111_v40  ;;  %v2321_v46 = vcombine.high %v108_v41, %v112_v42  ;;  %v99_v47 = vld [vmem:[#allocation5 + $0x40] sm:$0xff]  ;;  %v100_v49 = vld [vmem:[#allocation5 + $0x48] sm:$0xff]  ;;  %v2318_v51 = vcombine.low %v107_v39, %v111_v40  ;;  %v2320_v52 = vcombine.low %v108_v41, %v112_v42  ;;  %v138_v20 = vld [vmem:[#allocation5 + $0x178] sm:$0xff] }
  0x41   :  { %570 = vmatpush1.bf16.msra.mxu0 %v2342_v27  ;;  %683 = vmatpush1.bf16.msra.mxu1 %v2344_v28  ;;  %v103_v48 = vld [vmem:[#allocation5 + $0x60] sm:$0xff]  ;;  %v104_v50 = vld [vmem:[#allocation5 + $0x68] sm:$0xff]  ;;  %v125_v25 = vld [vmem:[#allocation5 + $0x110] sm:$0xff]  ;;  %v2349_v26 = vcombine.high %v134_v18, %v138_v20  ;;  %v2348_v32 = vcombine.low %v134_v18, %v138_v20 }
  0x42   :  { %571 = vmatprep.subr.bf16.mxu0 %v2335_v29  ;;  %684 = vmatprep.subr.bf16.mxu1 %v2337_v30  ;;  %v2311_v53 = vcombine.high %v99_v47, %v103_v48  ;;  %v91_v54 = vld [vmem:[#allocation5] sm:$0xff]  ;;  %v2313_v55 = vcombine.high %v100_v49, %v104_v50  ;;  %v92_v57 = vld [vmem:[#allocation5 + $0x8] sm:$0xff]  ;;  %v2310_v59 = vcombine.low %v99_v47, %v103_v48  ;;  %v129_v27 = vld [vmem:[#allocation5 + $0x130] sm:$0xff] }
  0x43   :  { %v95_v56 = vld [vmem:[#allocation5 + $0x20] sm:$0xff]  ;;  %v96_v58 = vld [vmem:[#allocation5 + $0x28] sm:$0xff]  ;;  %v2312_v60 = vcombine.low %v100_v49, %v104_v50  ;;  %v126_v28 = vld [vmem:[#allocation5 + $0x118] sm:$0xff]  ;;  %v2346_v30 = vcombine.low %v133_v14, %v137_v16  ;;  %v2339_v33 = vcombine.high %v125_v25, %v129_v27  ;;  %v2338_v39 = vcombine.low %v125_v25, %v129_v27 }
  0x44   :  { %v2303_v61 = vcombine.high %v91_v54, %v95_v56  ;;  %v2305_v62 = vcombine.high %v92_v57, %v96_v58  ;;  %v2302_v4 = vcombine.low %v91_v54, %v95_v56  ;;  %v2304_v5 = vcombine.low %v92_v57, %v96_v58  ;;  %v2931_v6 = vld [vmem:[#allocation2] sm:$0xff]   ;;  %v2936_v22 = vld [vmem:[#allocation2 + $0x8] sm:$0xff]   ;;  %v130_v29 = vld [vmem:[#allocation5 + $0x138] sm:$0xff] }
  0x45   :  { %572 = vmatpush1.bf16.msra.mxu0 %v2334_v35  ;;  %685 = vmatpush1.bf16.msra.mxu1 %v2336_v36  ;;  %v117_v31 = vld [vmem:[#allocation5 + $0xd0] sm:$0xff]  ;;  %v2341_v35 = vcombine.high %v126_v28, %v130_v29  ;;  %v118_v36 = vld [vmem:[#allocation5 + $0xd8] sm:$0xff]  ;;  %v2340_v41 = vcombine.low %v126_v28, %v130_v29  ;;  %v2707_v9 = vld [vmem:[#allocation8 + $0xf8] sm:$0xff]  }
  0x46   :  { %573 = vmatprep.subr.bf16.mxu0 %v2327_v37  ;;  %686 = vmatprep.subr.bf16.mxu1 %v2329_v38  ;;  %v121_v34 = vld [vmem:[#allocation5 + $0xf0] sm:$0xff]  ;;  %v122_v37 = vld [vmem:[#allocation5 + $0xf8] sm:$0xff]  ;;  %v2961_v11 = vld [vmem:[#allocation2 + $0x28] sm:$0xff]  }
  0x47   :  { %v2943_v38 = vld [vmem:[#allocation2 + $0x10] sm:$0xff]   ;;  %v2331_v42 = vcombine.high %v117_v31, %v121_v34  ;;  %v2330_v47 = vcombine.low %v117_v31, %v121_v34  ;;  %v2332_v49 = vcombine.low %v118_v36, %v122_v37  ;;  %v106_v54 = vld [vmem:[#allocation5 + $0x78] sm:$0xff]  ;;  %v2706_v14 = vld [vmem:[#allocation8 + $0x38] sm:$0xff]  }
  0x48   :  { %v109_v40 = vld [vmem:[#allocation5 + $0x90] sm:$0xff]  ;;  %v2709_v16 = vld [vmem:[#allocation8 + $0x70] sm:$0xff]   ;;  %v2717_v25 = vld [vmem:[#allocation8 + $0x60] sm:$0xff]  }
  0x49   :  { %574 = vmatpush1.bf16.msra.mxu0 %v2326_v43  ;;  %687 = vmatpush1.bf16.msra.mxu1 %v2328_v44  ;;  %v113_v43 = vld [vmem:[#allocation5 + $0xb0] sm:$0xff]  ;;  %v2333_v44 = vcombine.high %v118_v36, %v122_v37  ;;  %v2710_v18 = vld [vmem:[#allocation8 + $0x30] sm:$0xff]   ;;  %v2720_v27 = vld [vmem:[#allocation8 + $0xa0] sm:$0xff]  }
  0x4a   :  { %575 = vmatprep.subr.bf16.mxu0 %v2319_v45  ;;  %688 = vmatprep.subr.bf16.mxu1 %v2321_v46  ;;  %v110_v45 = vld [vmem:[#allocation5 + $0x98] sm:$0xff]  ;;  %v101_v48 = vld [vmem:[#allocation5 + $0x50] sm:$0xff]  ;;  %v2323_v50 = vcombine.high %v109_v40, %v113_v43  ;;  %v2322_v56 = vcombine.low %v109_v40, %v113_v43  ;;  %v2721_v28 = vld [vmem:[#allocation8 + $0x58] sm:$0xff]  }
  0x4b   :  { %v114_v46 = vld [vmem:[#allocation5 + $0xb8] sm:$0xff]  ;;  %v93_v57 = vld [vmem:[#allocation5 + $0x10] sm:$0xff]  ;;  %v2723_v29 = vld [vmem:[#allocation8 + $0xd8] sm:$0xff]  }
  0x4c   :  { %v97_v58 = vld [vmem:[#allocation5 + $0x30] sm:$0xff]  ;;  %v2724_v31 = vld [vmem:[#allocation8 + $0x98] sm:$0xff]   ;;  %v2728_v34 = vld [vmem:[#allocation8 + $0x90] sm:$0xff]  }
  0x4d   :  { %576 = vmatpush1.bf16.msra.mxu0 %v2318_v51  ;;  %689 = vmatpush1.bf16.msra.mxu1 %v2320_v52  ;;  %v105_v51 = vld [vmem:[#allocation5 + $0x70] sm:$0xff]  ;;  %v2325_v52 = vcombine.high %v110_v45, %v114_v46  ;;  %v2307_v3 = vcombine.high %v93_v57, %v97_v58  ;;  %v2306_v8 = vcombine.low %v93_v57, %v97_v58  ;;  %v2733_v40 = vld [vmem:[#allocation8 + $0x40] sm:$0xff]   ;;  %v2737_v43 = vld [vmem:[#allocation8 + $0x178] sm:$0xff]  }
  0x4e   :  { %577 = vmatprep.subr.bf16.mxu0 %v2311_v53  ;;  %690 = vmatprep.subr.bf16.mxu1 %v2313_v55  ;;  %v102_v53 = vld [vmem:[#allocation5 + $0x58] sm:$0xff]  ;;  %v2314_v1 = vcombine.low %v101_v48, %v105_v51  ;;  %v2967_v12 = vld [vmem:[#allocation2 + $0x30] sm:$0xff]  }
  0x4f   :  { %v2949_v55 = vld [vmem:[#allocation2 + $0x18] sm:$0xff]   ;;  %v2317_v63 = vcombine.high %v102_v53, %v106_v54  ;;  %v2316_v2 = vcombine.low %v102_v53, %v106_v54  ;;  %v2713_v20 = vld [vmem:[#allocation8 + $0x68] sm:$0xff]  }
  0x50   :  { %v2731_v36 = vld [vmem:[#allocation8 + $0xc8] sm:$0xff]  }
  0x51   :  { %578 = vmatpush1.bf16.msra.mxu0 %v2310_v59  ;;  %691 = vmatpush1.bf16.msra.mxu1 %v2312_v60  ;;  %v2324_v59 = vcombine.low %v110_v45, %v114_v46  ;;  %v2315_v60 = vcombine.high %v101_v48, %v105_v51  ;;  %v2730_v37 = vld [vmem:[#allocation8 + $0x8] sm:$0xff]   ;;  %v157_v45 = vlaneseq  ;;  %v3012_v48 = vld [vmem:[#allocation7] sm:$0xff] }
  0x52   :  { %579 = vmatprep.subr.bf16.mxu0 %v2303_v61  ;;  %692 = vmatprep.subr.bf16.mxu1 %v2305_v62  ;;  %v94_v61 = vld [vmem:[#allocation5 + $0x18] sm:$0xff] }
  0x53   :  { %v98_v62 = vld [vmem:[#allocation5 + $0x38] sm:$0xff]  ;;  %v3009_v46 = vshrl.u32 %v157_v45, 7 }
  0x55   :  { %580 = vmatpush1.bf16.msra.mxu0 %v2302_v4  ;;  %693 = vmatpush1.bf16.msra.mxu1 %v2304_v5  ;;  %v2309_v4 = vcombine.high %v94_v61, %v98_v62  ;;  %v2705_v5 = vld [vmem:[#allocation8 + $0x78] sm:$0xff]   ;;  %v167_v51 = vsub.s32 2, %v3009_v46 }
  0x56   :  { %791 = vmatprep.subr.bf16.mxu0 %v2363_v7  ;;  %904 = vmatprep.subr.bf16.mxu1 %v2365_v10  ;;  %v2955_v7 = vld [vmem:[#allocation2 + $0x20] sm:$0xff]   ;;  %v2308_v10 = vcombine.low %v94_v61, %v98_v62 }
  0x58   :  { %598 = vmatmul.mubr.bf16.vlgmr.msra.gmra.mxu0 %v2931_v6  ;;  %711 = vmatmul.mubr.bf16.vlgmr.msra.gmra.mxu1 %v2931_v6 }
  0x59   :  { %792 = vmatpush1.bf16.msra.mxu0 %v2362_v13  ;;  %905 = vmatpush1.bf16.msra.mxu1 %v2364_v15  ;;  %v2973_v13 = vld [vmem:[#allocation2 + $0x38] sm:$0xff]   ;;  %v2708_v15 = vld [vmem:[#allocation8 + $0xb8] sm:$0xff]  }
  0x5a   :  { %607 = vmatprep.mubr.bf16.mxu0 %v2885_v0  ;;  %720 = vmatprep.mubr.bf16.mxu1 %v2885_v0 }
  0x5b   :  { %793 = vmatprep.subr.bf16.mxu0 %v2355_v17  ;;  %906 = vmatprep.subr.bf16.mxu1 %v2357_v19  ;;  %v2711_v17 = vld [vmem:[#allocation8 + $0xf0] sm:$0xff]  }
  0x5c   :  { %v2712_v19 = vld [vmem:[#allocation8 + $0xb0] sm:$0xff]  }
  0x5d   :  { %794 = vmatpush1.bf16.msra.mxu0 %v2354_v21  ;;  %907 = vmatpush1.bf16.msra.mxu1 %v2356_v23  ;;  %v2715_v21 = vld [vmem:[#allocation8 + $0xe8] sm:$0xff]  }
  0x5e   :  { %795 = vmatprep.subr.bf16.mxu0 %v2347_v24  ;;  %908 = vmatprep.subr.bf16.mxu1 %v2349_v26  ;;  %v2714_v23 = vld [vmem:[#allocation8 + $0x28] sm:$0xff]   ;;  %v2718_v26 = vld [vmem:[#allocation8 + $0x20] sm:$0xff]  }
  0x5f   :  { %v2716_v24 = vld [vmem:[#allocation8 + $0xa8] sm:$0xff]  }
  0x60   :  { %608 = vmatmul.mubr.bf16.gmra.mxu0 %v2936_v22  ;;  %721 = vmatmul.mubr.bf16.gmra.mxu1 %v2936_v22 }
  0x61   :  { %617 = vmatprep.mubr.bf16.mxu0 %v2885_v0  ;;  %730 = vmatprep.mubr.bf16.mxu1 %v2885_v0 }
  0x62   :  { %796 = vmatpush1.bf16.msra.mxu0 %v2346_v30  ;;  %909 = vmatpush1.bf16.msra.mxu1 %v2348_v32  ;;  %v2722_v30 = vld [vmem:[#allocation8 + $0x18] sm:$0xff]   ;;  %v2725_v32 = vld [vmem:[#allocation8 + $0x50] sm:$0xff]  }
  0x63   :  { %797 = vmatprep.subr.bf16.mxu0 %v2339_v33  ;;  %910 = vmatprep.subr.bf16.mxu1 %v2341_v35  ;;  %v2726_v33 = vld [vmem:[#allocation8 + $0x10] sm:$0xff]   ;;  %v2729_v35 = vld [vmem:[#allocation8 + $0x48] sm:$0xff]  }
  0x66   :  { %798 = vmatpush1.bf16.msra.mxu0 %v2338_v39  ;;  %911 = vmatpush1.bf16.msra.mxu1 %v2340_v41  ;;  %v2732_v39 = vld [vmem:[#allocation8 + $0x88] sm:$0xff]   ;;  %v2734_v41 = vld [vmem:[#allocation8] sm:$0xff]  }
  0x67   :  { %799 = vmatprep.subr.bf16.mxu0 %v2331_v42  ;;  %912 = vmatprep.subr.bf16.mxu1 %v2333_v44  ;;  %v2736_v42 = vld [vmem:[#allocation8 + $0x80] sm:$0xff]   ;;  %v2739_v44 = vld [vmem:[#allocation8 + $0x1f8] sm:$0xff]  }
  0x68   :  { %618 = vmatmul.mubr.bf16.gmra.mxu0 %v2943_v38  ;;  %731 = vmatmul.mubr.bf16.gmra.mxu1 %v2943_v38 }
  0x69   :  { %627 = vmatprep.mubr.bf16.mxu0 %v2885_v0  ;;  %740 = vmatprep.mubr.bf16.mxu1 %v2885_v0 }
  0x6a   :  { %800 = vmatpush1.bf16.msra.mxu0 %v2330_v47  ;;  %913 = vmatpush1.bf16.msra.mxu1 %v2332_v49  ;;  %v159_v47 = vsub.s32 0, %v3009_v46  ;;  %v163_v49 = vsub.s32 1, %v3009_v46 }
  0x6b   :  { %801 = vmatprep.subr.bf16.mxu0 %v2323_v50  ;;  %914 = vmatprep.subr.bf16.mxu1 %v2325_v52  ;;  %v171_v50 = vsub.s32 3, %v3009_v46 }
  0x6c   :  { %v3018_v52 = vrot.slane %v3012_v48, %v159_v47 }
  0x6d   :  { %v3024_v54 = vrot.slane %v3012_v48, %v171_v50  ;;  %v2743_v50 = vld [vmem:[#allocation8 + $0x1f0] sm:$0xff]  }
  0x6e   :  { %802 = vmatpush1.bf16.msra.mxu0 %v2322_v56  ;;  %915 = vmatpush1.bf16.msra.mxu1 %v2324_v59 }
  0x6f   :  { %803 = vmatprep.subr.bf16.mxu0 %v2315_v60  ;;  %916 = vmatprep.subr.bf16.mxu1 %v2317_v63 }
  0x70   :  { %628 = vmatmul.mubr.bf16.gmra.mxu0 %v2949_v55  ;;  %741 = vmatmul.mubr.bf16.gmra.mxu1 %v2949_v55 }
  0x71   :  { %637 = vmatprep.mubr.bf16.mxu0 %v2885_v0  ;;  %750 = vmatprep.mubr.bf16.mxu1 %v2885_v0 }
  0x72   :  { %804 = vmatpush1.bf16.msra.mxu0 %v2314_v1  ;;  %917 = vmatpush1.bf16.msra.mxu1 %v2316_v2 }
  0x73   :  { %805 = vmatprep.subr.bf16.mxu0 %v2307_v3  ;;  %918 = vmatprep.subr.bf16.mxu1 %v2309_v4 }
  0x76   :  { %806 = vmatpush1.bf16.msra.mxu0 %v2306_v8  ;;  %919 = vmatpush1.bf16.msra.mxu1 %v2308_v10 }
  0x77   :  { %2431 = vmatprep.subr.bf16.mxu0 %v2705_v5  ;;  %2495 = vmatprep.subr.bf16.mxu1 %v2707_v9 }
  0x78   :  { %638 = vmatmul.mubr.bf16.gmra.mxu0 %v2955_v7  ;;  %751 = vmatmul.mubr.bf16.gmra.mxu1 %v2955_v7 }
  0x79   :  { %647 = vmatprep.mubr.bf16.mxu0 %v2885_v0  ;;  %760 = vmatprep.mubr.bf16.mxu1 %v2885_v0 }
  0x80   :  { %648 = vmatmul.mubr.bf16.gmra.mxu0 %v2961_v11  ;;  %761 = vmatmul.mubr.bf16.gmra.mxu1 %v2961_v11 }
  0x81   :  { %657 = vmatprep.mubr.bf16.mxu0 %v2885_v0  ;;  %770 = vmatprep.mubr.bf16.mxu1 %v2885_v0 }
  0x88   :  { %658 = vmatmul.mubr.bf16.gmra.mxu0 %v2967_v12  ;;  %771 = vmatmul.mubr.bf16.gmra.mxu1 %v2967_v12 }
  0x89   :  { %667 = vmatprep.mubr.bf16.mxu0 %v2885_v0  ;;  %780 = vmatprep.mubr.bf16.mxu1 %v2885_v0 }
  0x90   :  { %668 = vmatmul.mubr.bf16.gmra.mxu0 %v2973_v13  ;;  %781 = vmatmul.mubr.bf16.gmra.mxu1 %v2973_v13 }
  0x91   :  { %823 = vmatprep.mubr.bf16.mxu0 %v2885_v0  ;;  %936 = vmatprep.mubr.bf16.mxu1 %v2885_v0 }
  0x98   :  { %824 = vmatmul.mubr.bf16.vlgmr.msra.gmra.mxu0 %v2931_v6  ;;  %937 = vmatmul.mubr.bf16.vlgmr.msra.gmra.mxu1 %v2931_v6  ;;  %v2719_v6 = vld [vmem:[#allocation8 + $0xe0] sm:$0xff]  }
  0x99   :  { %833 = vmatprep.mubr.bf16.mxu0 %v2885_v0  ;;  %946 = vmatprep.mubr.bf16.mxu1 %v2885_v0 }
  0x9a   :  { %2432 = vmatpush3.bf16.msra.mxu0 %v2706_v14  ;;  %2496 = vmatpush3.bf16.msra.mxu1 %v2708_v15 }
  0x9b   :  { %2433 = vmatprep.subr.bf16.mxu0 %v2709_v16  ;;  %2497 = vmatprep.subr.bf16.mxu1 %v2711_v17 }
  0x9e   :  { %2434 = vmatpush3.bf16.msra.mxu0 %v2710_v18  ;;  %2498 = vmatpush3.bf16.msra.mxu1 %v2712_v19 }
  0x9f   :  { %2435 = vmatprep.subr.bf16.mxu0 %v2713_v20  ;;  %2499 = vmatprep.subr.bf16.mxu1 %v2715_v21 }
  0xa0   :  { %834 = vmatmul.mubr.bf16.gmra.mxu0 %v2936_v22  ;;  %947 = vmatmul.mubr.bf16.gmra.mxu1 %v2936_v22  ;;  %v2727_v22 = vld [vmem:[#allocation8 + $0xd0] sm:$0xff]  }
  0xa1   :  { %843 = vmatprep.mubr.bf16.mxu0 %v2885_v0  ;;  %956 = vmatprep.mubr.bf16.mxu1 %v2885_v0 }
  0xa2   :  { %2436 = vmatpush3.bf16.msra.mxu0 %v2714_v23  ;;  %2500 = vmatpush3.bf16.msra.mxu1 %v2716_v24 }
  0xa3   :  { %2437 = vmatprep.subr.bf16.mxu0 %v2717_v25  ;;  %2501 = vmatprep.subr.bf16.mxu1 %v2719_v6 }
  0xa6   :  { %2438 = vmatpush3.bf16.msra.mxu0 %v2718_v26  ;;  %2502 = vmatpush3.bf16.msra.mxu1 %v2720_v27 }
  0xa7   :  { %2439 = vmatprep.subr.bf16.mxu0 %v2721_v28  ;;  %2503 = vmatprep.subr.bf16.mxu1 %v2723_v29 }
  0xa8   :  { %844 = vmatmul.mubr.bf16.gmra.mxu0 %v2943_v38  ;;  %957 = vmatmul.mubr.bf16.gmra.mxu1 %v2943_v38  ;;  %v2735_v38 = vld [vmem:[#allocation8 + $0xc0] sm:$0xff]  }
  0xa9   :  { %853 = vmatprep.mubr.bf16.mxu0 %v2885_v0  ;;  %966 = vmatprep.mubr.bf16.mxu1 %v2885_v0 }
  0xaa   :  { %2440 = vmatpush3.bf16.msra.mxu0 %v2722_v30  ;;  %2504 = vmatpush3.bf16.msra.mxu1 %v2724_v31 }
  0xab   :  { %2441 = vmatprep.subr.bf16.mxu0 %v2725_v32  ;;  %2505 = vmatprep.subr.bf16.mxu1 %v2727_v22 }
  0xae   :  { %2442 = vmatpush3.bf16.msra.mxu0 %v2726_v33  ;;  %2506 = vmatpush3.bf16.msra.mxu1 %v2728_v34 }
  0xaf   :  { %2443 = vmatprep.subr.bf16.mxu0 %v2729_v35  ;;  %2507 = vmatprep.subr.bf16.mxu1 %v2731_v36  ;;  %v2738_v36 = vld [vmem:[#allocation8 + $0x138] sm:$0xff]  }
  0xb0   :  { %854 = vmatmul.mubr.bf16.gmra.mxu0 %v2949_v55  ;;  %967 = vmatmul.mubr.bf16.gmra.mxu1 %v2949_v55  ;;  %v3027_v55 = vrot.slane %v3012_v48, %v167_v51 }
  0xb1   :  { %863 = vmatprep.mubr.bf16.mxu0 %v2885_v0  ;;  %976 = vmatprep.mubr.bf16.mxu1 %v2885_v0 }
  0xb2   :  { %2444 = vmatpush3.bf16.msra.mxu0 %v2730_v37  ;;  %2508 = vmatpush3.bf16.msra.mxu1 %v2732_v39 }
  0xb3   :  { %2445 = vmatprep.subr.bf16.mxu0 %v2733_v40  ;;  %2509 = vmatprep.subr.bf16.mxu1 %v2735_v38 }
  0xb6   :  { %2446 = vmatpush3.bf16.msra.mxu0 %v2734_v41  ;;  %2510 = vmatpush3.bf16.msra.mxu1 %v2736_v42  ;;  %v2740_v41 = vld [vmem:[#allocation8 + $0x1b8] sm:$0xff]   ;;  %v2741_v42 = vld [vmem:[#allocation8 + $0x170] sm:$0xff]  }
  0xb7   :  { %2559 = vmatprep.subr.bf16.mxu0 %v2737_v43  ;;  %2623 = vmatprep.subr.bf16.mxu1 %v2739_v44 }
  0xb8   :  { %864 = vmatmul.mubr.bf16.gmra.mxu0 %v2955_v7  ;;  %977 = vmatmul.mubr.bf16.gmra.mxu1 %v2955_v7 }
  0xb9   :  { %873 = vmatprep.mubr.bf16.mxu0 %v2885_v0  ;;  %986 = vmatprep.mubr.bf16.mxu1 %v2885_v0 }
  0xc0   :  { %874 = vmatmul.mubr.bf16.gmra.mxu0 %v2961_v11  ;;  %987 = vmatmul.mubr.bf16.gmra.mxu1 %v2961_v11 }
  0xc1   :  { %883 = vmatprep.mubr.bf16.mxu0 %v2885_v0  ;;  %996 = vmatprep.mubr.bf16.mxu1 %v2885_v0 }
  0xc8   :  { %884 = vmatmul.mubr.bf16.gmra.mxu0 %v2967_v12  ;;  %997 = vmatmul.mubr.bf16.gmra.mxu1 %v2967_v12 }
  0xc9   :  { %893 = vmatprep.mubr.bf16.mxu0 %v2885_v0  ;;  %1006 = vmatprep.mubr.bf16.mxu1 %v2885_v0  ;;  %v3021_v0 = vrot.slane %v3012_v48, %v163_v49 }
  0xd0   :  { %894 = vmatmul.mubr.bf16.gmra.mxu0 %v2973_v13  ;;  %1007 = vmatmul.mubr.bf16.gmra.mxu1 %v2973_v13 }
 0x118   :  { %v599_v53 = vpop.f32.mrf.mxu0  ;;  %v712_v56 = vpop.f32.mrf.mxu1 }
 0x119   :  { %v600_v57 = vadd.f32 %v599_v53, %v3018_v52  ;;  %v713_v63 = vadd.f32 %v712_v56, %v3027_v55 }
 0x11a   :  { %v601_v58 = vpop.f32.mrf.mxu0  ;;  %v714_v60 = vpop.f32.mrf.mxu1 }
 0x11b   :  { %v602_v59 = vadd.f32 %v601_v58, %v3021_v0  ;;  %v715_v61 = vadd.f32 %v714_v60, %v3024_v54  ;;  %v1017_v3 = vmul.f32 0.2, %v600_v57  ;;  %v1019_v15 = vmul.f32 0.2, %v713_v63 }
 0x11c   :  { %v603_v62 = vpop.f32.mrf.mxu0  ;;  %v716_v2 = vpop.f32.mrf.mxu1 }
 0x11d   :  { %v604_v1 = vadd.f32 %v603_v62, %v3018_v52  ;;  %v717_v4 = vadd.f32 %v716_v2, %v3027_v55  ;;  %v1018_v7 = vmul.f32 0.2, %v602_v59  ;;  %v1020_v11 = vmul.f32 0.2, %v715_v61  ;;  %v2742_v62 = vld [vmem:[#allocation8 + $0x130] sm:$0xff]  }
 0x11e   :  { %v605_v5 = vpop.f32.mrf.mxu0  ;;  %v718_v10 = vpop.f32.mrf.mxu1  ;;  %v1145_v18 = vmax.f32 %v600_v57, %v1017_v3  ;;  %v1147_v32 = vmax.f32 %v713_v63, %v1019_v15 }
 0x11f   :  { %v1025_v8 = vmul.f32 0.2, %v604_v1  ;;  %v606_v9 = vadd.f32 %v605_v5, %v3021_v0  ;;  %v1027_v12 = vmul.f32 0.2, %v717_v4  ;;  %v719_v13 = vadd.f32 %v718_v10, %v3024_v54  ;;  %v2745_v5 = vld [vmem:[#allocation8 + $0x168] sm:$0xff]  }
 0x120   :  { %v609_v14 = vpop.f32.mrf.mxu0  ;;  %v722_v17 = vpop.f32.mrf.mxu1  ;;  %v1146_v23 = vmax.f32 %v602_v59, %v1018_v7  ;;  %v1148_v27 = vmax.f32 %v715_v61, %v1020_v11 }
 0x121   :  { %v1026_v16 = vmul.f32 0.2, %v606_v9  ;;  %v1153_v19 = vmax.f32 %v604_v1, %v1025_v8  ;;  %v1028_v20 = vmul.f32 0.2, %v719_v13  ;;  %v1155_v24 = vmax.f32 %v717_v4, %v1027_v12  ;;  %v2744_v4 = vld [vmem:[#allocation8 + $0x1b0] sm:$0xff]   ;;  %v2747_v12 = vld [vmem:[#allocation8 + $0x1e8] sm:$0xff]  }
 0x122   :  { %v611_v21 = vpop.f32.mrf.mxu0  ;;  %v724_v26 = vpop.f32.mrf.mxu1  ;;  %v3041_v29 = vadd.f32 %v609_v14, %v3018_v52  ;;  %v3047_v22 = vadd.f32 %v722_v17, %v3027_v55 }
 0x123   :  { %v1154_v25 = vmax.f32 %v606_v9, %v1026_v16  ;;  %v3038_v6 = vadd.f32 %v611_v21, %v3021_v0  ;;  %v1156_v28 = vmax.f32 %v719_v13, %v1028_v20  ;;  %v3044_v30 = vadd.f32 %v724_v26, %v3024_v54 }
 0x124   :  { %v613_v31 = vpop.f32.mrf.mxu0  ;;  %v726_v34 = vpop.f32.mrf.mxu1  ;;  %v1273_v37 = vpack.c.bf16 %v1153_v19, %v1145_v18  ;;  %v1275_v43 = vpack.c.bf16 %v1155_v24, %v1147_v32  ;;  %v1033_v51 = vmul.f32 0.2, %v3041_v29  ;;  %v1035_v59 = vmul.f32 0.2, %v3047_v22  ;;  %v2746_v24 = vld [vmem:[#allocation8 + $0x128] sm:$0xff]  }
 0x125   :  { %v614_v33 = vadd.f32 %v613_v31, %v3018_v52  ;;  %v1274_v35 = vpack.c.bf16 %v1154_v25, %v1146_v23  ;;  %v3051_v39 = vadd.f32 %v726_v34, %v3027_v55  ;;  %v1276_v38 = vpack.c.bf16 %v1156_v28, %v1148_v27 }
 0x126   :  { %v615_v40 = vpop.f32.mrf.mxu0  ;;  %v1034_v44 = vmul.f32 0.2, %v3038_v6  ;;  %v728_v49 = vpop.f32.mrf.mxu1  ;;  %v1036_v53 = vmul.f32 0.2, %v3044_v30  ;;  %v1161_v13 = vmax.f32 %v3041_v29, %v1033_v51  ;;  %v1163_v18 = vmax.f32 %v3047_v22, %v1035_v59  ;;  %v2748_v29 = vld [vmem:[#allocation8 + $0x1a8] sm:$0xff]   ;;  %v2753_v51 = vld [vmem:[#allocation8 + $0x158] sm:$0xff]  }
 0x127   :  { %v1041_v45 = vmul.f32 0.2, %v614_v33  ;;  %v616_v47 = vadd.f32 %v615_v40, %v3021_v0  ;;  %1888 = vmatprep.mubr.bf16.mxu0 %v1274_v35  ;;  %v1043_v56 = vmul.f32 0.2, %v3051_v39  ;;  %v729_v57 = vadd.f32 %v728_v49, %v3024_v54  ;;  %1985 = vmatprep.mubr.bf16.mxu1 %v1276_v38  ;;  %v2751_v35 = vld [vmem:[#allocation8 + $0x1e0] sm:$0xff]  }
 0x128   :  { %v619_v58 = vpop.f32.mrf.mxu0  ;;  %1889 = vmatmul.mubr.bf16.vlgmr.msra.gmra.mxu0 %v1273_v37  ;;  %v732_v61 = vpop.f32.mrf.mxu1  ;;  %1986 = vmatmul.mubr.bf16.vlgmr.msra.gmra.mxu1 %v1275_v43  ;;  %v1162_v7 = vmax.f32 %v3038_v6, %v1034_v44  ;;  %v1164_v14 = vmax.f32 %v3044_v30, %v1036_v53  ;;  %v2749_v30 = vld [vmem:[#allocation8 + $0x160] sm:$0xff]  }
 0x129   :  { %v1042_v60 = vmul.f32 0.2, %v616_v47  ;;  %2560 = vmatpush3.bf16.msra.mxu0 %v2738_v36  ;;  %v1169_v63 = vmax.f32 %v614_v33, %v1041_v45  ;;  %v1044_v1 = vmul.f32 0.2, %v729_v57  ;;  %v3061_v2 = vadd.f32 %v619_v58, %v3018_v52  ;;  %2624 = vmatpush3.bf16.msra.mxu1 %v2740_v41  ;;  %v2750_v43 = vld [vmem:[#allocation8 + $0x120] sm:$0xff]  }
 0x12a   :  { %v621_v3 = vpop.f32.mrf.mxu0  ;;  %2561 = vmatprep.subr.bf16.mxu0 %v2741_v42  ;;  %v1171_v8 = vmax.f32 %v3051_v39, %v1043_v56  ;;  %v734_v11 = vpop.f32.mrf.mxu1  ;;  %2625 = vmatprep.subr.bf16.mxu1 %v2743_v50  ;;  %v3075_v19 = vadd.f32 %v732_v61, %v3027_v55  ;;  %v2752_v50 = vld [vmem:[#allocation8 + $0x1a0] sm:$0xff]  }
 0x12b   :  { %v1170_v9 = vmax.f32 %v616_v47, %v1042_v60  ;;  %v3066_v10 = vadd.f32 %v621_v3, %v3021_v0  ;;  %v1172_v15 = vmax.f32 %v729_v57, %v1044_v1  ;;  %v3071_v16 = vadd.f32 %v734_v11, %v3024_v54  ;;  %v2755_v60 = vld [vmem:[#allocation8 + $0x1d8] sm:$0xff]  }
 0x12c   :  { %v623_v17 = vpop.f32.mrf.mxu0  ;;  %v736_v21 = vpop.f32.mrf.mxu1  ;;  %v1049_v25 = vmul.f32 0.2, %v3061_v2  ;;  %v1281_v28 = vpack.c.bf16 %v1169_v63, %v1161_v13  ;;  %v1283_v34 = vpack.c.bf16 %v1171_v8, %v1163_v18  ;;  %v1051_v38 = vmul.f32 0.2, %v3075_v19 }
 0x12d   :  { %v3078_v20 = vadd.f32 %v623_v17, %v3018_v52  ;;  %v1282_v23 = vpack.c.bf16 %v1170_v9, %v1162_v7  ;;  %2562 = vmatpush3.bf16.msra.mxu0 %v2742_v62  ;;  %v3082_v6 = vadd.f32 %v736_v21, %v3027_v55  ;;  %v1284_v27 = vpack.c.bf16 %v1172_v15, %v1164_v14  ;;  %v2754_v9 = vld [vmem:[#allocation8 + $0x118] sm:$0xff]   ;;  %v2757_v15 = vld [vmem:[#allocation8 + $0x150] sm:$0xff]  }
 0x12e   :  { %v625_v26 = vpop.f32.mrf.mxu0  ;;  %2626 = vmatpush3.bf16.msra.mxu1 %v2744_v4  ;;  %2563 = vmatprep.subr.bf16.mxu0 %v2745_v5  ;;  %v1050_v31 = vmul.f32 0.2, %v3066_v10  ;;  %v738_v33 = vpop.f32.mrf.mxu1  ;;  %v1052_v36 = vmul.f32 0.2, %v3071_v16  ;;  %v1177_v44 = vmax.f32 %v3061_v2, %v1049_v25  ;;  %v1179_v3 = vmax.f32 %v3075_v19, %v1051_v38  ;;  %v2756_v14 = vld [vmem:[#allocation8 + $0x198] sm:$0xff]   ;;  %v2759_v21 = vld [vmem:[#allocation8 + $0x1d0] sm:$0xff]  }
 0x12f   :  { %v1057_v32 = vmul.f32 0.2, %v3078_v20  ;;  %v626_v22 = vadd.f32 %v625_v26, %v3021_v0  ;;  %1896 = vmatprep.mubr.bf16.mxu0 %v1282_v23  ;;  %2627 = vmatprep.subr.bf16.mxu1 %v2747_v12  ;;  %v1059_v37 = vmul.f32 0.2, %v3082_v6  ;;  %v739_v39 = vadd.f32 %v738_v33, %v3024_v54 }
 0x130   :  { %1993 = vmatprep.mubr.bf16.mxu1 %v1284_v27  ;;  %v629_v40 = vpop.f32.mrf.mxu0  ;;  %1897 = vmatmul.mubr.bf16.gmra.mxu0 %v1281_v28  ;;  %v742_v42 = vpop.f32.mrf.mxu1  ;;  %v1178_v53 = vmax.f32 %v3066_v10, %v1050_v31  ;;  %v1180_v61 = vmax.f32 %v3071_v16, %v1052_v36 }
 0x131   :  { %v1058_v41 = vmul.f32 0.2, %v626_v22  ;;  %1994 = vmatmul.mubr.bf16.gmra.mxu1 %v1283_v34  ;;  %2564 = vmatpush3.bf16.msra.mxu0 %v2746_v24  ;;  %v1185_v45 = vmax.f32 %v3078_v20, %v1057_v32  ;;  %v1060_v47 = vmul.f32 0.2, %v739_v39  ;;  %v1187_v56 = vmax.f32 %v3082_v6, %v1059_v37  ;;  %v2760_v34 = vld [vmem:[#allocation8 + $0x190] sm:$0xff]  }
 0x132   :  { %v631_v49 = vpop.f32.mrf.mxu0  ;;  %2628 = vmatpush3.bf16.msra.mxu1 %v2748_v29  ;;  %2565 = vmatprep.subr.bf16.mxu0 %v2749_v30  ;;  %v744_v59 = vpop.f32.mrf.mxu1  ;;  %v3100_v63 = vadd.f32 %v629_v40, %v3018_v52  ;;  %v3107_v4 = vadd.f32 %v742_v42, %v3027_v55  ;;  %v2758_v30 = vld [vmem:[#allocation8 + $0x110] sm:$0xff]  }
 0x133   :  { %v1186_v57 = vmax.f32 %v626_v22, %v1058_v41  ;;  %v3096_v58 = vadd.f32 %v631_v49, %v3021_v0  ;;  %2629 = vmatprep.subr.bf16.mxu1 %v2751_v35  ;;  %v1188_v62 = vmax.f32 %v739_v39, %v1060_v47  ;;  %v3103_v1 = vadd.f32 %v744_v59, %v3024_v54  ;;  %v2761_v35 = vld [vmem:[#allocation8 + $0x148] sm:$0xff]  }
 0x134   :  { %v633_v2 = vpop.f32.mrf.mxu0  ;;  %v746_v7 = vpop.f32.mrf.mxu1  ;;  %v1289_v13 = vpack.c.bf16 %v1185_v45, %v1177_v44  ;;  %v1291_v20 = vpack.c.bf16 %v1187_v56, %v1179_v3  ;;  %v1065_v23 = vmul.f32 0.2, %v3100_v63  ;;  %v1067_v27 = vmul.f32 0.2, %v3107_v4  ;;  %v2763_v41 = vld [vmem:[#allocation8 + $0x1c8] sm:$0xff]  }
 0x135   :  { %v3110_v5 = vadd.f32 %v633_v2, %v3018_v52  ;;  %v1290_v8 = vpack.c.bf16 %v1186_v57, %v1178_v53  ;;  %2566 = vmatpush3.bf16.msra.mxu0 %v2750_v43  ;;  %v3113_v10 = vadd.f32 %v746_v7, %v3027_v55  ;;  %v1292_v12 = vpack.c.bf16 %v1188_v62, %v1180_v61  ;;  %v2762_v57 = vld [vmem:[#allocation8 + $0x108] sm:$0xff]  }
 0x136   :  { %v635_v11 = vpop.f32.mrf.mxu0  ;;  %2630 = vmatpush3.bf16.msra.mxu1 %v2752_v50  ;;  %2567 = vmatprep.subr.bf16.mxu0 %v2753_v51  ;;  %v1066_v16 = vmul.f32 0.2, %v3096_v58  ;;  %v748_v19 = vpop.f32.mrf.mxu1  ;;  %v1068_v24 = vmul.f32 0.2, %v3103_v1  ;;  %v1193_v42 = vmax.f32 %v3100_v63, %v1065_v23  ;;  %v1195_v49 = vmax.f32 %v3107_v4, %v1067_v27  ;;  %v2764_v63 = vld [vmem:[#allocation8 + $0x188] sm:$0xff]  }
 0x137   :  { %v1073_v17 = vmul.f32 0.2, %v3110_v5  ;;  %v636_v18 = vadd.f32 %v635_v11, %v3021_v0  ;;  %1904 = vmatprep.mubr.bf16.mxu0 %v1290_v8  ;;  %2631 = vmatprep.subr.bf16.mxu1 %v2755_v60  ;;  %v1075_v25 = vmul.f32 0.2, %v3113_v10  ;;  %v749_v6 = vadd.f32 %v748_v19, %v3024_v54  ;;  %v2767_v8 = vld [vmem:[#allocation8 + $0x1c0] sm:$0xff]  }
 0x138   :  { %2001 = vmatprep.mubr.bf16.mxu1 %v1292_v12  ;;  %v639_v26 = vpop.f32.mrf.mxu0  ;;  %1905 = vmatmul.mubr.bf16.gmra.mxu0 %v1289_v13  ;;  %v752_v29 = vpop.f32.mrf.mxu1  ;;  %v1194_v36 = vmax.f32 %v3096_v58, %v1066_v16  ;;  %v1196_v43 = vmax.f32 %v3103_v1, %v1068_v24  ;;  %v2765_v1 = vld [vmem:[#allocation8 + $0x140] sm:$0xff]  }
 0x139   :  { %v1074_v28 = vmul.f32 0.2, %v636_v18  ;;  %2002 = vmatmul.mubr.bf16.gmra.mxu1 %v1291_v20  ;;  %2568 = vmatpush3.bf16.msra.mxu0 %v2754_v9  ;;  %v1201_v31 = vmax.f32 %v3110_v5, %v1073_v17  ;;  %v1076_v32 = vmul.f32 0.2, %v749_v6  ;;  %v3125_v22 = vadd.f32 %v639_v26, %v3018_v52  ;;  %v2766_v16 = vld [vmem:[#allocation8 + $0x100] sm:$0xff]  }
 0x13a   :  { %v641_v33 = vpop.f32.mrf.mxu0  ;;  %2632 = vmatpush3.bf16.msra.mxu1 %v2756_v14  ;;  %2569 = vmatprep.subr.bf16.mxu0 %v2757_v15  ;;  %v1203_v37 = vmax.f32 %v3113_v10, %v1075_v25  ;;  %v754_v38 = vpop.f32.mrf.mxu1  ;;  %v3139_v50 = vadd.f32 %v752_v29, %v3027_v55 }
 0x13b   :  { %v1202_v39 = vmax.f32 %v636_v18, %v1074_v28  ;;  %v3130_v40 = vadd.f32 %v641_v33, %v3021_v0  ;;  %2633 = vmatprep.subr.bf16.mxu1 %v2759_v21  ;;  %v1204_v44 = vmax.f32 %v749_v6, %v1076_v32  ;;  %v3135_v45 = vadd.f32 %v754_v38, %v3024_v54  ;;  %v2768_v21 = vld [vmem:[#allocation8 + $0x180] sm:$0xff]  }
 0x13c   :  { %v643_v47 = vpop.f32.mrf.mxu0  ;;  %v756_v53 = vpop.f32.mrf.mxu1  ;;  %v1081_v58 = vmul.f32 0.2, %v3125_v22  ;;  %v1297_v62 = vpack.c.bf16 %v1201_v31, %v1193_v42  ;;  %v1299_v7 = vpack.c.bf16 %v1203_v37, %v1195_v49  ;;  %v1083_v13 = vmul.f32 0.2, %v3139_v50 }
 0x13d   :  { %v644_v51 = vadd.f32 %v643_v47, %v3018_v52  ;;  %v1298_v56 = vpack.c.bf16 %v1202_v39, %v1194_v36  ;;  %2570 = vmatpush3.bf16.msra.mxu0 %v2758_v30  ;;  %v3144_v59 = vadd.f32 %v756_v53, %v3027_v55  ;;  %v1300_v61 = vpack.c.bf16 %v1204_v44, %v1196_v43 }
 0x13e   :  { %v645_v60 = vpop.f32.mrf.mxu0  ;;  %2634 = vmatpush3.bf16.msra.mxu1 %v2760_v34  ;;  %2571 = vmatprep.subr.bf16.mxu0 %v2761_v35  ;;  %v1082_v2 = vmul.f32 0.2, %v3130_v40  ;;  %v758_v5 = vpop.f32.mrf.mxu1  ;;  %v1084_v9 = vmul.f32 0.2, %v3135_v45  ;;  %v1209_v17 = vmax.f32 %v3125_v22, %v1081_v58  ;;  %v1211_v32 = vmax.f32 %v3139_v50, %v1083_v13 }
 0x13f   :  { %v1089_v3 = vmul.f32 0.2, %v644_v51  ;;  %v646_v4 = vadd.f32 %v645_v60, %v3021_v0  ;;  %1912 = vmatprep.mubr.bf16.mxu0 %v1298_v56  ;;  %2635 = vmatprep.subr.bf16.mxu1 %v2763_v41  ;;  %v1091_v10 = vmul.f32 0.2, %v3144_v59  ;;  %v759_v11 = vadd.f32 %v758_v5, %v3024_v54 }
 0x140   :  { %2009 = vmatprep.mubr.bf16.mxu1 %v1300_v61  ;;  %v649_v12 = vpop.f32.mrf.mxu0  ;;  %1913 = vmatmul.mubr.bf16.gmra.mxu0 %v1297_v62  ;;  %v762_v15 = vpop.f32.mrf.mxu1  ;;  %v1210_v23 = vmax.f32 %v3130_v40, %v1082_v2  ;;  %v1212_v27 = vmax.f32 %v3135_v45, %v1084_v9  ;;  %v175_v58 = vsub.s32 4, %v3009_v46 }
 0x141   :  { %v1090_v14 = vmul.f32 0.2, %v646_v4  ;;  %2010 = vmatmul.mubr.bf16.gmra.mxu1 %v1299_v7  ;;  %2572 = vmatpush3.bf16.msra.mxu0 %v2762_v57  ;;  %v1217_v18 = vmax.f32 %v644_v51, %v1089_v3  ;;  %v1092_v19 = vmul.f32 0.2, %v759_v11  ;;  %v1219_v24 = vmax.f32 %v3144_v59, %v1091_v10 }
 0x142   :  { %v651_v20 = vpop.f32.mrf.mxu0  ;;  %2636 = vmatpush3.bf16.msra.mxu1 %v2764_v63  ;;  %2573 = vmatprep.subr.bf16.mxu0 %v2765_v1  ;;  %v764_v26 = vpop.f32.mrf.mxu1  ;;  %v650_v29 = vadd.f32 %v649_v12, %v3018_v52  ;;  %v763_v22 = vadd.f32 %v762_v15, %v3027_v55  ;;  %v179_v63 = vsub.s32 5, %v3009_v46 }
 0x143   :  { %v1218_v25 = vmax.f32 %v646_v4, %v1090_v14  ;;  %v652_v6 = vadd.f32 %v651_v20, %v3021_v0  ;;  %2637 = vmatprep.subr.bf16.mxu1 %v2767_v8  ;;  %v1220_v28 = vmax.f32 %v759_v11, %v1092_v19  ;;  %v765_v30 = vadd.f32 %v764_v26, %v3024_v54 }
 0x144   :  { %v653_v31 = vpop.f32.mrf.mxu0  ;;  %v766_v34 = vpop.f32.mrf.mxu1  ;;  %v1305_v40 = vpack.c.bf16 %v1217_v18, %v1209_v17  ;;  %v1307_v44 = vpack.c.bf16 %v1219_v24, %v1211_v32  ;;  %v1097_v45 = vmul.f32 0.2, %v650_v29  ;;  %v1099_v53 = vmul.f32 0.2, %v763_v22 }
 0x145   :  { %v654_v33 = vadd.f32 %v653_v31, %v3018_v52  ;;  %v1306_v35 = vpack.c.bf16 %v1218_v25, %v1210_v23  ;;  %2574 = vmatpush3.bf16.msra.mxu0 %v2766_v16  ;;  %v767_v36 = vadd.f32 %v766_v34, %v3027_v55  ;;  %v1308_v39 = vpack.c.bf16 %v1220_v28, %v1212_v27 }
 0x146   :  { %v655_v37 = vpop.f32.mrf.mxu0  ;;  %2638 = vmatpush3.bf16.msra.mxu1 %v2768_v21  ;;  %v1098_v38 = vmul.f32 0.2, %v652_v6  ;;  %v768_v43 = vpop.f32.mrf.mxu1  ;;  %v1100_v47 = vmul.f32 0.2, %v765_v30  ;;  %v1225_v7 = vmax.f32 %v650_v29, %v1097_v45  ;;  %v1227_v12 = vmax.f32 %v763_v22, %v1099_v53 }
 0x147   :  { %v1105_v41 = vmul.f32 0.2, %v654_v33  ;;  %v656_v42 = vadd.f32 %v655_v37, %v3021_v0  ;;  %1920 = vmatprep.mubr.bf16.mxu0 %v1306_v35  ;;  %v1107_v49 = vmul.f32 0.2, %v767_v36  ;;  %v769_v50 = vadd.f32 %v768_v43, %v3024_v54  ;;  %2017 = vmatprep.mubr.bf16.mxu1 %v1308_v39 }
 0x148   :  { %v659_v51 = vpop.f32.mrf.mxu0  ;;  %1921 = vmatmul.mubr.bf16.gmra.mxu0 %v1305_v40  ;;  %v772_v57 = vpop.f32.mrf.mxu1  ;;  %v1226_v1 = vmax.f32 %v652_v6, %v1098_v38  ;;  %v1228_v8 = vmax.f32 %v765_v30, %v1100_v47  ;;  %v183_v31 = vsub.s32 6, %v3009_v46  ;;  %v3180_v34 = vrot.slane %v3012_v48, %v175_v58 }
 0x149   :  { %v1106_v56 = vmul.f32 0.2, %v656_v42  ;;  %2018 = vmatmul.mubr.bf16.gmra.mxu1 %v1307_v44  ;;  %v1233_v59 = vmax.f32 %v654_v33, %v1105_v41  ;;  %v1108_v60 = vmul.f32 0.2, %v769_v50  ;;  %v3167_v61 = vadd.f32 %v659_v51, %v3018_v52 }
 0x14a   :  { %v661_v62 = vpop.f32.mrf.mxu0  ;;  %v1235_v2 = vmax.f32 %v767_v36, %v1107_v49  ;;  %v774_v5 = vpop.f32.mrf.mxu1  ;;  %v773_v13 = vadd.f32 %v772_v57, %v3027_v55  ;;  %v187_v35 = vsub.s32 7, %v3009_v46  ;;  %v3185_v38 = vrot.slane %v3012_v48, %v179_v63 }
 0x14b   :  { %v1234_v3 = vmax.f32 %v656_v42, %v1106_v56  ;;  %v662_v4 = vadd.f32 %v661_v62, %v3021_v0  ;;  %v1236_v9 = vmax.f32 %v769_v50, %v1108_v60  ;;  %v775_v10 = vadd.f32 %v774_v5, %v3024_v54 }
 0x14c   :  { %v663_v11 = vpop.f32.mrf.mxu0  ;;  %v776_v15 = vpop.f32.mrf.mxu1  ;;  %v1113_v17 = vmul.f32 0.2, %v3167_v61  ;;  %v1313_v21 = vpack.c.bf16 %v1233_v59, %v1225_v7  ;;  %v1315_v26 = vpack.c.bf16 %v1235_v2, %v1227_v12  ;;  %v1115_v32 = vmul.f32 0.2, %v773_v13 }
 0x14d   :  { %v664_v14 = vadd.f32 %v663_v11, %v3018_v52  ;;  %v1314_v16 = vpack.c.bf16 %v1234_v3, %v1226_v1  ;;  %v777_v18 = vadd.f32 %v776_v15, %v3027_v55  ;;  %v1316_v20 = vpack.c.bf16 %v1236_v9, %v1228_v8 }
 0x14e   :  { %v665_v19 = vpop.f32.mrf.mxu0  ;;  %v1114_v23 = vmul.f32 0.2, %v662_v4  ;;  %v778_v6 = vpop.f32.mrf.mxu1  ;;  %v1116_v27 = vmul.f32 0.2, %v775_v10  ;;  %v1241_v36 = vmax.f32 %v3167_v61, %v1113_v17  ;;  %v1243_v53 = vmax.f32 %v773_v13, %v1115_v32 }
 0x14f   :  { %v1121_v24 = vmul.f32 0.2, %v664_v14  ;;  %v666_v25 = vadd.f32 %v665_v19, %v3021_v0  ;;  %1928 = vmatprep.mubr.bf16.mxu0 %v1314_v16  ;;  %v1123_v28 = vmul.f32 0.2, %v777_v18  ;;  %v779_v29 = vadd.f32 %v778_v6, %v3024_v54  ;;  %2025 = vmatprep.mubr.bf16.mxu1 %v1316_v20 }
 0x150   :  { %v669_v30 = vpop.f32.mrf.mxu0  ;;  %1929 = vmatmul.mubr.bf16.gmra.mxu0 %v1313_v21  ;;  %v782_v33 = vpop.f32.mrf.mxu1  ;;  %v1242_v41 = vmax.f32 %v662_v4, %v1114_v23  ;;  %v1244_v47 = vmax.f32 %v775_v10, %v1116_v27  ;;  %v3194_v1 = vrot.slane %v3012_v48, %v187_v35  ;;  %v3199_v13 = vrot.slane %v3012_v48, %v183_v31 }
 0x151   :  { %v1122_v22 = vmul.f32 0.2, %v666_v25  ;;  %2026 = vmatmul.mubr.bf16.gmra.mxu1 %v1315_v26  ;;  %v1249_v37 = vmax.f32 %v664_v14, %v1121_v24  ;;  %v1124_v39 = vmul.f32 0.2, %v779_v29  ;;  %v1251_v42 = vmax.f32 %v777_v18, %v1123_v28 }
 0x152   :  { %v671_v40 = vpop.f32.mrf.mxu0  ;;  %v784_v45 = vpop.f32.mrf.mxu1  ;;  %v670_v50 = vadd.f32 %v669_v30, %v3018_v52  ;;  %v783_v56 = vadd.f32 %v782_v33, %v3027_v55 }
 0x153   :  { %v1250_v43 = vmax.f32 %v666_v25, %v1122_v22  ;;  %v672_v44 = vadd.f32 %v671_v40, %v3021_v0  ;;  %v1252_v49 = vmax.f32 %v779_v29, %v1124_v39  ;;  %v785_v46 = vadd.f32 %v784_v45, %v3024_v54 }
 0x154   :  { %v673_v51 = vpop.f32.mrf.mxu0  ;;  %v786_v58 = vpop.f32.mrf.mxu1  ;;  %v1321_v63 = vpack.c.bf16 %v1249_v37, %v1241_v36  ;;  %v1323_v7 = vpack.c.bf16 %v1251_v42, %v1243_v53  ;;  %v1129_v8 = vmul.f32 0.2, %v670_v50  ;;  %v1131_v11 = vmul.f32 0.2, %v783_v56 }
 0x155   :  { %v674_v57 = vadd.f32 %v673_v51, %v3018_v52  ;;  %v1322_v59 = vpack.c.bf16 %v1250_v43, %v1242_v41  ;;  %v787_v60 = vadd.f32 %v786_v58, %v3027_v55  ;;  %v1324_v62 = vpack.c.bf16 %v1252_v49, %v1244_v47 }
 0x156   :  { %v675_v61 = vpop.f32.mrf.mxu0  ;;  %v1130_v2 = vmul.f32 0.2, %v672_v44  ;;  %v788_v5 = vpop.f32.mrf.mxu1  ;;  %v1132_v9 = vmul.f32 0.2, %v785_v46  ;;  %v1257_v23 = vmax.f32 %v670_v50, %v1129_v8  ;;  %v1259_v26 = vmax.f32 %v783_v56, %v1131_v11 }
 0x157   :  { %v1137_v3 = vmul.f32 0.2, %v674_v57  ;;  %v676_v4 = vadd.f32 %v675_v61, %v3021_v0  ;;  %1936 = vmatprep.mubr.bf16.mxu0 %v1322_v59  ;;  %v1139_v52 = vmul.f32 0.2, %v787_v60  ;;  %v789_v10 = vadd.f32 %v788_v5, %v3024_v54  ;;  %2033 = vmatprep.mubr.bf16.mxu1 %v1324_v62 }
 0x158   :  { %v825_v55 = vpop.f32.mrf.mxu0  ;;  %1937 = vmatmul.mubr.bf16.gmra.mxu0 %v1321_v63  ;;  %v938_v14 = vpop.f32.mrf.mxu1  ;;  %v1258_v18 = vmax.f32 %v672_v44, %v1130_v2  ;;  %v1260_v24 = vmax.f32 %v785_v46, %v1132_v9 }
 0x159   :  { %v1138_v12 = vmul.f32 0.2, %v676_v4  ;;  %2034 = vmatmul.mubr.bf16.gmra.mxu1 %v1323_v7  ;;  %v1265_v15 = vmax.f32 %v674_v57, %v1137_v3  ;;  %v1140_v0 = vmul.f32 0.2, %v789_v10  ;;  %v826_v16 = vadd.f32 %v825_v55, %v3180_v34 }
 0x15a   :  { %v827_v17 = vpop.f32.mrf.mxu0  ;;  %v1267_v19 = vmax.f32 %v787_v60, %v1139_v52  ;;  %v940_v21 = vpop.f32.mrf.mxu1  ;;  %v939_v27 = vadd.f32 %v938_v14, %v3199_v13 }
 0x15b   :  { %v1266_v20 = vmax.f32 %v676_v4, %v1138_v12  ;;  %v828_v54 = vadd.f32 %v827_v17, %v3185_v38  ;;  %v1268_v25 = vmax.f32 %v789_v10, %v1140_v0  ;;  %v941_v6 = vadd.f32 %v940_v21, %v3194_v1 }
 0x15c   :  { %v829_v48 = vpop.f32.mrf.mxu0  ;;  %v942_v29 = vpop.f32.mrf.mxu1  ;;  %v1021_v31 = vmul.f32 0.2, %v826_v16  ;;  %v1329_v35 = vpack.c.bf16 %v1265_v15, %v1257_v23  ;;  %v1331_v41 = vpack.c.bf16 %v1267_v19, %v1259_v26  ;;  %v1023_v47 = vmul.f32 0.2, %v939_v27 }
 0x15d   :  { %v830_v28 = vadd.f32 %v829_v48, %v3180_v34  ;;  %v1330_v30 = vpack.c.bf16 %v1266_v20, %v1258_v18  ;;  %v943_v32 = vadd.f32 %v942_v29, %v3199_v13  ;;  %v1332_v33 = vpack.c.bf16 %v1268_v25, %v1260_v24 }
 0x15e   :  { %v831_v22 = vpop.f32.mrf.mxu0  ;;  %v1022_v36 = vmul.f32 0.2, %v828_v54  ;;  %v944_v40 = vpop.f32.mrf.mxu1  ;;  %v1024_v42 = vmul.f32 0.2, %v941_v6  ;;  %v1149_v46 = vmax.f32 %v826_v16, %v1021_v31  ;;  %v1151_v5 = vmax.f32 %v939_v27, %v1023_v47 }
 0x15f   :  { %v1029_v37 = vmul.f32 0.2, %v830_v28  ;;  %v832_v39 = vadd.f32 %v831_v22, %v3185_v38  ;;  %1944 = vmatprep.mubr.bf16.mxu0 %v1330_v30  ;;  %v1031_v43 = vmul.f32 0.2, %v943_v32  ;;  %v945_v44 = vadd.f32 %v944_v40, %v3194_v1  ;;  %2041 = vmatprep.mubr.bf16.mxu1 %v1332_v33 }
 0x160   :  { %v835_v45 = vpop.f32.mrf.mxu0  ;;  %1945 = vmatmul.mubr.bf16.gmra.mxu0 %v1329_v35  ;;  %v948_v50 = vpop.f32.mrf.mxu1  ;;  %v1150_v57 = vmax.f32 %v828_v54, %v1022_v36  ;;  %v1152_v62 = vmax.f32 %v941_v6, %v1024_v42 }
 0x161   :  { %v1030_v49 = vmul.f32 0.2, %v832_v39  ;;  %2042 = vmatmul.mubr.bf16.gmra.mxu1 %v1331_v41  ;;  %v1157_v51 = vmax.f32 %v830_v28, %v1029_v37  ;;  %v1032_v53 = vmul.f32 0.2, %v945_v44  ;;  %v1159_v58 = vmax.f32 %v943_v32, %v1031_v43 }
 0x162   :  { %v837_v56 = vpop.f32.mrf.mxu0  ;;  %v950_v61 = vpop.f32.mrf.mxu1  ;;  %v836_v2 = vadd.f32 %v835_v45, %v3180_v34  ;;  %v949_v7 = vadd.f32 %v948_v50, %v3199_v13 }
 0x163   :  { %v1158_v59 = vmax.f32 %v832_v39, %v1030_v49  ;;  %v838_v60 = vadd.f32 %v837_v56, %v3185_v38  ;;  %v1160_v63 = vmax.f32 %v945_v44, %v1032_v53  ;;  %v951_v3 = vadd.f32 %v950_v61, %v3194_v1 }
 0x164   :  { %v839_v4 = vpop.f32.mrf.mxu0  ;;  %v952_v9 = vpop.f32.mrf.mxu1  ;;  %v1277_v10 = vpack.c.bf16 %v1157_v51, %v1149_v46  ;;  %v1279_v14 = vpack.c.bf16 %v1159_v58, %v1151_v5  ;;  %v1037_v18 = vmul.f32 0.2, %v836_v2  ;;  %v1039_v23 = vmul.f32 0.2, %v949_v7 }
 0x165   :  { %v840_v8 = vadd.f32 %v839_v4, %v3180_v34  ;;  %v1278_v52 = vpack.c.bf16 %v1158_v59, %v1150_v57  ;;  %v953_v55 = vadd.f32 %v952_v9, %v3199_v13  ;;  %v1280_v12 = vpack.c.bf16 %v1160_v63, %v1152_v62 }
 0x166   :  { %v841_v11 = vpop.f32.mrf.mxu0  ;;  %v1038_v15 = vmul.f32 0.2, %v838_v60  ;;  %v954_v17 = vpop.f32.mrf.mxu1  ;;  %v1040_v19 = vmul.f32 0.2, %v951_v3  ;;  %v1165_v22 = vmax.f32 %v836_v2, %v1037_v18  ;;  %v1167_v39 = vmax.f32 %v949_v7, %v1039_v23 }
 0x167   :  { %v1045_v0 = vmul.f32 0.2, %v840_v8  ;;  %v842_v16 = vadd.f32 %v841_v11, %v3185_v38  ;;  %2082 = vmatprep.mubr.bf16.mxu0 %v1278_v52  ;;  %v1047_v20 = vmul.f32 0.2, %v953_v55  ;;  %v955_v54 = vadd.f32 %v954_v17, %v3194_v1  ;;  %2179 = vmatprep.mubr.bf16.mxu1 %v1280_v12 }
 0x168   :  { %v845_v21 = vpop.f32.mrf.mxu0  ;;  %2083 = vmatmul.mubr.bf16.vlgmr.msra.gmra.mxu0 %v1277_v10  ;;  %v958_v25 = vpop.f32.mrf.mxu1  ;;  %v1166_v28 = vmax.f32 %v838_v60, %v1038_v15  ;;  %v1168_v33 = vmax.f32 %v951_v3, %v1040_v19 }
 0x169   :  { %v1046_v24 = vmul.f32 0.2, %v842_v16  ;;  %2180 = vmatmul.mubr.bf16.vlgmr.msra.gmra.mxu1 %v1279_v14  ;;  %v1173_v6 = vmax.f32 %v840_v8, %v1045_v0  ;;  %v1048_v48 = vmul.f32 0.2, %v955_v54  ;;  %v846_v26 = vadd.f32 %v845_v21, %v3180_v34 }
 0x16a   :  { %v847_v27 = vpop.f32.mrf.mxu0  ;;  %v1175_v29 = vmax.f32 %v953_v55, %v1047_v20  ;;  %v960_v32 = vpop.f32.mrf.mxu1  ;;  %v959_v40 = vadd.f32 %v958_v25, %v3199_v13 }
 0x16b   :  { %v1174_v30 = vmax.f32 %v842_v16, %v1046_v24  ;;  %v848_v31 = vadd.f32 %v847_v27, %v3185_v38  ;;  %v1176_v35 = vmax.f32 %v955_v54, %v1048_v48  ;;  %v961_v36 = vadd.f32 %v960_v32, %v3194_v1 }
 0x16c   :  { %v849_v37 = vpop.f32.mrf.mxu0  ;;  %v962_v42 = vpop.f32.mrf.mxu1  ;;  %v1053_v44 = vmul.f32 0.2, %v846_v26  ;;  %v1285_v50 = vpack.c.bf16 %v1173_v6, %v1165_v22  ;;  %v1287_v57 = vpack.c.bf16 %v1175_v29, %v1167_v39  ;;  %v1055_v62 = vmul.f32 0.2, %v959_v40 }
 0x16d   :  { %v850_v41 = vadd.f32 %v849_v37, %v3180_v34  ;;  %v1286_v43 = vpack.c.bf16 %v1174_v30, %v1166_v28  ;;  %v963_v45 = vadd.f32 %v962_v42, %v3199_v13  ;;  %v1288_v49 = vpack.c.bf16 %v1176_v35, %v1168_v33 }
 0x16e   :  { %v851_v47 = vpop.f32.mrf.mxu0  ;;  %v1054_v46 = vmul.f32 0.2, %v848_v31  ;;  %v964_v56 = vpop.f32.mrf.mxu1  ;;  %v1056_v58 = vmul.f32 0.2, %v961_v36  ;;  %v1181_v3 = vmax.f32 %v846_v26, %v1053_v44  ;;  %v1183_v16 = vmax.f32 %v959_v40, %v1055_v62 }
 0x16f   :  { %v1061_v51 = vmul.f32 0.2, %v850_v41  ;;  %v852_v53 = vadd.f32 %v851_v47, %v3185_v38  ;;  %2090 = vmatprep.mubr.bf16.mxu0 %v1286_v43  ;;  %v1063_v59 = vmul.f32 0.2, %v963_v45  ;;  %v965_v60 = vadd.f32 %v964_v56, %v3194_v1  ;;  %2187 = vmatprep.mubr.bf16.mxu1 %v1288_v49 }
 0x170   :  { %v855_v61 = vpop.f32.mrf.mxu0  ;;  %2091 = vmatmul.mubr.bf16.gmra.mxu0 %v1285_v50  ;;  %v968_v2 = vpop.f32.mrf.mxu1  ;;  %v1182_v8 = vmax.f32 %v848_v31, %v1054_v46  ;;  %v1184_v11 = vmax.f32 %v961_v36, %v1056_v58 }
 0x171   :  { %v1062_v63 = vmul.f32 0.2, %v852_v53  ;;  %2188 = vmatmul.mubr.bf16.gmra.mxu1 %v1287_v57  ;;  %v1189_v4 = vmax.f32 %v850_v41, %v1061_v51  ;;  %v1064_v5 = vmul.f32 0.2, %v965_v60  ;;  %v1191_v9 = vmax.f32 %v963_v45, %v1063_v59 }
 0x172   :  { %v857_v7 = vpop.f32.mrf.mxu0  ;;  %v970_v55 = vpop.f32.mrf.mxu1  ;;  %v856_v14 = vadd.f32 %v855_v61, %v3180_v34  ;;  %v969_v17 = vadd.f32 %v968_v2, %v3199_v13 }
 0x173   :  { %v1190_v52 = vmax.f32 %v852_v53, %v1062_v63  ;;  %v858_v10 = vadd.f32 %v857_v7, %v3185_v38  ;;  %v1192_v12 = vmax.f32 %v965_v60, %v1064_v5  ;;  %v971_v15 = vadd.f32 %v970_v55, %v3194_v1 }
 0x174   :  { %v859_v0 = vpop.f32.mrf.mxu0  ;;  %v972_v19 = vpop.f32.mrf.mxu1  ;;  %v1293_v24 = vpack.c.bf16 %v1189_v4, %v1181_v3  ;;  %v1295_v27 = vpack.c.bf16 %v1191_v9, %v1183_v16  ;;  %v1069_v28 = vmul.f32 0.2, %v856_v14  ;;  %v1071_v22 = vmul.f32 0.2, %v969_v17 }
 0x175   :  { %v860_v18 = vadd.f32 %v859_v0, %v3180_v34  ;;  %v1294_v20 = vpack.c.bf16 %v1190_v52, %v1182_v8  ;;  %v973_v54 = vadd.f32 %v972_v19, %v3199_v13  ;;  %v1296_v23 = vpack.c.bf16 %v1192_v12, %v1184_v11 }
 0x176   :  { %v861_v21 = vpop.f32.mrf.mxu0  ;;  %v1070_v25 = vmul.f32 0.2, %v858_v10  ;;  %v974_v26 = vpop.f32.mrf.mxu1  ;;  %v1072_v29 = vmul.f32 0.2, %v971_v15  ;;  %v1197_v47 = vmax.f32 %v856_v14, %v1069_v28  ;;  %v1199_v53 = vmax.f32 %v969_v17, %v1071_v22 }
 0x177   :  { %v1077_v6 = vmul.f32 0.2, %v860_v18  ;;  %v862_v48 = vadd.f32 %v861_v21, %v3185_v38  ;;  %2098 = vmatprep.mubr.bf16.mxu0 %v1294_v20  ;;  %v1079_v30 = vmul.f32 0.2, %v973_v54  ;;  %v975_v31 = vadd.f32 %v974_v26, %v3194_v1  ;;  %2195 = vmatprep.mubr.bf16.mxu1 %v1296_v23 }
 0x178   :  { %v865_v32 = vpop.f32.mrf.mxu0  ;;  %2099 = vmatmul.mubr.bf16.gmra.mxu0 %v1293_v24  ;;  %v978_v35 = vpop.f32.mrf.mxu1  ;;  %v1198_v41 = vmax.f32 %v858_v10, %v1070_v25  ;;  %v1200_v49 = vmax.f32 %v971_v15, %v1072_v29 }
 0x179   :  { %v1078_v33 = vmul.f32 0.2, %v862_v48  ;;  %2196 = vmatmul.mubr.bf16.gmra.mxu1 %v1295_v27  ;;  %v1205_v36 = vmax.f32 %v860_v18, %v1077_v6  ;;  %v1080_v37 = vmul.f32 0.2, %v975_v31  ;;  %v866_v39 = vadd.f32 %v865_v32, %v3180_v34 }
 0x17a   :  { %v867_v40 = vpop.f32.mrf.mxu0  ;;  %v1207_v42 = vmax.f32 %v973_v54, %v1079_v30  ;;  %v980_v45 = vpop.f32.mrf.mxu1  ;;  %v979_v56 = vadd.f32 %v978_v35, %v3199_v13 }
 0x17b   :  { %v1206_v43 = vmax.f32 %v862_v48, %v1078_v33  ;;  %v868_v44 = vadd.f32 %v867_v40, %v3185_v38  ;;  %v1208_v50 = vmax.f32 %v975_v31, %v1080_v37  ;;  %v981_v46 = vadd.f32 %v980_v45, %v3194_v1 }
 0x17c   :  { %v869_v51 = vpop.f32.mrf.mxu0  ;;  %v982_v58 = vpop.f32.mrf.mxu1  ;;  %v1085_v60 = vmul.f32 0.2, %v866_v39  ;;  %v1301_v2 = vpack.c.bf16 %v1205_v36, %v1197_v47  ;;  %v1303_v8 = vpack.c.bf16 %v1207_v42, %v1199_v53  ;;  %v1087_v11 = vmul.f32 0.2, %v979_v56 }
 0x17d   :  { %v870_v57 = vadd.f32 %v869_v51, %v3180_v34  ;;  %v1302_v59 = vpack.c.bf16 %v1206_v43, %v1198_v41  ;;  %v983_v61 = vadd.f32 %v982_v58, %v3199_v13  ;;  %v1304_v63 = vpack.c.bf16 %v1208_v50, %v1200_v49 }
 0x17e   :  { %v871_v62 = vpop.f32.mrf.mxu0  ;;  %v1086_v3 = vmul.f32 0.2, %v868_v44  ;;  %v984_v7 = vpop.f32.mrf.mxu1  ;;  %v1088_v9 = vmul.f32 0.2, %v981_v46  ;;  %v1213_v15 = vmax.f32 %v866_v39, %v1085_v60  ;;  %v1215_v26 = vmax.f32 %v979_v56, %v1087_v11 }
 0x17f   :  { %v1093_v4 = vmul.f32 0.2, %v870_v57  ;;  %v872_v5 = vadd.f32 %v871_v62, %v3185_v38  ;;  %2106 = vmatprep.mubr.bf16.mxu0 %v1302_v59  ;;  %v1095_v52 = vmul.f32 0.2, %v983_v61  ;;  %v985_v10 = vadd.f32 %v984_v7, %v3194_v1  ;;  %2203 = vmatprep.mubr.bf16.mxu1 %v1304_v63 }
 0x180   :  { %v875_v55 = vpop.f32.mrf.mxu0  ;;  %2107 = vmatmul.mubr.bf16.gmra.mxu0 %v1301_v2  ;;  %v988_v14 = vpop.f32.mrf.mxu1  ;;  %v1214_v18 = vmax.f32 %v868_v44, %v1086_v3  ;;  %v1216_v23 = vmax.f32 %v981_v46, %v1088_v9 }
 0x181   :  { %v1094_v12 = vmul.f32 0.2, %v872_v5  ;;  %2204 = vmatmul.mubr.bf16.gmra.mxu1 %v1303_v8  ;;  %v1221_v0 = vmax.f32 %v870_v57, %v1093_v4  ;;  %v1096_v16 = vmul.f32 0.2, %v985_v10  ;;  %v1223_v19 = vmax.f32 %v983_v61, %v1095_v52 }
 0x182   :  { %v877_v17 = vpop.f32.mrf.mxu0  ;;  %v990_v21 = vpop.f32.mrf.mxu1  ;;  %v876_v25 = vadd.f32 %v875_v55, %v3180_v34  ;;  %v989_v27 = vadd.f32 %v988_v14, %v3199_v13 }
 0x183   :  { %v1222_v20 = vmax.f32 %v872_v5, %v1094_v12  ;;  %v878_v54 = vadd.f32 %v877_v17, %v3185_v38  ;;  %v1224_v24 = vmax.f32 %v985_v10, %v1096_v16  ;;  %v991_v6 = vadd.f32 %v990_v21, %v3194_v1 }
 0x184   :  { %v879_v48 = vpop.f32.mrf.mxu0  ;;  %v992_v29 = vpop.f32.mrf.mxu1  ;;  %v1309_v31 = vpack.c.bf16 %v1221_v0, %v1213_v15  ;;  %v1311_v35 = vpack.c.bf16 %v1223_v19, %v1215_v26  ;;  %v1101_v41 = vmul.f32 0.2, %v876_v25  ;;  %v1103_v47 = vmul.f32 0.2, %v989_v27 }
 0x185   :  { %v880_v28 = vadd.f32 %v879_v48, %v3180_v34  ;;  %v1310_v30 = vpack.c.bf16 %v1222_v20, %v1214_v18  ;;  %v993_v32 = vadd.f32 %v992_v29, %v3199_v13  ;;  %v1312_v33 = vpack.c.bf16 %v1224_v24, %v1216_v23 }
 0x186   :  { %v881_v22 = vpop.f32.mrf.mxu0  ;;  %v1102_v36 = vmul.f32 0.2, %v878_v54  ;;  %v994_v40 = vpop.f32.mrf.mxu1  ;;  %v1104_v42 = vmul.f32 0.2, %v991_v6  ;;  %v1229_v62 = vmax.f32 %v876_v25, %v1101_v41  ;;  %v1231_v5 = vmax.f32 %v989_v27, %v1103_v47 }
 0x187   :  { %v1109_v37 = vmul.f32 0.2, %v880_v28  ;;  %v882_v39 = vadd.f32 %v881_v22, %v3185_v38  ;;  %2114 = vmatprep.mubr.bf16.mxu0 %v1310_v30  ;;  %v1111_v43 = vmul.f32 0.2, %v993_v32  ;;  %v995_v44 = vadd.f32 %v994_v40, %v3194_v1  ;;  %2211 = vmatprep.mubr.bf16.mxu1 %v1312_v33 }
 0x188   :  { %v885_v45 = vpop.f32.mrf.mxu0  ;;  %2115 = vmatmul.mubr.bf16.gmra.mxu0 %v1309_v31  ;;  %v998_v50 = vpop.f32.mrf.mxu1  ;;  %v1230_v57 = vmax.f32 %v878_v54, %v1102_v36  ;;  %v1232_v63 = vmax.f32 %v991_v6, %v1104_v42 }
 0x189   :  { %v1110_v49 = vmul.f32 0.2, %v882_v39  ;;  %2212 = vmatmul.mubr.bf16.gmra.mxu1 %v1311_v35  ;;  %v1237_v46 = vmax.f32 %v880_v28, %v1109_v37  ;;  %v1112_v51 = vmul.f32 0.2, %v995_v44  ;;  %v886_v53 = vadd.f32 %v885_v45, %v3180_v34 }
 0x18a   :  { %v887_v56 = vpop.f32.mrf.mxu0  ;;  %v1239_v58 = vmax.f32 %v993_v32, %v1111_v43  ;;  %v1000_v61 = vpop.f32.mrf.mxu1  ;;  %v999_v7 = vadd.f32 %v998_v50, %v3199_v13 }
 0x18b   :  { %v1238_v59 = vmax.f32 %v882_v39, %v1110_v49  ;;  %v888_v60 = vadd.f32 %v887_v56, %v3185_v38  ;;  %v1240_v2 = vmax.f32 %v995_v44, %v1112_v51  ;;  %v1001_v3 = vadd.f32 %v1000_v61, %v3194_v1 }
 0x18c   :  { %v889_v4 = vpop.f32.mrf.mxu0  ;;  %v1002_v9 = vpop.f32.mrf.mxu1  ;;  %v1317_v10 = vpack.c.bf16 %v1237_v46, %v1229_v62  ;;  %v1117_v55 = vmul.f32 0.2, %v886_v53  ;;  %v1319_v15 = vpack.c.bf16 %v1239_v58, %v1231_v5  ;;  %v1119_v23 = vmul.f32 0.2, %v999_v7 }
 0x18d   :  { %v890_v8 = vadd.f32 %v889_v4, %v3180_v34  ;;  %v1318_v52 = vpack.c.bf16 %v1238_v59, %v1230_v57  ;;  %v1003_v11 = vadd.f32 %v1002_v9, %v3199_v13  ;;  %v1320_v14 = vpack.c.bf16 %v1240_v2, %v1232_v63 }
 0x18e   :  { %v891_v12 = vpop.f32.mrf.mxu0  ;;  %v1118_v0 = vmul.f32 0.2, %v888_v60  ;;  %v1004_v18 = vpop.f32.mrf.mxu1  ;;  %v1120_v19 = vmul.f32 0.2, %v1001_v3  ;;  %v1245_v6 = vmax.f32 %v886_v53, %v1117_v55  ;;  %v1247_v39 = vmax.f32 %v999_v7, %v1119_v23 }
 0x18f   :  { %v1125_v16 = vmul.f32 0.2, %v890_v8  ;;  %v892_v17 = vadd.f32 %v891_v12, %v3185_v38  ;;  %2122 = vmatprep.mubr.bf16.mxu0 %v1318_v52  ;;  %v1127_v20 = vmul.f32 0.2, %v1003_v11  ;;  %v1005_v54 = vadd.f32 %v1004_v18, %v3194_v1  ;;  %2219 = vmatprep.mubr.bf16.mxu1 %v1320_v14 }
 0x190   :  { %v895_v21 = vpop.f32.mrf.mxu0  ;;  %2123 = vmatmul.mubr.bf16.gmra.mxu0 %v1317_v10  ;;  %v1008_v25 = vpop.f32.mrf.mxu1  ;;  %v1246_v28 = vmax.f32 %v888_v60, %v1118_v0  ;;  %v1248_v22 = vmax.f32 %v1001_v3, %v1120_v19 }
 0x191   :  { %v1126_v24 = vmul.f32 0.2, %v892_v17  ;;  %2220 = vmatmul.mubr.bf16.gmra.mxu1 %v1319_v15  ;;  %v1253_v48 = vmax.f32 %v890_v8, %v1125_v16  ;;  %v1128_v26 = vmul.f32 0.2, %v1005_v54  ;;  %v1255_v29 = vmax.f32 %v1003_v11, %v1127_v20 }
 0x192   :  { %v897_v27 = vpop.f32.mrf.mxu0  ;;  %v1010_v32 = vpop.f32.mrf.mxu1  ;;  %v896_v35 = vadd.f32 %v895_v21, %v3180_v34  ;;  %v1009_v40 = vadd.f32 %v1008_v25, %v3199_v13 }
 0x193   :  { %v1254_v30 = vmax.f32 %v892_v17, %v1126_v24  ;;  %v898_v31 = vadd.f32 %v897_v27, %v3185_v38  ;;  %v1256_v33 = vmax.f32 %v1005_v54, %v1128_v26  ;;  %v1011_v36 = vadd.f32 %v1010_v32, %v3194_v1 }
 0x194   :  { %v899_v37 = vpop.f32.mrf.mxu0  ;;  %v1012_v42 = vpop.f32.mrf.mxu1  ;;  %v1325_v44 = vpack.c.bf16 %v1253_v48, %v1245_v6  ;;  %v1327_v50 = vpack.c.bf16 %v1255_v29, %v1247_v39  ;;  %v1133_v57 = vmul.f32 0.2, %v896_v35 }
 0x195   :  { %v900_v41 = vadd.f32 %v899_v37, %v3180_v34  ;;  %v1326_v43 = vpack.c.bf16 %v1254_v30, %v1246_v28  ;;  %v1013_v45 = vadd.f32 %v1012_v42, %v3199_v13  ;;  %v1328_v49 = vpack.c.bf16 %v1256_v33, %v1248_v22 }
 0x196   :  { %v901_v47 = vpop.f32.mrf.mxu0  ;;  %v1134_v46 = vmul.f32 0.2, %v898_v31  ;;  %v1014_v56 = vpop.f32.mrf.mxu1  ;;  %v1136_v58 = vmul.f32 0.2, %v1011_v36  ;;  %v1135_v34 = vmul.f32 0.2, %v1009_v40  ;;  %v1261_v4 = vmax.f32 %v896_v35, %v1133_v57 }
 0x197   :  { %v1141_v51 = vmul.f32 0.2, %v900_v41  ;;  %v902_v53 = vadd.f32 %v901_v47, %v3185_v38  ;;  %2130 = vmatprep.mubr.bf16.mxu0 %v1326_v43  ;;  %v1143_v59 = vmul.f32 0.2, %v1013_v45  ;;  %v1015_v60 = vadd.f32 %v1014_v56, %v3194_v1  ;;  %2227 = vmatprep.mubr.bf16.mxu1 %v1328_v49 }
 0x198   :  { %2131 = vmatmul.mubr.bf16.gmra.mxu0 %v1325_v44  ;;  %v1262_v63 = vmax.f32 %v898_v31, %v1134_v46  ;;  %v1264_v5 = vmax.f32 %v1011_v36, %v1136_v58  ;;  %v1263_v7 = vmax.f32 %v1009_v40, %v1135_v34 }
 0x199   :  { %v1142_v61 = vmul.f32 0.2, %v902_v53  ;;  %2228 = vmatmul.mubr.bf16.gmra.mxu1 %v1327_v50  ;;  %v1269_v13 = vmax.f32 %v900_v41, %v1141_v51  ;;  %v1144_v62 = vmul.f32 0.2, %v1015_v60  ;;  %v1271_v2 = vmax.f32 %v1013_v45, %v1143_v59 }
 0x19b   :  { %v1270_v3 = vmax.f32 %v902_v53, %v1142_v61  ;;  %v1272_v38 = vmax.f32 %v1015_v60, %v1144_v62  ;;  %v1333_v9 = vpack.c.bf16 %v1269_v13, %v1261_v4  ;;  %v1335_v10 = vpack.c.bf16 %v1271_v2, %v1263_v7 }
 0x19d   :  { %v1334_v8 = vpack.c.bf16 %v1270_v3, %v1262_v63  ;;  %v1336_v52 = vpack.c.bf16 %v1272_v38, %v1264_v5 }
 0x19f   :  { %2138 = vmatprep.mubr.bf16.mxu0 %v1334_v8  ;;  %2235 = vmatprep.mubr.bf16.mxu1 %v1336_v52 }
 0x1a0   :  { %2139 = vmatmul.mubr.bf16.gmra.mxu0 %v1333_v9  ;;  %v3380_v9 = vld [vmem:[%s3473_s4] ss:$0 sm:$0xff]  ;;  %s2886_s4 = smov [#allocation10]  }
 0x1a1   :  { %2236 = vmatmul.mubr.bf16.gmra.mxu1 %v1335_v10  ;;  %s2283_s15 = sshll.u32 %s2886_s4, 4  ;;  %s2284_s15 = int_to_ptr.vmem [resolvable:$true] %s2283_s15 }
 0x1a2   :  { %s2849_s16 = scalar_lea.vmem %s2284_s15, 16  ;;  %s2853_s17 = scalar_lea.vmem %s2284_s15, 32 }
 0x1a3   :  { %p2850_p6 = scmp.ne.s32.totalorder %s2284_s15, %s2849_s16  ;;  %p2854_p7 = scmp.lt.s32.totalorder %s2284_s15, %s2284_s15 }
 0x1a4   :  { %p2855_p8 = scmp.lt.s32.totalorder %s2853_s17, %s2849_s16 }
 0x1a6   :  { %p2856_p9 = por %p2855_p8, %p2854_p7 }
 0x1a8   :  { %p2857_p10 = pnand %p2856_p9, %p2850_p6 }
 0x1e8   :  { %v2447_v1 = vpop.f32.mrf.mxu0  ;;  %v3265_v55 = vpop.f32.mrf.mxu1 }
 0x1ea   :  { %v2448_v11 = vpop.f32.mrf.mxu0  ;;  %v3267_v12 = vpop.f32.mrf.mxu1 }
 0x1eb   :  { %v2449_v7 = vadd.f32 %v2448_v11, %v2447_v1  ;;  %v2513_v1 = vadd.f32 %v3267_v12, %v3265_v55 }
 0x1ec   :  { %v2450_v14 = vpop.f32.mrf.mxu0  ;;  %v3269_v15 = vpop.f32.mrf.mxu1 }
 0x1ee   :  { %v2451_v0 = vpop.f32.mrf.mxu0  ;;  %v3271_v16 = vpop.f32.mrf.mxu1 }
 0x1f0   :  { %v3273_v17 = vpop.f32.mrf.mxu0 }
 0x1f1   :  { %v3275_v18 = vpop.f32.mrf.mxu1 }
 0x1f2   :  { %v3277_v19 = vpop.f32.mrf.mxu0 }
 0x1f3   :  { %v3279_v20 = vpop.f32.mrf.mxu1 }
 0x1f4   :  { %v3281_v54 = vpop.f32.mrf.mxu0 }
 0x1f5   :  { %v3283_v21 = vpop.f32.mrf.mxu1 }
 0x1f6   :  { %v3285_v23 = vpop.f32.mrf.mxu0 }
 0x1f7   :  { %v3287_v24 = vpop.f32.mrf.mxu1  ;;  %v2458_v12 = vadd.f32 %v3285_v23, %v3281_v54 }
 0x1f8   :  { %v3289_v25 = vpop.f32.mrf.mxu0 }
 0x1f9   :  { %v3291_v6 = vpop.f32.mrf.mxu1 }
 0x1fa   :  { %v3293_v48 = vpop.f32.mrf.mxu0 }
 0x1fb   :  { %v3295_v26 = vpop.f32.mrf.mxu1 }
 0x1fc   :  { %v3297_v27 = vpop.f32.mrf.mxu0 }
 0x1fd   :  { %v3299_v28 = vpop.f32.mrf.mxu1 }
 0x1fe   :  { %v3301_v29 = vpop.f32.mrf.mxu0 }
 0x1ff   :  { %v3303_v30 = vpop.f32.mrf.mxu1 }
 0x200   :  { %v3305_v31 = vpop.f32.mrf.mxu0 }
 0x201   :  { %v3307_v32 = vpop.f32.mrf.mxu1 }
 0x202   :  { %v3309_v22 = vpop.f32.mrf.mxu0 }
 0x203   :  { %v3311_v33 = vpop.f32.mrf.mxu1 }
 0x204   :  { %v3313_v35 = vpop.f32.mrf.mxu0 }
 0x205   :  { %v3315_v36 = vpop.f32.mrf.mxu1 }
 0x206   :  { %v3317_v37 = vpop.f32.mrf.mxu0 }
 0x207   :  { %v3319_v39 = vpop.f32.mrf.mxu1 }
 0x208   :  { %v3321_v40 = vpop.f32.mrf.mxu0 }
 0x209   :  { %v3323_v41 = vpop.f32.mrf.mxu1 }
 0x20a   :  { %v3325_v42 = vpop.f32.mrf.mxu0 }
 0x20b   :  { %v3327_v43 = vpop.f32.mrf.mxu1 }
 0x20c   :  { %v3329_v44 = vpop.f32.mrf.mxu0 }
 0x20d   :  { %v3331_v45 = vpop.f32.mrf.mxu1 }
 0x20e   :  { %v3333_v47 = vpop.f32.mrf.mxu0 }
 0x20f   :  { %v3335_v49 = vpop.f32.mrf.mxu1 }
 0x210   :  { %v3337_v50 = vpop.f32.mrf.mxu0 }
 0x211   :  { %v3339_v46 = vpop.f32.mrf.mxu1 }
 0x212   :  { %v3341_v51 = vpop.f32.mrf.mxu0 }
 0x213   :  { %v3343_v53 = vpop.f32.mrf.mxu1 }
 0x214   :  { %v3345_v56 = vpop.f32.mrf.mxu0 }
 0x215   :  { %v3347_v57 = vpop.f32.mrf.mxu1 }
 0x216   :  { %v3349_v58 = vpop.f32.mrf.mxu0 }
 0x217   :  { %v3351_v59 = vpop.f32.mrf.mxu1 }
 0x218   :  { %3475 = vst [vmem:[#allocation15_spill] sm:$0xff] %v3351_v59  ;;  %v3353_v60 = vpop.f32.mrf.mxu0 }
 0x219   :  { %v3355_v34 = vpop.f32.mrf.mxu1 }
 0x21a   :  { %3476 = vst [vmem:[#allocation16_spill] sm:$0xff] %v3355_v34  ;;  %v3357_v61 = vpop.f32.mrf.mxu0 }
 0x21b   :  { %v3359_v13 = vpop.f32.mrf.mxu1 }
 0x21c   :  { %3477 = vst [vmem:[#allocation17_spill] sm:$0xff] %v3359_v13  ;;  %v3361_v62 = vpop.f32.mrf.mxu0 }
 0x21d   :  { %3478 = vst [vmem:[#allocation18_spill] sm:$0xff] %v3361_v62  ;;  %v3363_v63 = vpop.f32.mrf.mxu1 }
 0x21e   :  { %3479 = vst [vmem:[#allocation19_spill] sm:$0xff] %v3363_v63  ;;  %v3365_v2 = vpop.f32.mrf.mxu0  ;;  %v2452_v63 = vadd.f32 %v2451_v0, %v2450_v14  ;;  %v2516_v0 = vadd.f32 %v3271_v16, %v3269_v15 }
 0x21f   :  { %3480 = vst [vmem:[#allocation20_spill] sm:$0xff] %v3365_v2  ;;  %v3367_v3 = vpop.f32.mrf.mxu1 }
 0x220   :  { %3481 = vst [vmem:[#allocation21_spill] sm:$0xff] %v3367_v3  ;;  %v3369_v4 = vpop.f32.mrf.mxu0 }
 0x221   :  { %3482 = vst [vmem:[#allocation22_spill] sm:$0xff] %v3369_v4  ;;  %v3371_v5 = vpop.f32.mrf.mxu1  ;;  %v1891_v4 = vadd.f32 %v2449_v7, %v3380_v9 }
 0x222   :  { %3483 = vst [vmem:[#allocation23_spill] sm:$0xff] %v3371_v5  ;;  %v3373_v38 = vpop.f32.mrf.mxu0 }
 0x223   :  { %3484 = vst [vmem:[#allocation24_spill] sm:$0xff] %v3373_v38  ;;  %v3375_v8 = vpop.f32.mrf.mxu1  ;;  %v1988_v34 = vadd.f32 %v2513_v1, %v1891_v4 }
 0x224   :  { %3485 = vst [vmem:[#allocation25_spill] sm:$0xff] %v3375_v8  ;;  %v3382_v52 = vpop.f32.mrf.mxu0  ;;  %v1894_v8 = vadd.f32 %v2452_v63, %v3380_v9 }
 0x225   :  { %3486 = vst [vmem:[#allocation26_spill] sm:$0xff] %v3382_v52  ;;  %v3384_v10 = vpop.f32.mrf.mxu1  ;;  %v2455_v52 = vadd.f32 %v3277_v19, %v3273_v17  ;;  %v2519_v19 = vadd.f32 %v3279_v20, %v3275_v18 }
 0x226   :  { %3487 = vst [vmem:[#allocation27_spill] sm:$0xff] %v3384_v10  ;;  %v3386_v3 = vpop.f32.mrf.mxu0  ;;  %v1991_v62 = vadd.f32 %v2516_v0, %v1894_v8 }
 0x227   :  { %3488 = vst [vmem:[#allocation28_spill] sm:$0xff] %v3386_v3  ;;  %v3389_v5 = vpop.f32.mrf.mxu1  ;;  %v1899_v55 = vadd.f32 %v2455_v52, %v3380_v9  ;;  %v1902_v52 = vadd.f32 %v2458_v12, %v3380_v9 }
 0x228   :  { %3489 = vst [vmem:[#allocation29_spill] sm:$0xff] %v3389_v5  ;;  %v2575_v38 = vpop.f32.mrf.mxu0 }
 0x229   :  { %v2639_v11 = vpop.f32.mrf.mxu1  ;;  %v1996_v8 = vadd.f32 %v2519_v19, %v1899_v55 }
 0x22a   :  { %v2576_v13 = vpop.f32.mrf.mxu0 }
 0x22b   :  { %v2577_v10 = vadd.f32 %v2576_v13, %v2575_v38  ;;  %v2640_v14 = vpop.f32.mrf.mxu1 }
 0x22c   :  { %v2578_v7 = vpop.f32.mrf.mxu0  ;;  %v2641_v3 = vadd.f32 %v2640_v14, %v2639_v11 }
 0x22d   :  { %v2642_v5 = vpop.f32.mrf.mxu1  ;;  %v2085_v2 = vadd.f32 %v2577_v10, %v1988_v34  ;;  %v2461_v34 = vadd.f32 %v3293_v48, %v3289_v25  ;;  %v2464_v25 = vadd.f32 %v3301_v29, %v3297_v27 }
 0x22e   :  { %v2579_v59 = vpop.f32.mrf.mxu0 }
 0x22f   :  { %v2580_v63 = vadd.f32 %v2579_v59, %v2578_v7  ;;  %v2643_v4 = vpop.f32.mrf.mxu1  ;;  %v2182_v1 = vadd.f32 %v2641_v3, %v2085_v2  ;;  %v2522_v2 = vadd.f32 %v3287_v24, %v3283_v21  ;;  %v2525_v7 = vadd.f32 %v3295_v26, %v3291_v6 }
 0x230   :  { %v2581_v17 = vpop.f32.mrf.mxu0  ;;  %v2644_v15 = vadd.f32 %v2643_v4, %v2642_v5 }
 0x231   :  { %v2088_v13 = vadd.f32 %v2580_v63, %v1991_v62  ;;  %v2645_v16 = vpop.f32.mrf.mxu1  ;;  %2244 = vxpose.xlu0.b32.start [1/16] (narrow) %v2182_v1, 8  ;;  %v1907_v62 = vadd.f32 %v2461_v34, %v3380_v9  ;;  %v1999_v11 = vadd.f32 %v2522_v2, %v1902_v52  ;;  %v1910_v1 = vadd.f32 %v2464_v25, %v3380_v9 }
 0x232   :  { %v2582_v38 = vpop.f32.mrf.mxu0  ;;  %v2470_v34 = vadd.f32 %v3317_v37, %v3313_v35  ;;  %v2473_v35 = vadd.f32 %v3325_v42, %v3321_v40 }
 0x233   :  { %v2583_v10 = vadd.f32 %v2582_v38, %v2581_v17  ;;  %v2646_v54 = vpop.f32.mrf.mxu1  ;;  %v2185_v23 = vadd.f32 %v2644_v15, %v2088_v13  ;;  %v2004_v63 = vadd.f32 %v2525_v7, %v1907_v62  ;;  %v2467_v17 = vadd.f32 %v3309_v22, %v3305_v31 }
 0x234   :  { %v2584_v59 = vpop.f32.mrf.mxu0  ;;  %v2647_v18 = vadd.f32 %v2646_v54, %v2645_v16  ;;  %v2528_v15 = vadd.f32 %v3303_v30, %v3299_v28  ;;  %v1918_v2 = vadd.f32 %v2470_v34, %v3380_v9  ;;  %v2476_v7 = vadd.f32 %v3333_v47, %v3329_v44 }
 0x235   :  { %v2093_v3 = vadd.f32 %v2583_v10, %v1996_v8  ;;  %v2648_v20 = vpop.f32.mrf.mxu1  ;;  %2245 = vxpose.xlu0.b32.cont [2/16] (narrow) %v2185_v23, 8  ;;  %v1915_v52 = vadd.f32 %v2467_v17, %v3380_v9  ;;  %v2531_v23 = vadd.f32 %v3311_v33, %v3307_v32 }
 0x236   :  { %v2585_v5 = vpop.f32.mrf.mxu0  ;;  %v2007_v8 = vadd.f32 %v2528_v15, %v1910_v1  ;;  %v1926_v17 = vadd.f32 %v2476_v7, %v3380_v9 }
 0x237   :  { %v2586_v48 = vadd.f32 %v2585_v5, %v2584_v59  ;;  %v2649_v14 = vpop.f32.mrf.mxu1  ;;  %v2190_v0 = vadd.f32 %v2647_v18, %v2093_v3  ;;  %v2012_v18 = vadd.f32 %v2531_v23, %v1915_v52  ;;  %v2534_v5 = vadd.f32 %v3319_v39, %v3315_v36 }
 0x238   :  { %v2587_v55 = vpop.f32.mrf.mxu0  ;;  %v2650_v21 = vadd.f32 %v2649_v14, %v2648_v20 }
 0x239   :  { %v2096_v12 = vadd.f32 %v2586_v48, %v1999_v11  ;;  %v2651_v24 = vpop.f32.mrf.mxu1  ;;  %2246 = vxpose.xlu0.b32.cont [3/16] (narrow) %v2190_v0, 8  ;;  %v2015_v48 = vadd.f32 %v2534_v5, %v1918_v2  ;;  %v1923_v0 = vadd.f32 %v2473_v35, %v3380_v9 }
 0x23a   :  { %v2588_v4 = vpop.f32.mrf.mxu0 }
 0x23b   :  { %v2589_v19 = vadd.f32 %v2588_v4, %v2587_v55  ;;  %v2652_v27 = vpop.f32.mrf.mxu1  ;;  %v2193_v29 = vadd.f32 %v2650_v21, %v2096_v12  ;;  %v2537_v21 = vadd.f32 %v3327_v43, %v3323_v41 }
 0x23c   :  { %v2590_v13 = vpop.f32.mrf.mxu0  ;;  %v2653_v26 = vadd.f32 %v2652_v27, %v2651_v24 }
 0x23d   :  { %v2101_v6 = vadd.f32 %v2589_v19, %v2004_v63  ;;  %v2654_v16 = vpop.f32.mrf.mxu1  ;;  %2247 = vxpose.xlu0.b32.cont [4/16] (narrow) %v2193_v29, 8  ;;  %v2479_v63 = vadd.f32 %v3341_v51, %v3337_v50  ;;  %v2020_v1 = vadd.f32 %v2537_v21, %v1923_v0  ;;  %v2540_v29 = vadd.f32 %v3335_v49, %v3331_v45 }
 0x23e   :  { %v2591_v38 = vpop.f32.mrf.mxu0  ;;  %v2482_v50 = vadd.f32 %v3349_v58, %v3345_v56 }
 0x23f   :  { %v2592_v10 = vadd.f32 %v2591_v38, %v2590_v13  ;;  %v2655_v31 = vpop.f32.mrf.mxu1  ;;  %v2198_v22 = vadd.f32 %v2653_v26, %v2101_v6  ;;  %v1931_v15 = vadd.f32 %v2479_v63, %v3380_v9  ;;  %v2023_v26 = vadd.f32 %v2540_v29, %v1926_v17  ;;  %v3498_v63 = vld [vmem:[#allocation21_spill] sm:$0xff] }
 0x240   :  { %v2593_v54 = vpop.f32.mrf.mxu0  ;;  %v2656_v28 = vadd.f32 %v2655_v31, %v2654_v16  ;;  %v2543_v38 = vadd.f32 %v3343_v53, %v3339_v46 }
 0x241   :  { %v2104_v59 = vadd.f32 %v2592_v10, %v2007_v8  ;;  %v2657_v30 = vpop.f32.mrf.mxu1  ;;  %2248 = vxpose.xlu0.b32.cont [5/16] (narrow) %v2198_v22, 8  ;;  %v1934_v22 = vadd.f32 %v2482_v50, %v3380_v9 }
 0x242   :  { %v2594_v3 = vpop.f32.mrf.mxu0  ;;  %v2028_v10 = vadd.f32 %v2543_v38, %v1931_v15 }
 0x243   :  { %v2595_v37 = vadd.f32 %v2594_v3, %v2593_v54  ;;  %v2658_v20 = vpop.f32.mrf.mxu1  ;;  %v2201_v62 = vadd.f32 %v2656_v28, %v2104_v59  ;;  %v2485_v54 = vadd.f32 %v3357_v61, %v3353_v60  ;;  %v3490_v28 = vld [vmem:[#allocation15_spill] sm:$0xff]  ;;  %v3491_v3 = vld [vmem:[#allocation18_spill] sm:$0xff] }
 0x244   :  { %v2596_v11 = vpop.f32.mrf.mxu0  ;;  %v2659_v32 = vadd.f32 %v2658_v20, %v2657_v30  ;;  %v2546_v30 = vadd.f32 %v3490_v28, %v3347_v57 }
 0x245   :  { %v2109_v25 = vadd.f32 %v2595_v37, %v2012_v18  ;;  %v2660_v33 = vpop.f32.mrf.mxu1  ;;  %2249 = vxpose.xlu0.b32.cont [6/16] (narrow) %v2201_v62, 8  ;;  %v3492_v18 = vld [vmem:[#allocation20_spill] sm:$0xff]  ;;  %v1939_v62 = vadd.f32 %v2485_v54, %v3380_v9 }
 0x246   :  { %v2597_v14 = vpop.f32.mrf.mxu0  ;;  %v2488_v35 = vadd.f32 %v3492_v18, %v3491_v3  ;;  %v2031_v20 = vadd.f32 %v2546_v30, %v1934_v22 }
 0x247   :  { %v2598_v55 = vadd.f32 %v2597_v14, %v2596_v11  ;;  %v2661_v40 = vpop.f32.mrf.mxu1  ;;  %v2206_v42 = vadd.f32 %v2659_v32, %v2109_v25  ;;  %v3493_v25 = vld [vmem:[#allocation16_spill] sm:$0xff]  ;;  %v3494_v32 = vld [vmem:[#allocation17_spill] sm:$0xff] }
 0x248   :  { %v2599_v12 = vpop.f32.mrf.mxu0  ;;  %v2662_v39 = vadd.f32 %v2661_v40, %v2660_v33  ;;  %v2549_v33 = vadd.f32 %v3494_v32, %v3493_v25  ;;  %v1942_v0 = vadd.f32 %v2488_v35, %v3380_v9  ;;  %v3495_v40 = vld [vmem:[#allocation22_spill] sm:$0xff] }
 0x249   :  { %v2112_v36 = vadd.f32 %v2598_v55, %v2015_v48  ;;  %v2663_v24 = vpop.f32.mrf.mxu1  ;;  %2250 = vxpose.xlu0.b32.cont [7/16] (narrow) %v2206_v42, 8  ;;  %v3496_v42 = vld [vmem:[#allocation24_spill] sm:$0xff] }
 0x24a   :  { %v2600_v4 = vpop.f32.mrf.mxu0  ;;  %v2036_v55 = vadd.f32 %v2549_v33, %v1939_v62 }
 0x24b   :  { %v2601_v19 = vadd.f32 %v2600_v4, %v2599_v12  ;;  %v2664_v44 = vpop.f32.mrf.mxu1  ;;  %v2209_v47 = vadd.f32 %v2662_v39, %v2112_v36  ;;  %v2491_v12 = vadd.f32 %v3496_v42, %v3495_v40 }
 0x24c   :  { %v2602_v27 = vpop.f32.mrf.mxu0  ;;  %v2665_v41 = vadd.f32 %v2664_v44, %v2663_v24  ;;  %v3497_v24 = vld [vmem:[#allocation19_spill] sm:$0xff] }
 0x24d   :  { %v2117_v13 = vadd.f32 %v2601_v19, %v2020_v1  ;;  %v2666_v43 = vpop.f32.mrf.mxu1  ;;  %2251 = vxpose.xlu0.b32.cont [8/16] (narrow) %v2209_v47, 8  ;;  %v2552_v4 = vadd.f32 %v3498_v63, %v3497_v24  ;;  %v1947_v29 = vadd.f32 %v2491_v12, %v3380_v9 }
 0x24e   :  { %v2603_v6 = vpop.f32.mrf.mxu0 }
 0x24f   :  { %v2604_v51 = vadd.f32 %v2603_v6, %v2602_v27  ;;  %v2667_v16 = vpop.f32.mrf.mxu1  ;;  %v2214_v34 = vadd.f32 %v2665_v41, %v2117_v13  ;;  %v2039_v47 = vadd.f32 %v2552_v4, %v1942_v0  ;;  %v3499_v13 = vld [vmem:[#allocation26_spill] sm:$0xff]  ;;  %v3500_v41 = vld [vmem:[#allocation28_spill] sm:$0xff] }
 0x250   :  { %v2605_v8 = vpop.f32.mrf.mxu0  ;;  %v2668_v45 = vadd.f32 %v2667_v16, %v2666_v43  ;;  %v2494_v43 = vadd.f32 %v3500_v41, %v3499_v13  ;;  %v3502_v16 = vld [vmem:[#allocation25_spill] sm:$0xff] }
 0x251   :  { %v2120_v52 = vadd.f32 %v2604_v51, %v2023_v26  ;;  %v2669_v49 = vpop.f32.mrf.mxu1  ;;  %2252 = vxpose.xlu0.b32.cont [9/16] (narrow) %v2214_v34, 8  ;;  %v3501_v51 = vld [vmem:[#allocation23_spill] sm:$0xff] }
 0x252   :  { %v2606_v31 = vpop.f32.mrf.mxu0  ;;  %v2555_v34 = vadd.f32 %v3502_v16, %v3501_v51 }
 0x253   :  { %v2607_v23 = vadd.f32 %v2606_v31, %v2605_v8  ;;  %v2670_v56 = vpop.f32.mrf.mxu1  ;;  %v2217_v58 = vadd.f32 %v2668_v45, %v2120_v52 }
 0x254   :  { %v2608_v59 = vpop.f32.mrf.mxu0  ;;  %v2671_v53 = vadd.f32 %v2670_v56, %v2669_v49  ;;  %v2044_v49 = vadd.f32 %v2555_v34, %v1947_v29  ;;  %v3503_v56 = vld [vmem:[#allocation27_spill] sm:$0xff] }
 0x255   :  { %v2125_v46 = vadd.f32 %v2607_v23, %v2028_v10  ;;  %v2672_v2 = vpop.f32.mrf.mxu1  ;;  %2253 = vxpose.xlu0.b32.cont [10/16] (narrow) %v2217_v58, 8  ;;  %v1950_v10 = vadd.f32 %v2494_v43, %v3380_v9  ;;  %v3504_v58 = vld [vmem:[#allocation29_spill] sm:$0xff] }
 0x256   :  { %v2609_v37 = vpop.f32.mrf.mxu0 }
 0x257   :  { %v2610_v5 = vadd.f32 %v2609_v37, %v2608_v59  ;;  %v2673_v60 = vpop.f32.mrf.mxu1  ;;  %v2222_v61 = vadd.f32 %v2671_v53, %v2125_v46  ;;  %v2558_v59 = vadd.f32 %v3504_v58, %v3503_v56 }
 0x258   :  { %v2611_v11 = vpop.f32.mrf.mxu0  ;;  %v2674_v57 = vadd.f32 %v2673_v60, %v2672_v2 }
 0x259   :  { %v2128_v48 = vadd.f32 %v2610_v5, %v2031_v20  ;;  %v2675_v14 = vpop.f32.mrf.mxu1  ;;  %2254 = vxpose.xlu0.b32.cont [11/16] (narrow) %v2222_v61, 8  ;;  %v2047_v2 = vadd.f32 %v2558_v59, %v1950_v10 }
 0x25a   :  { %v2612_v7 = vpop.f32.mrf.mxu0 }
 0x25b   :  { %v2613_v21 = vadd.f32 %v2612_v7, %v2611_v11  ;;  %v2676_v36 = vpop.f32.mrf.mxu1  ;;  %v2225_v39 = vadd.f32 %v2674_v57, %v2128_v48 }
 0x25c   :  { %v2614_v1 = vpop.f32.mrf.mxu0  ;;  %v2677_v19 = vadd.f32 %v2676_v36, %v2675_v14 }
 0x25d   :  { %v2133_v17 = vadd.f32 %v2613_v21, %v2036_v55  ;;  %v2678_v44 = vpop.f32.mrf.mxu1  ;;  %2255 = vxpose.xlu0.b32.cont [12/16] (narrow) %v2225_v39, 8 }
 0x25e   :  { %v2615_v27 = vpop.f32.mrf.mxu0 }
 0x25f   :  { %v2616_v15 = vadd.f32 %v2615_v27, %v2614_v1  ;;  %v2679_v6 = vpop.f32.mrf.mxu1  ;;  %v2230_v26 = vadd.f32 %v2677_v19, %v2133_v17 }
 0x260   :  { %v2617_v50 = vpop.f32.mrf.mxu0  ;;  %v2680_v8 = vadd.f32 %v2679_v6, %v2678_v44 }
 0x261   :  { %v2136_v38 = vadd.f32 %v2616_v15, %v2039_v47  ;;  %v2681_v52 = vpop.f32.mrf.mxu1  ;;  %2256 = vxpose.xlu0.b32.cont [13/16] (narrow) %v2230_v26, 8 }
 0x262   :  { %v2618_v45 = vpop.f32.mrf.mxu0 }
 0x263   :  { %v2619_v31 = vadd.f32 %v2618_v45, %v2617_v50  ;;  %v2682_v22 = vpop.f32.mrf.mxu1  ;;  %v2233_v54 = vadd.f32 %v2680_v8, %v2136_v38 }
 0x264   :  { %v2620_v23 = vpop.f32.mrf.mxu0  ;;  %v2683_v30 = vadd.f32 %v2682_v22, %v2681_v52 }
 0x265   :  { %v2141_v28 = vadd.f32 %v2619_v31, %v2044_v49  ;;  %v2684_v46 = vpop.f32.mrf.mxu1  ;;  %2257 = vxpose.xlu0.b32.cont [14/16] (narrow) %v2233_v54, 8 }
 0x266   :  { %v2621_v53 = vpop.f32.mrf.mxu0 }
 0x267   :  { %v2622_v3 = vadd.f32 %v2621_v53, %v2620_v23  ;;  %v2685_v18 = vpop.f32.mrf.mxu1  ;;  %v2238_v35 = vadd.f32 %v2683_v30, %v2141_v28 }
 0x268   :  { %v2686_v20 = vadd.f32 %v2685_v18, %v2684_v46 }
 0x269   :  { %v2144_v37 = vadd.f32 %v2622_v3, %v2047_v2  ;;  %2258 = vxpose.xlu0.b32.cont [15/16] (narrow) %v2238_v35, 8 }
 0x26b   :  { %v2241_v9 = vadd.f32 %v2686_v20, %v2144_v37 }
 0x26d   :  { %2259 = vxpose.xlu0.b32.end [16/16] (narrow) %v2241_v9, 8 }
 0x2ad   :  { %v2260_v62 = vpop.trf.xlu0 }
 0x2ae   :  { %2276 = vst [vmem:[#allocation10] sm:$0x1] %v2260_v62 }
 0x2af   :  { %2860 = shalt.err (!%p2857_p10)
}
 0x2b0   :  { %2286 = dma.vmem_to_hbm [thread:$0]  %s2284_s15, 16, %s3474_s5, [#allocation4]  }
 0x2b1   :  { %2875 = dma.done.wait [#allocation4], 16  }
 0x2b2   :  { %2876 = vsyncadd [#allocation4], 4294967280 }
 0x2b3   :  { %2290 = vsyncpa [#allocation3], 1 }
 0x2b4   :  { %2291 = vsyncpa [#allocation6], 1 }
 0x2b5   :  { %2292 = vsyncpa [#allocation9], 1 }
 0x2b6   :  { %2293 = vsyncpa [#allocation4], 1 }

</bundles_post_ra>
